<compile_context>
chip_gen: v6e
topology: v6e:2x2x1
jax: 0.10.0
libtpu: 0.0.40
codegen_flags: <defaults>
</compile_context>

<pallas_src>
import functools

import jax
import jax.numpy as jnp
import numpy as np
from jax.experimental import pallas as pl
from jax.experimental.pallas import tpu as pltpu


def _cnn_kernel(N, C_in, C_out, K, CBLK,
                taps_ref, wc_ref, bc_ref, w1_ref, b1_ref, g_ref, bt_ref,
                w2_ref, b2_ref, out_ref, flat_ref, acc_ref):
    j = pl.program_id(0)

    @pl.when(j == 0)
    def _():
        # Conv1d(k=4, s=1, p=2) + ReLU + MaxPool1d(k=3, s=2), split in even/odd phases.
        # taps_ref: (6, C_in, N, CBLK) f32 = [xe, xo, xe>>1, xo>>1, xe>>2, xo>>2]
        # conv@2i   = w0*xe[i]   + w1*xo[i]   + w2*xe[i+1] + w3*xo[i+1]
        # conv@2i+1 = w0*xo[i]   + w1*xe[i+1] + w2*xo[i+1] + w3*xe[i+2]
        # conv@2i+2 = w0*xe[i+1] + w1*xo[i+1] + w2*xe[i+2] + w3*xo[i+2]
        # pooled[i] = max(relu(conv@2i), relu(conv@2i+1), relu(conv@2i+2))
        for co in range(C_out):
            e0 = jnp.zeros((N, CBLK), jnp.float32)
            o0 = jnp.zeros((N, CBLK), jnp.float32)
            e1 = jnp.zeros((N, CBLK), jnp.float32)
            for ci in range(C_in):
                xe0 = taps_ref[0, ci]
                xo0 = taps_ref[1, ci]
                xe1 = taps_ref[2, ci]
                xo1 = taps_ref[3, ci]
                xe2 = taps_ref[4, ci]
                xo2 = taps_ref[5, ci]
                base = (co * C_in + ci) * K
                w0 = wc_ref[base + 0]
                w1 = wc_ref[base + 1]
                w2 = wc_ref[base + 2]
                w3 = wc_ref[base + 3]
                e0 = e0 + w0 * xe0 + w1 * xo0 + w2 * xe1 + w3 * xo1
                o0 = o0 + w0 * xo0 + w1 * xe1 + w2 * xo1 + w3 * xe2
                e1 = e1 + w0 * xe1 + w1 * xo1 + w2 * xe2 + w3 * xo2
            b = bc_ref[co]
            e0 = jnp.maximum(e0 + b, 0.0)
            o0 = jnp.maximum(o0 + b, 0.0)
            e1 = jnp.maximum(e1 + b, 0.0)
            pooled = jnp.maximum(jnp.maximum(e0, o0), e1)        # (N, CBLK)
            # 256-lane-aligned padded flat layout; cols >= 250 hit zero W1 rows.
            flat_ref[:, co * CBLK:(co + 1) * CBLK] = pooled.astype(flat_ref.dtype)
        acc_ref[...] = jnp.broadcast_to(b2_ref[...], acc_ref.shape)   # init with fc2 bias

    # FC1 chunk: (N, C_out*CBLK) x (C_out*CBLK, FBLK), bf16 MXU, f32 accumulation.
    h = jnp.dot(flat_ref[...], w1_ref[...], preferred_element_type=jnp.float32)
    h = jnp.maximum(h + b1_ref[...], 0.0)

    # BatchNorm1d (training mode): per-feature batch mean, biased variance, eps=1e-5.
    # (Running-stat updates are optimizer-side state; they do not affect the output.)
    mu = jnp.mean(h, axis=0, keepdims=True)
    var = jnp.mean((h - mu) * (h - mu), axis=0, keepdims=True)
    hn = (h - mu) * jax.lax.rsqrt(var + 1e-5)
    hn = hn * g_ref[...] + bt_ref[...]

    # FC2 partial sum over this hidden-feature chunk.
    acc_ref[...] += jnp.dot(hn.astype(w2_ref.dtype), w2_ref[...],
                            preferred_element_type=jnp.float32)

    @pl.when(j == pl.num_programs(0) - 1)
    def _():
        out_ref[...] = acc_ref[...]


def make_params(key, c_in, c_out=4, k=4, hid=512, out_dim=500, pool_len=250):
    ks = jax.random.split(key, 6)
    conv_w = jax.random.normal(ks[0], (c_out, c_in, k), jnp.float32) / np.sqrt(c_in * k)
    conv_b = 0.1 * jax.random.normal(ks[1], (c_out,), jnp.float32)
    fc1_w = jax.random.normal(ks[2], (hid, c_out * pool_len), jnp.float32) / np.sqrt(c_out * pool_len)
    fc1_b = 0.1 * jax.random.normal(ks[3], (hid,), jnp.float32)
    gamma = jnp.ones((hid,), jnp.float32)    # BatchNorm init: weight=1, bias=0
    beta = jnp.zeros((hid,), jnp.float32)
    fc2_w = jax.random.normal(ks[4], (out_dim, hid), jnp.float32) / np.sqrt(hid)
    fc2_b = 0.1 * jax.random.normal(ks[5], (out_dim,), jnp.float32)
    return (conv_w, conv_b, fc1_w, fc1_b, gamma, beta, fc2_w, fc2_b)


@jax.jit
def cnn_forward(x, params):
    conv_w, conv_b, fc1_w, fc1_b, gamma, beta, fc2_w, fc2_b = params
    N, C_in, L = x.shape
    C_out, _, K = conv_w.shape
    HID = fc1_w.shape[0]
    OUT = fc2_w.shape[0]
    POOL = fc1_w.shape[1] // C_out

    CBLK = 256                               # lane-padded per-channel pooled width
    FBLK = 256                               # hidden-feature chunk streamed per grid step
    assert HID % FBLK == 0
    NF = HID // FBLK
    OUT_PAD = ((OUT + 127) // 128) * 128     # lane-dense output (500 -> 512)

    # --- conv input: zero-pad (padding=2), even/odd phases, lane-shifted taps ---
    xpad = jnp.pad(x, ((0, 0), (0, 0), (2, 2)))          # (N, C_in, L+4)
    xe = xpad[:, :, 0::2]                                 # (N, C_in, (L+4)//2)
    xo = xpad[:, :, 1::2]

    def tap(a, s):
        v = a[:, :, s:]
        v = jnp.pad(v, ((0, 0), (0, 0), (0, CBLK - v.shape[2])))
        return v.transpose(1, 0, 2)                       # (C_in, N, CBLK)

    taps = jnp.stack([tap(xe, 0), tap(xo, 0), tap(xe, 1),
                      tap(xo, 1), tap(xe, 2), tap(xo, 2)], axis=0)   # (6,C_in,N,CBLK)

    wc = conv_w.reshape(C_out * C_in * K).astype(jnp.float32)        # SMEM scalars
    bc = conv_b.astype(jnp.float32)                                  # (C_out,) SMEM

    # --- FC1 weight: W1[f, co*POOL+i] -> padded, transposed [co*CBLK+i, f], bf16 ---
    w1r = fc1_w.reshape(HID, C_out, POOL).transpose(1, 2, 0)         # (C_out, POOL, HID)
    w1p = jnp.zeros((C_out, CBLK, HID), jnp.float32).at[:, :POOL, :].set(w1r)
    w1p = w1p.reshape(C_out * CBLK, HID).astype(jnp.bfloat16)
    b1 = fc1_b.reshape(1, HID).astype(jnp.float32)
    g = gamma.reshape(1, HID).astype(jnp.float32)
    bt = beta.reshape(1, HID).astype(jnp.float32)

    # --- FC2 weight: transpose + pad output lanes to OUT_PAD, bf16 ---
    w2p = jnp.zeros((HID, OUT_PAD), jnp.float32).at[:, :OUT].set(fc2_w.T).astype(jnp.bfloat16)
    b2 = jnp.zeros((1, OUT_PAD), jnp.float32).at[:, :OUT].set(fc2_b.reshape(1, OUT))

    kernel = functools.partial(_cnn_kernel, N, C_in, C_out, K, CBLK)
    smem = pl.BlockSpec(memory_space=pltpu.MemorySpace.SMEM)

    out = pl.pallas_call(
        kernel,
        out_shape=jax.ShapeDtypeStruct((N, OUT_PAD), jnp.float32),
        grid=(NF,),
        in_specs=[
            pl.BlockSpec((6, C_in, N, CBLK), lambda j: (0, 0, 0, 0)),   # taps (resident)
            smem,                                                        # conv weights (scalars)
            smem,                                                        # conv bias (scalars)
            pl.BlockSpec((C_out * CBLK, FBLK), lambda j: (0, j)),        # W1 column chunk (streamed)
            pl.BlockSpec((1, FBLK), lambda j: (0, j)),                   # b1 chunk
            pl.BlockSpec((1, FBLK), lambda j: (0, j)),                   # gamma chunk
            pl.BlockSpec((1, FBLK), lambda j: (0, j)),                   # beta chunk
            pl.BlockSpec((FBLK, OUT_PAD), lambda j: (j, 0)),             # W2 row chunk (streamed)
            pl.BlockSpec((1, OUT_PAD), lambda j: (0, 0)),                # b2 (resident)
        ],
        out_specs=pl.BlockSpec((N, OUT_PAD), lambda j: (0, 0)),
        scratch_shapes=[pltpu.VMEM((N, C_out * CBLK), jnp.bfloat16),     # flat pooled acts
                        pltpu.VMEM((N, OUT_PAD), jnp.float32)],          # FC2 accumulator
        compiler_params=pltpu.CompilerParams(
            dimension_semantics=("arbitrary",)),
    )(taps, wc, bc, w1p, b1, g, bt, w2p, b2)

    out = out[:, :OUT].reshape(-1, OUT, 1)
    # torch.squeeze(x, dim=0): only squeezes if the leading dim is 1
    return out[0] if out.shape[0] == 1 else out


def cnn_reference(x, params):
    """Pure-JAX reference (plain XLA).

    Matches the kernel's deliberate precision choice: FC weights and the MXU
    operands (pooled activations, normalized hidden) stored in bfloat16, all
    accumulation and elementwise math in f32.
    """
    conv_w, conv_b, fc1_w, fc1_b, gamma, beta, fc2_w, fc2_b = params
    N, C_in, L = x.shape
    C_out, _, K = conv_w.shape
    hp = jax.lax.Precision.HIGHEST
    xpad = jnp.pad(x, ((0, 0), (0, 0), (2, 2)))
    Lc = L + 1
    cols = jnp.stack([xpad[:, :, kk:kk + Lc] for kk in range(K)], axis=-1)    # (N,C_in,Lc,K)
    conv = jnp.einsum('nclk,ock->nol', cols, conv_w, precision=hp) + conv_b[None, :, None]
    r = jnp.maximum(conv, 0.0)
    pooled = jnp.maximum(jnp.maximum(r[:, :, 0:Lc - 2:2], r[:, :, 1:Lc - 1:2]),
                         r[:, :, 2:Lc:2])                                     # (N,C_out,250)
    flat = pooled.reshape(N, -1)
    flat_q = flat.astype(jnp.bfloat16).astype(jnp.float32)
    w1_q = fc1_w.astype(jnp.bfloat16).astype(jnp.float32)
    h = jnp.maximum(jnp.dot(flat_q, w1_q.T, precision=hp) + fc1_b, 0.0)
    mu = jnp.mean(h, axis=0, keepdims=True)
    var = jnp.mean((h - mu) ** 2, axis=0, keepdims=True)
    hn = (h - mu) / jnp.sqrt(var + 1e-5) * gamma + beta
    hn_q = hn.astype(jnp.bfloat16).astype(jnp.float32)
    w2_q = fc2_w.astype(jnp.bfloat16).astype(jnp.float32)
    out = jnp.dot(hn_q, w2_q.T, precision=hp) + fc2_b
    out = out.reshape(-1, fc2_w.shape[0], 1)
    return out[0] if out.shape[0] == 1 else out


if __name__ == "__main__":
    key = jax.random.PRNGKey(0)
    k_x, k_p = jax.random.split(key)
    # L=500 and OUT=500 are fixed by Linear(4*250, 512) and view(-1, 500, 1);
    # batch and input channels kept small.
    N, C_IN, L = 2, 4, 500
    params = make_params(k_p, C_IN)
    x = jax.random.normal(k_x, (N, C_IN, L), jnp.float32)

    y = cnn_forward(x, params)
    y = jax.block_until_ready(y)
    assert y.shape == (N, 500, 1)

    y_ref = cnn_reference(x, params)
    np.testing.assert_allclose(np.asarray(y), np.asarray(y_ref), rtol=2e-2, atol=2e-2)
    print("KERNEL_OK")
</pallas_src>

<mosaic_0001>
module attributes {stable_mosaic.version = 11 : i64} {
  func.func @_cnn_kernel(%arg0: i32, %arg1: memref<6x4x2x256xf32, #tpu.memory_space<vmem>>, %arg2: memref<64xf32, #tpu.memory_space<smem>>, %arg3: memref<4xf32, #tpu.memory_space<smem>>, %arg4: memref<1024x256xbf16, #tpu.memory_space<vmem>>, %arg5: memref<1x256xf32, #tpu.memory_space<vmem>>, %arg6: memref<1x256xf32, #tpu.memory_space<vmem>>, %arg7: memref<1x256xf32, #tpu.memory_space<vmem>>, %arg8: memref<256x512xbf16, #tpu.memory_space<vmem>>, %arg9: memref<1x512xf32, #tpu.memory_space<vmem>>, %arg10: memref<2x512xf32, #tpu.memory_space<vmem>>, %arg11: memref<2x1024xbf16, #tpu.memory_space<vmem>>, %arg12: memref<2x512xf32, #tpu.memory_space<vmem>>) attributes {dimension_semantics = [#tpu.dimension_semantics<arbitrary>], iteration_bounds = array<i64: 2>, scalar_prefetch = 0 : i64, scratch_operands = 2 : i64, tpu.core_type = #tpu.core_type<tc>, window_params = [{pipeline_mode = #tpu.pipeline_mode<synchronous>, transform_indices = @transform_0, window_bounds = array<i64: 6, 4, 2, 256>}, {transform_indices = @transform_1, window_bounds = array<i64: 64>}, {transform_indices = @transform_2, window_bounds = array<i64: 4>}, {transform_indices = @transform_3, window_bounds = array<i64: 1024, 256>}, {transform_indices = @transform_4, window_bounds = array<i64: 1, 256>}, {transform_indices = @transform_5, window_bounds = array<i64: 1, 256>}, {transform_indices = @transform_6, window_bounds = array<i64: 1, 256>}, {transform_indices = @transform_7, window_bounds = array<i64: 256, 512>}, {pipeline_mode = #tpu.pipeline_mode<synchronous>, transform_indices = @transform_8, window_bounds = array<i64: 1, 512>}, {pipeline_mode = #tpu.pipeline_mode<synchronous>, transform_indices = @transform_9, window_bounds = array<i64: 2, 512>}]} {
    %c0_i32 = arith.constant 0 : i32
    %0 = arith.cmpi eq, %arg0, %c0_i32 : i32
    %1 = arith.extui %0 : i1 to i32
    %c0_i32_0 = arith.constant 0 : i32
    %2 = arith.cmpi ne, %1, %c0_i32_0 : i32
    scf.if %2 {
      %cst_24 = arith.constant 0.000000e+00 : f32
      %46 = vector.broadcast %cst_24 : f32 to vector<2x256xf32>
      %cst_25 = arith.constant 0.000000e+00 : f32
      %47 = vector.broadcast %cst_25 : f32 to vector<2x256xf32>
      %cst_26 = arith.constant 0.000000e+00 : f32
      %48 = vector.broadcast %cst_26 : f32 to vector<2x256xf32>
      %c0_27 = arith.constant 0 : index
      %c0_28 = arith.constant 0 : index
      %c0_29 = arith.constant 0 : index
      %c0_30 = arith.constant 0 : index
      %49 = vector.load %arg1[%c0_27, %c0_28, %c0_29, %c0_30] : memref<6x4x2x256xf32, #tpu.memory_space<vmem>>, vector<1x1x2x256xf32>
      %50 = vector.shape_cast %49 : vector<1x1x2x256xf32> to vector<2x256xf32>
      %c1 = arith.constant 1 : index
      %c0_31 = arith.constant 0 : index
      %c0_32 = arith.constant 0 : index
      %c0_33 = arith.constant 0 : index
      %51 = vector.load %arg1[%c1, %c0_31, %c0_32, %c0_33] : memref<6x4x2x256xf32, #tpu.memory_space<vmem>>, vector<1x1x2x256xf32>
      %52 = vector.shape_cast %51 : vector<1x1x2x256xf32> to vector<2x256xf32>
      %c2 = arith.constant 2 : index
      %c0_34 = arith.constant 0 : index
      %c0_35 = arith.constant 0 : index
      %c0_36 = arith.constant 0 : index
      %53 = vector.load %arg1[%c2, %c0_34, %c0_35, %c0_36] : memref<6x4x2x256xf32, #tpu.memory_space<vmem>>, vector<1x1x2x256xf32>
      %54 = vector.shape_cast %53 : vector<1x1x2x256xf32> to vector<2x256xf32>
      %c3 = arith.constant 3 : index
      %c0_37 = arith.constant 0 : index
      %c0_38 = arith.constant 0 : index
      %c0_39 = arith.constant 0 : index
      %55 = vector.load %arg1[%c3, %c0_37, %c0_38, %c0_39] : memref<6x4x2x256xf32, #tpu.memory_space<vmem>>, vector<1x1x2x256xf32>
      %56 = vector.shape_cast %55 : vector<1x1x2x256xf32> to vector<2x256xf32>
      %c4 = arith.constant 4 : index
      %c0_40 = arith.constant 0 : index
      %c0_41 = arith.constant 0 : index
      %c0_42 = arith.constant 0 : index
      %57 = vector.load %arg1[%c4, %c0_40, %c0_41, %c0_42] : memref<6x4x2x256xf32, #tpu.memory_space<vmem>>, vector<1x1x2x256xf32>
      %58 = vector.shape_cast %57 : vector<1x1x2x256xf32> to vector<2x256xf32>
      %c5 = arith.constant 5 : index
      %c0_43 = arith.constant 0 : index
      %c0_44 = arith.constant 0 : index
      %c0_45 = arith.constant 0 : index
      %59 = vector.load %arg1[%c5, %c0_43, %c0_44, %c0_45] : memref<6x4x2x256xf32, #tpu.memory_space<vmem>>, vector<1x1x2x256xf32>
      %60 = vector.shape_cast %59 : vector<1x1x2x256xf32> to vector<2x256xf32>
      %c0_46 = arith.constant 0 : index
      %61 = memref.load %arg2[%c0_46] : memref<64xf32, #tpu.memory_space<smem>>
      %c1_47 = arith.constant 1 : index
      %62 = memref.load %arg2[%c1_47] : memref<64xf32, #tpu.memory_space<smem>>
      %c2_48 = arith.constant 2 : index
      %63 = memref.load %arg2[%c2_48] : memref<64xf32, #tpu.memory_space<smem>>
      %c3_49 = arith.constant 3 : index
      %64 = memref.load %arg2[%c3_49] : memref<64xf32, #tpu.memory_space<smem>>
      %65 = vector.broadcast %61 : f32 to vector<2x256xf32>
      %66 = arith.mulf %65, %50 : vector<2x256xf32>
      %67 = arith.addf %46, %66 : vector<2x256xf32>
      %68 = vector.broadcast %62 : f32 to vector<2x256xf32>
      %69 = arith.mulf %68, %52 : vector<2x256xf32>
      %70 = arith.addf %67, %69 : vector<2x256xf32>
      %71 = vector.broadcast %63 : f32 to vector<2x256xf32>
      %72 = arith.mulf %71, %54 : vector<2x256xf32>
      %73 = arith.addf %70, %72 : vector<2x256xf32>
      %74 = vector.broadcast %64 : f32 to vector<2x256xf32>
      %75 = arith.mulf %74, %56 : vector<2x256xf32>
      %76 = arith.addf %73, %75 : vector<2x256xf32>
      %77 = vector.broadcast %61 : f32 to vector<2x256xf32>
      %78 = arith.mulf %77, %52 : vector<2x256xf32>
      %79 = arith.addf %47, %78 : vector<2x256xf32>
      %80 = vector.broadcast %62 : f32 to vector<2x256xf32>
      %81 = arith.mulf %80, %54 : vector<2x256xf32>
      %82 = arith.addf %79, %81 : vector<2x256xf32>
      %83 = vector.broadcast %63 : f32 to vector<2x256xf32>
      %84 = arith.mulf %83, %56 : vector<2x256xf32>
      %85 = arith.addf %82, %84 : vector<2x256xf32>
      %86 = vector.broadcast %64 : f32 to vector<2x256xf32>
      %87 = arith.mulf %86, %58 : vector<2x256xf32>
      %88 = arith.addf %85, %87 : vector<2x256xf32>
      %89 = vector.broadcast %61 : f32 to vector<2x256xf32>
      %90 = arith.mulf %89, %54 : vector<2x256xf32>
      %91 = arith.addf %48, %90 : vector<2x256xf32>
      %92 = vector.broadcast %62 : f32 to vector<2x256xf32>
      %93 = arith.mulf %92, %56 : vector<2x256xf32>
      %94 = arith.addf %91, %93 : vector<2x256xf32>
      %95 = vector.broadcast %63 : f32 to vector<2x256xf32>
      %96 = arith.mulf %95, %58 : vector<2x256xf32>
      %97 = arith.addf %94, %96 : vector<2x256xf32>
      %98 = vector.broadcast %64 : f32 to vector<2x256xf32>
      %99 = arith.mulf %98, %60 : vector<2x256xf32>
      %100 = arith.addf %97, %99 : vector<2x256xf32>
      %c0_50 = arith.constant 0 : index
      %c1_51 = arith.constant 1 : index
      %c0_52 = arith.constant 0 : index
      %c0_53 = arith.constant 0 : index
      %101 = vector.load %arg1[%c0_50, %c1_51, %c0_52, %c0_53] : memref<6x4x2x256xf32, #tpu.memory_space<vmem>>, vector<1x1x2x256xf32>
      %102 = vector.shape_cast %101 : vector<1x1x2x256xf32> to vector<2x256xf32>
      %c1_54 = arith.constant 1 : index
      %c1_55 = arith.constant 1 : index
      %c0_56 = arith.constant 0 : index
      %c0_57 = arith.constant 0 : index
      %103 = vector.load %arg1[%c1_54, %c1_55, %c0_56, %c0_57] : memref<6x4x2x256xf32, #tpu.memory_space<vmem>>, vector<1x1x2x256xf32>
      %104 = vector.shape_cast %103 : vector<1x1x2x256xf32> to vector<2x256xf32>
      %c2_58 = arith.constant 2 : index
      %c1_59 = arith.constant 1 : index
      %c0_60 = arith.constant 0 : index
      %c0_61 = arith.constant 0 : index
      %105 = vector.load %arg1[%c2_58, %c1_59, %c0_60, %c0_61] : memref<6x4x2x256xf32, #tpu.memory_space<vmem>>, vector<1x1x2x256xf32>
      %106 = vector.shape_cast %105 : vector<1x1x2x256xf32> to vector<2x256xf32>
      %c3_62 = arith.constant 3 : index
      %c1_63 = arith.constant 1 : index
      %c0_64 = arith.constant 0 : index
      %c0_65 = arith.constant 0 : index
      %107 = vector.load %arg1[%c3_62, %c1_63, %c0_64, %c0_65] : memref<6x4x2x256xf32, #tpu.memory_space<vmem>>, vector<1x1x2x256xf32>
      %108 = vector.shape_cast %107 : vector<1x1x2x256xf32> to vector<2x256xf32>
      %c4_66 = arith.constant 4 : index
      %c1_67 = arith.constant 1 : index
      %c0_68 = arith.constant 0 : index
      %c0_69 = arith.constant 0 : index
      %109 = vector.load %arg1[%c4_66, %c1_67, %c0_68, %c0_69] : memref<6x4x2x256xf32, #tpu.memory_space<vmem>>, vector<1x1x2x256xf32>
      %110 = vector.shape_cast %109 : vector<1x1x2x256xf32> to vector<2x256xf32>
      %c5_70 = arith.constant 5 : index
      %c1_71 = arith.constant 1 : index
      %c0_72 = arith.constant 0 : index
      %c0_73 = arith.constant 0 : index
      %111 = vector.load %arg1[%c5_70, %c1_71, %c0_72, %c0_73] : memref<6x4x2x256xf32, #tpu.memory_space<vmem>>, vector<1x1x2x256xf32>
      %112 = vector.shape_cast %111 : vector<1x1x2x256xf32> to vector<2x256xf32>
      %c4_74 = arith.constant 4 : index
      %113 = memref.load %arg2[%c4_74] : memref<64xf32, #tpu.memory_space<smem>>
      %c5_75 = arith.constant 5 : index
      %114 = memref.load %arg2[%c5_75] : memref<64xf32, #tpu.memory_space<smem>>
      %c6 = arith.constant 6 : index
      %115 = memref.load %arg2[%c6] : memref<64xf32, #tpu.memory_space<smem>>
      %c7 = arith.constant 7 : index
      %116 = memref.load %arg2[%c7] : memref<64xf32, #tpu.memory_space<smem>>
      %117 = vector.broadcast %113 : f32 to vector<2x256xf32>
      %118 = arith.mulf %117, %102 : vector<2x256xf32>
      %119 = arith.addf %76, %118 : vector<2x256xf32>
      %120 = vector.broadcast %114 : f32 to vector<2x256xf32>
      %121 = arith.mulf %120, %104 : vector<2x256xf32>
      %122 = arith.addf %119, %121 : vector<2x256xf32>
      %123 = vector.broadcast %115 : f32 to vector<2x256xf32>
      %124 = arith.mulf %123, %106 : vector<2x256xf32>
      %125 = arith.addf %122, %124 : vector<2x256xf32>
      %126 = vector.broadcast %116 : f32 to vector<2x256xf32>
      %127 = arith.mulf %126, %108 : vector<2x256xf32>
      %128 = arith.addf %125, %127 : vector<2x256xf32>
      %129 = vector.broadcast %113 : f32 to vector<2x256xf32>
      %130 = arith.mulf %129, %104 : vector<2x256xf32>
      %131 = arith.addf %88, %130 : vector<2x256xf32>
      %132 = vector.broadcast %114 : f32 to vector<2x256xf32>
      %133 = arith.mulf %132, %106 : vector<2x256xf32>
      %134 = arith.addf %131, %133 : vector<2x256xf32>
      %135 = vector.broadcast %115 : f32 to vector<2x256xf32>
      %136 = arith.mulf %135, %108 : vector<2x256xf32>
      %137 = arith.addf %134, %136 : vector<2x256xf32>
      %138 = vector.broadcast %116 : f32 to vector<2x256xf32>
      %139 = arith.mulf %138, %110 : vector<2x256xf32>
      %140 = arith.addf %137, %139 : vector<2x256xf32>
      %141 = vector.broadcast %113 : f32 to vector<2x256xf32>
      %142 = arith.mulf %141, %106 : vector<2x256xf32>
      %143 = arith.addf %100, %142 : vector<2x256xf32>
      %144 = vector.broadcast %114 : f32 to vector<2x256xf32>
      %145 = arith.mulf %144, %108 : vector<2x256xf32>
      %146 = arith.addf %143, %145 : vector<2x256xf32>
      %147 = vector.broadcast %115 : f32 to vector<2x256xf32>
      %148 = arith.mulf %147, %110 : vector<2x256xf32>
      %149 = arith.addf %146, %148 : vector<2x256xf32>
      %150 = vector.broadcast %116 : f32 to vector<2x256xf32>
      %151 = arith.mulf %150, %112 : vector<2x256xf32>
      %152 = arith.addf %149, %151 : vector<2x256xf32>
      %c0_76 = arith.constant 0 : index
      %c2_77 = arith.constant 2 : index
      %c0_78 = arith.constant 0 : index
      %c0_79 = arith.constant 0 : index
      %153 = vector.load %arg1[%c0_76, %c2_77, %c0_78, %c0_79] : memref<6x4x2x256xf32, #tpu.memory_space<vmem>>, vector<1x1x2x256xf32>
      %154 = vector.shape_cast %153 : vector<1x1x2x256xf32> to vector<2x256xf32>
      %c1_80 = arith.constant 1 : index
      %c2_81 = arith.constant 2 : index
      %c0_82 = arith.constant 0 : index
      %c0_83 = arith.constant 0 : index
      %155 = vector.load %arg1[%c1_80, %c2_81, %c0_82, %c0_83] : memref<6x4x2x256xf32, #tpu.memory_space<vmem>>, vector<1x1x2x256xf32>
      %156 = vector.shape_cast %155 : vector<1x1x2x256xf32> to vector<2x256xf32>
      %c2_84 = arith.constant 2 : index
      %c2_85 = arith.constant 2 : index
      %c0_86 = arith.constant 0 : index
      %c0_87 = arith.constant 0 : index
      %157 = vector.load %arg1[%c2_84, %c2_85, %c0_86, %c0_87] : memref<6x4x2x256xf32, #tpu.memory_space<vmem>>, vector<1x1x2x256xf32>
      %158 = vector.shape_cast %157 : vector<1x1x2x256xf32> to vector<2x256xf32>
      %c3_88 = arith.constant 3 : index
      %c2_89 = arith.constant 2 : index
      %c0_90 = arith.constant 0 : index
      %c0_91 = arith.constant 0 : index
      %159 = vector.load %arg1[%c3_88, %c2_89, %c0_90, %c0_91] : memref<6x4x2x256xf32, #tpu.memory_space<vmem>>, vector<1x1x2x256xf32>
      %160 = vector.shape_cast %159 : vector<1x1x2x256xf32> to vector<2x256xf32>
      %c4_92 = arith.constant 4 : index
      %c2_93 = arith.constant 2 : index
      %c0_94 = arith.constant 0 : index
      %c0_95 = arith.constant 0 : index
      %161 = vector.load %arg1[%c4_92, %c2_93, %c0_94, %c0_95] : memref<6x4x2x256xf32, #tpu.memory_space<vmem>>, vector<1x1x2x256xf32>
      %162 = vector.shape_cast %161 : vector<1x1x2x256xf32> to vector<2x256xf32>
      %c5_96 = arith.constant 5 : index
      %c2_97 = arith.constant 2 : index
      %c0_98 = arith.constant 0 : index
      %c0_99 = arith.constant 0 : index
      %163 = vector.load %arg1[%c5_96, %c2_97, %c0_98, %c0_99] : memref<6x4x2x256xf32, #tpu.memory_space<vmem>>, vector<1x1x2x256xf32>
      %164 = vector.shape_cast %163 : vector<1x1x2x256xf32> to vector<2x256xf32>
      %c8 = arith.constant 8 : index
      %165 = memref.load %arg2[%c8] : memref<64xf32, #tpu.memory_space<smem>>
      %c9 = arith.constant 9 : index
      %166 = memref.load %arg2[%c9] : memref<64xf32, #tpu.memory_space<smem>>
      %c10 = arith.constant 10 : index
      %167 = memref.load %arg2[%c10] : memref<64xf32, #tpu.memory_space<smem>>
      %c11 = arith.constant 11 : index
      %168 = memref.load %arg2[%c11] : memref<64xf32, #tpu.memory_space<smem>>
      %169 = vector.broadcast %165 : f32 to vector<2x256xf32>
      %170 = arith.mulf %169, %154 : vector<2x256xf32>
      %171 = arith.addf %128, %170 : vector<2x256xf32>
      %172 = vector.broadcast %166 : f32 to vector<2x256xf32>
      %173 = arith.mulf %172, %156 : vector<2x256xf32>
      %174 = arith.addf %171, %173 : vector<2x256xf32>
      %175 = vector.broadcast %167 : f32 to vector<2x256xf32>
      %176 = arith.mulf %175, %158 : vector<2x256xf32>
      %177 = arith.addf %174, %176 : vector<2x256xf32>
      %178 = vector.broadcast %168 : f32 to vector<2x256xf32>
      %179 = arith.mulf %178, %160 : vector<2x256xf32>
      %180 = arith.addf %177, %179 : vector<2x256xf32>
      %181 = vector.broadcast %165 : f32 to vector<2x256xf32>
      %182 = arith.mulf %181, %156 : vector<2x256xf32>
      %183 = arith.addf %140, %182 : vector<2x256xf32>
      %184 = vector.broadcast %166 : f32 to vector<2x256xf32>
      %185 = arith.mulf %184, %158 : vector<2x256xf32>
      %186 = arith.addf %183, %185 : vector<2x256xf32>
      %187 = vector.broadcast %167 : f32 to vector<2x256xf32>
      %188 = arith.mulf %187, %160 : vector<2x256xf32>
      %189 = arith.addf %186, %188 : vector<2x256xf32>
      %190 = vector.broadcast %168 : f32 to vector<2x256xf32>
      %191 = arith.mulf %190, %162 : vector<2x256xf32>
      %192 = arith.addf %189, %191 : vector<2x256xf32>
      %193 = vector.broadcast %165 : f32 to vector<2x256xf32>
      %194 = arith.mulf %193, %158 : vector<2x256xf32>
      %195 = arith.addf %152, %194 : vector<2x256xf32>
      %196 = vector.broadcast %166 : f32 to vector<2x256xf32>
      %197 = arith.mulf %196, %160 : vector<2x256xf32>
      %198 = arith.addf %195, %197 : vector<2x256xf32>
      %199 = vector.broadcast %167 : f32 to vector<2x256xf32>
      %200 = arith.mulf %199, %162 : vector<2x256xf32>
      %201 = arith.addf %198, %200 : vector<2x256xf32>
      %202 = vector.broadcast %168 : f32 to vector<2x256xf32>
      %203 = arith.mulf %202, %164 : vector<2x256xf32>
      %204 = arith.addf %201, %203 : vector<2x256xf32>
      %c0_100 = arith.constant 0 : index
      %c3_101 = arith.constant 3 : index
      %c0_102 = arith.constant 0 : index
      %c0_103 = arith.constant 0 : index
      %205 = vector.load %arg1[%c0_100, %c3_101, %c0_102, %c0_103] : memref<6x4x2x256xf32, #tpu.memory_space<vmem>>, vector<1x1x2x256xf32>
      %206 = vector.shape_cast %205 : vector<1x1x2x256xf32> to vector<2x256xf32>
      %c1_104 = arith.constant 1 : index
      %c3_105 = arith.constant 3 : index
      %c0_106 = arith.constant 0 : index
      %c0_107 = arith.constant 0 : index
      %207 = vector.load %arg1[%c1_104, %c3_105, %c0_106, %c0_107] : memref<6x4x2x256xf32, #tpu.memory_space<vmem>>, vector<1x1x2x256xf32>
      %208 = vector.shape_cast %207 : vector<1x1x2x256xf32> to vector<2x256xf32>
      %c2_108 = arith.constant 2 : index
      %c3_109 = arith.constant 3 : index
      %c0_110 = arith.constant 0 : index
      %c0_111 = arith.constant 0 : index
      %209 = vector.load %arg1[%c2_108, %c3_109, %c0_110, %c0_111] : memref<6x4x2x256xf32, #tpu.memory_space<vmem>>, vector<1x1x2x256xf32>
      %210 = vector.shape_cast %209 : vector<1x1x2x256xf32> to vector<2x256xf32>
      %c3_112 = arith.constant 3 : index
      %c3_113 = arith.constant 3 : index
      %c0_114 = arith.constant 0 : index
      %c0_115 = arith.constant 0 : index
      %211 = vector.load %arg1[%c3_112, %c3_113, %c0_114, %c0_115] : memref<6x4x2x256xf32, #tpu.memory_space<vmem>>, vector<1x1x2x256xf32>
      %212 = vector.shape_cast %211 : vector<1x1x2x256xf32> to vector<2x256xf32>
      %c4_116 = arith.constant 4 : index
      %c3_117 = arith.constant 3 : index
      %c0_118 = arith.constant 0 : index
      %c0_119 = arith.constant 0 : index
      %213 = vector.load %arg1[%c4_116, %c3_117, %c0_118, %c0_119] : memref<6x4x2x256xf32, #tpu.memory_space<vmem>>, vector<1x1x2x256xf32>
      %214 = vector.shape_cast %213 : vector<1x1x2x256xf32> to vector<2x256xf32>
      %c5_120 = arith.constant 5 : index
      %c3_121 = arith.constant 3 : index
      %c0_122 = arith.constant 0 : index
      %c0_123 = arith.constant 0 : index
      %215 = vector.load %arg1[%c5_120, %c3_121, %c0_122, %c0_123] : memref<6x4x2x256xf32, #tpu.memory_space<vmem>>, vector<1x1x2x256xf32>
      %216 = vector.shape_cast %215 : vector<1x1x2x256xf32> to vector<2x256xf32>
      %c12 = arith.constant 12 : index
      %217 = memref.load %arg2[%c12] : memref<64xf32, #tpu.memory_space<smem>>
      %c13 = arith.constant 13 : index
      %218 = memref.load %arg2[%c13] : memref<64xf32, #tpu.memory_space<smem>>
      %c14 = arith.constant 14 : index
      %219 = memref.load %arg2[%c14] : memref<64xf32, #tpu.memory_space<smem>>
      %c15 = arith.constant 15 : index
      %220 = memref.load %arg2[%c15] : memref<64xf32, #tpu.memory_space<smem>>
      %221 = vector.broadcast %217 : f32 to vector<2x256xf32>
      %222 = arith.mulf %221, %206 : vector<2x256xf32>
      %223 = arith.addf %180, %222 : vector<2x256xf32>
      %224 = vector.broadcast %218 : f32 to vector<2x256xf32>
      %225 = arith.mulf %224, %208 : vector<2x256xf32>
      %226 = arith.addf %223, %225 : vector<2x256xf32>
      %227 = vector.broadcast %219 : f32 to vector<2x256xf32>
      %228 = arith.mulf %227, %210 : vector<2x256xf32>
      %229 = arith.addf %226, %228 : vector<2x256xf32>
      %230 = vector.broadcast %220 : f32 to vector<2x256xf32>
      %231 = arith.mulf %230, %212 : vector<2x256xf32>
      %232 = arith.addf %229, %231 : vector<2x256xf32>
      %233 = vector.broadcast %217 : f32 to vector<2x256xf32>
      %234 = arith.mulf %233, %208 : vector<2x256xf32>
      %235 = arith.addf %192, %234 : vector<2x256xf32>
      %236 = vector.broadcast %218 : f32 to vector<2x256xf32>
      %237 = arith.mulf %236, %210 : vector<2x256xf32>
      %238 = arith.addf %235, %237 : vector<2x256xf32>
      %239 = vector.broadcast %219 : f32 to vector<2x256xf32>
      %240 = arith.mulf %239, %212 : vector<2x256xf32>
      %241 = arith.addf %238, %240 : vector<2x256xf32>
      %242 = vector.broadcast %220 : f32 to vector<2x256xf32>
      %243 = arith.mulf %242, %214 : vector<2x256xf32>
      %244 = arith.addf %241, %243 : vector<2x256xf32>
      %245 = vector.broadcast %217 : f32 to vector<2x256xf32>
      %246 = arith.mulf %245, %210 : vector<2x256xf32>
      %247 = arith.addf %204, %246 : vector<2x256xf32>
      %248 = vector.broadcast %218 : f32 to vector<2x256xf32>
      %249 = arith.mulf %248, %212 : vector<2x256xf32>
      %250 = arith.addf %247, %249 : vector<2x256xf32>
      %251 = vector.broadcast %219 : f32 to vector<2x256xf32>
      %252 = arith.mulf %251, %214 : vector<2x256xf32>
      %253 = arith.addf %250, %252 : vector<2x256xf32>
      %254 = vector.broadcast %220 : f32 to vector<2x256xf32>
      %255 = arith.mulf %254, %216 : vector<2x256xf32>
      %256 = arith.addf %253, %255 : vector<2x256xf32>
      %c0_124 = arith.constant 0 : index
      %257 = memref.load %arg3[%c0_124] : memref<4xf32, #tpu.memory_space<smem>>
      %258 = vector.broadcast %257 : f32 to vector<2x256xf32>
      %259 = arith.addf %232, %258 : vector<2x256xf32>
      %cst_125 = arith.constant 0.000000e+00 : f32
      %260 = vector.broadcast %cst_125 : f32 to vector<2x256xf32>
      %261 = arith.maximumf %259, %260 : vector<2x256xf32>
      %262 = vector.broadcast %257 : f32 to vector<2x256xf32>
      %263 = arith.addf %244, %262 : vector<2x256xf32>
      %cst_126 = arith.constant 0.000000e+00 : f32
      %264 = vector.broadcast %cst_126 : f32 to vector<2x256xf32>
      %265 = arith.maximumf %263, %264 : vector<2x256xf32>
      %266 = vector.broadcast %257 : f32 to vector<2x256xf32>
      %267 = arith.addf %256, %266 : vector<2x256xf32>
      %cst_127 = arith.constant 0.000000e+00 : f32
      %268 = vector.broadcast %cst_127 : f32 to vector<2x256xf32>
      %269 = arith.maximumf %267, %268 : vector<2x256xf32>
      %270 = arith.maximumf %261, %265 : vector<2x256xf32>
      %271 = arith.maximumf %270, %269 : vector<2x256xf32>
      %272 = arith.truncf %271 : vector<2x256xf32> to vector<2x256xbf16>
      %c0_128 = arith.constant 0 : index
      %c0_129 = arith.constant 0 : index
      %273 = vector.load %arg11[%c0_128, %c0_129] : memref<2x1024xbf16, #tpu.memory_space<vmem>>, vector<2x256xbf16>
      tpu.vector_store %arg11[%c0_128, %c0_129], %272 {strides = array<i32>} : memref<2x1024xbf16, #tpu.memory_space<vmem>>, vector<2x256xbf16>,
      %cst_130 = arith.constant 0.000000e+00 : f32
      %274 = vector.broadcast %cst_130 : f32 to vector<2x256xf32>
      %cst_131 = arith.constant 0.000000e+00 : f32
      %275 = vector.broadcast %cst_131 : f32 to vector<2x256xf32>
      %cst_132 = arith.constant 0.000000e+00 : f32
      %276 = vector.broadcast %cst_132 : f32 to vector<2x256xf32>
      %c0_133 = arith.constant 0 : index
      %c0_134 = arith.constant 0 : index
      %c0_135 = arith.constant 0 : index
      %c0_136 = arith.constant 0 : index
      %277 = vector.load %arg1[%c0_133, %c0_134, %c0_135, %c0_136] : memref<6x4x2x256xf32, #tpu.memory_space<vmem>>, vector<1x1x2x256xf32>
      %278 = vector.shape_cast %277 : vector<1x1x2x256xf32> to vector<2x256xf32>
      %c1_137 = arith.constant 1 : index
      %c0_138 = arith.constant 0 : index
      %c0_139 = arith.constant 0 : index
      %c0_140 = arith.constant 0 : index
      %279 = vector.load %arg1[%c1_137, %c0_138, %c0_139, %c0_140] : memref<6x4x2x256xf32, #tpu.memory_space<vmem>>, vector<1x1x2x256xf32>
      %280 = vector.shape_cast %279 : vector<1x1x2x256xf32> to vector<2x256xf32>
      %c2_141 = arith.constant 2 : index
      %c0_142 = arith.constant 0 : index
      %c0_143 = arith.constant 0 : index
      %c0_144 = arith.constant 0 : index
      %281 = vector.load %arg1[%c2_141, %c0_142, %c0_143, %c0_144] : memref<6x4x2x256xf32, #tpu.memory_space<vmem>>, vector<1x1x2x256xf32>
      %282 = vector.shape_cast %281 : vector<1x1x2x256xf32> to vector<2x256xf32>
      %c3_145 = arith.constant 3 : index
      %c0_146 = arith.constant 0 : index
      %c0_147 = arith.constant 0 : index
      %c0_148 = arith.constant 0 : index
      %283 = vector.load %arg1[%c3_145, %c0_146, %c0_147, %c0_148] : memref<6x4x2x256xf32, #tpu.memory_space<vmem>>, vector<1x1x2x256xf32>
      %284 = vector.shape_cast %283 : vector<1x1x2x256xf32> to vector<2x256xf32>
      %c4_149 = arith.constant 4 : index
      %c0_150 = arith.constant 0 : index
      %c0_151 = arith.constant 0 : index
      %c0_152 = arith.constant 0 : index
      %285 = vector.load %arg1[%c4_149, %c0_150, %c0_151, %c0_152] : memref<6x4x2x256xf32, #tpu.memory_space<vmem>>, vector<1x1x2x256xf32>
      %286 = vector.shape_cast %285 : vector<1x1x2x256xf32> to vector<2x256xf32>
      %c5_153 = arith.constant 5 : index
      %c0_154 = arith.constant 0 : index
      %c0_155 = arith.constant 0 : index
      %c0_156 = arith.constant 0 : index
      %287 = vector.load %arg1[%c5_153, %c0_154, %c0_155, %c0_156] : memref<6x4x2x256xf32, #tpu.memory_space<vmem>>, vector<1x1x2x256xf32>
      %288 = vector.shape_cast %287 : vector<1x1x2x256xf32> to vector<2x256xf32>
      %c16 = arith.constant 16 : index
      %289 = memref.load %arg2[%c16] : memref<64xf32, #tpu.memory_space<smem>>
      %c17 = arith.constant 17 : index
      %290 = memref.load %arg2[%c17] : memref<64xf32, #tpu.memory_space<smem>>
      %c18 = arith.constant 18 : index
      %291 = memref.load %arg2[%c18] : memref<64xf32, #tpu.memory_space<smem>>
      %c19 = arith.constant 19 : index
      %292 = memref.load %arg2[%c19] : memref<64xf32, #tpu.memory_space<smem>>
      %293 = vector.broadcast %289 : f32 to vector<2x256xf32>
      %294 = arith.mulf %293, %278 : vector<2x256xf32>
      %295 = arith.addf %274, %294 : vector<2x256xf32>
      %296 = vector.broadcast %290 : f32 to vector<2x256xf32>
      %297 = arith.mulf %296, %280 : vector<2x256xf32>
      %298 = arith.addf %295, %297 : vector<2x256xf32>
      %299 = vector.broadcast %291 : f32 to vector<2x256xf32>
      %300 = arith.mulf %299, %282 : vector<2x256xf32>
      %301 = arith.addf %298, %300 : vector<2x256xf32>
      %302 = vector.broadcast %292 : f32 to vector<2x256xf32>
      %303 = arith.mulf %302, %284 : vector<2x256xf32>
      %304 = arith.addf %301, %303 : vector<2x256xf32>
      %305 = vector.broadcast %289 : f32 to vector<2x256xf32>
      %306 = arith.mulf %305, %280 : vector<2x256xf32>
      %307 = arith.addf %275, %306 : vector<2x256xf32>
      %308 = vector.broadcast %290 : f32 to vector<2x256xf32>
      %309 = arith.mulf %308, %282 : vector<2x256xf32>
      %310 = arith.addf %307, %309 : vector<2x256xf32>
      %311 = vector.broadcast %291 : f32 to vector<2x256xf32>
      %312 = arith.mulf %311, %284 : vector<2x256xf32>
      %313 = arith.addf %310, %312 : vector<2x256xf32>
      %314 = vector.broadcast %292 : f32 to vector<2x256xf32>
      %315 = arith.mulf %314, %286 : vector<2x256xf32>
      %316 = arith.addf %313, %315 : vector<2x256xf32>
      %317 = vector.broadcast %289 : f32 to vector<2x256xf32>
      %318 = arith.mulf %317, %282 : vector<2x256xf32>
      %319 = arith.addf %276, %318 : vector<2x256xf32>
      %320 = vector.broadcast %290 : f32 to vector<2x256xf32>
      %321 = arith.mulf %320, %284 : vector<2x256xf32>
      %322 = arith.addf %319, %321 : vector<2x256xf32>
      %323 = vector.broadcast %291 : f32 to vector<2x256xf32>
      %324 = arith.mulf %323, %286 : vector<2x256xf32>
      %325 = arith.addf %322, %324 : vector<2x256xf32>
      %326 = vector.broadcast %292 : f32 to vector<2x256xf32>
      %327 = arith.mulf %326, %288 : vector<2x256xf32>
      %328 = arith.addf %325, %327 : vector<2x256xf32>
      %c0_157 = arith.constant 0 : index
      %c1_158 = arith.constant 1 : index
      %c0_159 = arith.constant 0 : index
      %c0_160 = arith.constant 0 : index
      %329 = vector.load %arg1[%c0_157, %c1_158, %c0_159, %c0_160] : memref<6x4x2x256xf32, #tpu.memory_space<vmem>>, vector<1x1x2x256xf32>
      %330 = vector.shape_cast %329 : vector<1x1x2x256xf32> to vector<2x256xf32>
      %c1_161 = arith.constant 1 : index
      %c1_162 = arith.constant 1 : index
      %c0_163 = arith.constant 0 : index
      %c0_164 = arith.constant 0 : index
      %331 = vector.load %arg1[%c1_161, %c1_162, %c0_163, %c0_164] : memref<6x4x2x256xf32, #tpu.memory_space<vmem>>, vector<1x1x2x256xf32>
      %332 = vector.shape_cast %331 : vector<1x1x2x256xf32> to vector<2x256xf32>
      %c2_165 = arith.constant 2 : index
      %c1_166 = arith.constant 1 : index
      %c0_167 = arith.constant 0 : index
      %c0_168 = arith.constant 0 : index
      %333 = vector.load %arg1[%c2_165, %c1_166, %c0_167, %c0_168] : memref<6x4x2x256xf32, #tpu.memory_space<vmem>>, vector<1x1x2x256xf32>
      %334 = vector.shape_cast %333 : vector<1x1x2x256xf32> to vector<2x256xf32>
      %c3_169 = arith.constant 3 : index
      %c1_170 = arith.constant 1 : index
      %c0_171 = arith.constant 0 : index
      %c0_172 = arith.constant 0 : index
      %335 = vector.load %arg1[%c3_169, %c1_170, %c0_171, %c0_172] : memref<6x4x2x256xf32, #tpu.memory_space<vmem>>, vector<1x1x2x256xf32>
      %336 = vector.shape_cast %335 : vector<1x1x2x256xf32> to vector<2x256xf32>
      %c4_173 = arith.constant 4 : index
      %c1_174 = arith.constant 1 : index
      %c0_175 = arith.constant 0 : index
      %c0_176 = arith.constant 0 : index
      %337 = vector.load %arg1[%c4_173, %c1_174, %c0_175, %c0_176] : memref<6x4x2x256xf32, #tpu.memory_space<vmem>>, vector<1x1x2x256xf32>
      %338 = vector.shape_cast %337 : vector<1x1x2x256xf32> to vector<2x256xf32>
      %c5_177 = arith.constant 5 : index
      %c1_178 = arith.constant 1 : index
      %c0_179 = arith.constant 0 : index
      %c0_180 = arith.constant 0 : index
      %339 = vector.load %arg1[%c5_177, %c1_178, %c0_179, %c0_180] : memref<6x4x2x256xf32, #tpu.memory_space<vmem>>, vector<1x1x2x256xf32>
      %340 = vector.shape_cast %339 : vector<1x1x2x256xf32> to vector<2x256xf32>
      %c20 = arith.constant 20 : index
      %341 = memref.load %arg2[%c20] : memref<64xf32, #tpu.memory_space<smem>>
      %c21 = arith.constant 21 : index
      %342 = memref.load %arg2[%c21] : memref<64xf32, #tpu.memory_space<smem>>
      %c22 = arith.constant 22 : index
      %343 = memref.load %arg2[%c22] : memref<64xf32, #tpu.memory_space<smem>>
      %c23 = arith.constant 23 : index
      %344 = memref.load %arg2[%c23] : memref<64xf32, #tpu.memory_space<smem>>
      %345 = vector.broadcast %341 : f32 to vector<2x256xf32>
      %346 = arith.mulf %345, %330 : vector<2x256xf32>
      %347 = arith.addf %304, %346 : vector<2x256xf32>
      %348 = vector.broadcast %342 : f32 to vector<2x256xf32>
      %349 = arith.mulf %348, %332 : vector<2x256xf32>
      %350 = arith.addf %347, %349 : vector<2x256xf32>
      %351 = vector.broadcast %343 : f32 to vector<2x256xf32>
      %352 = arith.mulf %351, %334 : vector<2x256xf32>
      %353 = arith.addf %350, %352 : vector<2x256xf32>
      %354 = vector.broadcast %344 : f32 to vector<2x256xf32>
      %355 = arith.mulf %354, %336 : vector<2x256xf32>
      %356 = arith.addf %353, %355 : vector<2x256xf32>
      %357 = vector.broadcast %341 : f32 to vector<2x256xf32>
      %358 = arith.mulf %357, %332 : vector<2x256xf32>
      %359 = arith.addf %316, %358 : vector<2x256xf32>
      %360 = vector.broadcast %342 : f32 to vector<2x256xf32>
      %361 = arith.mulf %360, %334 : vector<2x256xf32>
      %362 = arith.addf %359, %361 : vector<2x256xf32>
      %363 = vector.broadcast %343 : f32 to vector<2x256xf32>
      %364 = arith.mulf %363, %336 : vector<2x256xf32>
      %365 = arith.addf %362, %364 : vector<2x256xf32>
      %366 = vector.broadcast %344 : f32 to vector<2x256xf32>
      %367 = arith.mulf %366, %338 : vector<2x256xf32>
      %368 = arith.addf %365, %367 : vector<2x256xf32>
      %369 = vector.broadcast %341 : f32 to vector<2x256xf32>
      %370 = arith.mulf %369, %334 : vector<2x256xf32>
      %371 = arith.addf %328, %370 : vector<2x256xf32>
      %372 = vector.broadcast %342 : f32 to vector<2x256xf32>
      %373 = arith.mulf %372, %336 : vector<2x256xf32>
      %374 = arith.addf %371, %373 : vector<2x256xf32>
      %375 = vector.broadcast %343 : f32 to vector<2x256xf32>
      %376 = arith.mulf %375, %338 : vector<2x256xf32>
      %377 = arith.addf %374, %376 : vector<2x256xf32>
      %378 = vector.broadcast %344 : f32 to vector<2x256xf32>
      %379 = arith.mulf %378, %340 : vector<2x256xf32>
      %380 = arith.addf %377, %379 : vector<2x256xf32>
      %c0_181 = arith.constant 0 : index
      %c2_182 = arith.constant 2 : index
      %c0_183 = arith.constant 0 : index
      %c0_184 = arith.constant 0 : index
      %381 = vector.load %arg1[%c0_181, %c2_182, %c0_183, %c0_184] : memref<6x4x2x256xf32, #tpu.memory_space<vmem>>, vector<1x1x2x256xf32>
      %382 = vector.shape_cast %381 : vector<1x1x2x256xf32> to vector<2x256xf32>
      %c1_185 = arith.constant 1 : index
      %c2_186 = arith.constant 2 : index
      %c0_187 = arith.constant 0 : index
      %c0_188 = arith.constant 0 : index
      %383 = vector.load %arg1[%c1_185, %c2_186, %c0_187, %c0_188] : memref<6x4x2x256xf32, #tpu.memory_space<vmem>>, vector<1x1x2x256xf32>
      %384 = vector.shape_cast %383 : vector<1x1x2x256xf32> to vector<2x256xf32>
      %c2_189 = arith.constant 2 : index
      %c2_190 = arith.constant 2 : index
      %c0_191 = arith.constant 0 : index
      %c0_192 = arith.constant 0 : index
      %385 = vector.load %arg1[%c2_189, %c2_190, %c0_191, %c0_192] : memref<6x4x2x256xf32, #tpu.memory_space<vmem>>, vector<1x1x2x256xf32>
      %386 = vector.shape_cast %385 : vector<1x1x2x256xf32> to vector<2x256xf32>
      %c3_193 = arith.constant 3 : index
      %c2_194 = arith.constant 2 : index
      %c0_195 = arith.constant 0 : index
      %c0_196 = arith.constant 0 : index
      %387 = vector.load %arg1[%c3_193, %c2_194, %c0_195, %c0_196] : memref<6x4x2x256xf32, #tpu.memory_space<vmem>>, vector<1x1x2x256xf32>
      %388 = vector.shape_cast %387 : vector<1x1x2x256xf32> to vector<2x256xf32>
      %c4_197 = arith.constant 4 : index
      %c2_198 = arith.constant 2 : index
      %c0_199 = arith.constant 0 : index
      %c0_200 = arith.constant 0 : index
      %389 = vector.load %arg1[%c4_197, %c2_198, %c0_199, %c0_200] : memref<6x4x2x256xf32, #tpu.memory_space<vmem>>, vector<1x1x2x256xf32>
      %390 = vector.shape_cast %389 : vector<1x1x2x256xf32> to vector<2x256xf32>
      %c5_201 = arith.constant 5 : index
      %c2_202 = arith.constant 2 : index
      %c0_203 = arith.constant 0 : index
      %c0_204 = arith.constant 0 : index
      %391 = vector.load %arg1[%c5_201, %c2_202, %c0_203, %c0_204] : memref<6x4x2x256xf32, #tpu.memory_space<vmem>>, vector<1x1x2x256xf32>
      %392 = vector.shape_cast %391 : vector<1x1x2x256xf32> to vector<2x256xf32>
      %c24 = arith.constant 24 : index
      %393 = memref.load %arg2[%c24] : memref<64xf32, #tpu.memory_space<smem>>
      %c25 = arith.constant 25 : index
      %394 = memref.load %arg2[%c25] : memref<64xf32, #tpu.memory_space<smem>>
      %c26 = arith.constant 26 : index
      %395 = memref.load %arg2[%c26] : memref<64xf32, #tpu.memory_space<smem>>
      %c27 = arith.constant 27 : index
      %396 = memref.load %arg2[%c27] : memref<64xf32, #tpu.memory_space<smem>>
      %397 = vector.broadcast %393 : f32 to vector<2x256xf32>
      %398 = arith.mulf %397, %382 : vector<2x256xf32>
      %399 = arith.addf %356, %398 : vector<2x256xf32>
      %400 = vector.broadcast %394 : f32 to vector<2x256xf32>
      %401 = arith.mulf %400, %384 : vector<2x256xf32>
      %402 = arith.addf %399, %401 : vector<2x256xf32>
      %403 = vector.broadcast %395 : f32 to vector<2x256xf32>
      %404 = arith.mulf %403, %386 : vector<2x256xf32>
      %405 = arith.addf %402, %404 : vector<2x256xf32>
      %406 = vector.broadcast %396 : f32 to vector<2x256xf32>
      %407 = arith.mulf %406, %388 : vector<2x256xf32>
      %408 = arith.addf %405, %407 : vector<2x256xf32>
      %409 = vector.broadcast %393 : f32 to vector<2x256xf32>
      %410 = arith.mulf %409, %384 : vector<2x256xf32>
      %411 = arith.addf %368, %410 : vector<2x256xf32>
      %412 = vector.broadcast %394 : f32 to vector<2x256xf32>
      %413 = arith.mulf %412, %386 : vector<2x256xf32>
      %414 = arith.addf %411, %413 : vector<2x256xf32>
      %415 = vector.broadcast %395 : f32 to vector<2x256xf32>
      %416 = arith.mulf %415, %388 : vector<2x256xf32>
      %417 = arith.addf %414, %416 : vector<2x256xf32>
      %418 = vector.broadcast %396 : f32 to vector<2x256xf32>
      %419 = arith.mulf %418, %390 : vector<2x256xf32>
      %420 = arith.addf %417, %419 : vector<2x256xf32>
      %421 = vector.broadcast %393 : f32 to vector<2x256xf32>
      %422 = arith.mulf %421, %386 : vector<2x256xf32>
      %423 = arith.addf %380, %422 : vector<2x256xf32>
      %424 = vector.broadcast %394 : f32 to vector<2x256xf32>
      %425 = arith.mulf %424, %388 : vector<2x256xf32>
      %426 = arith.addf %423, %425 : vector<2x256xf32>
      %427 = vector.broadcast %395 : f32 to vector<2x256xf32>
      %428 = arith.mulf %427, %390 : vector<2x256xf32>
      %429 = arith.addf %426, %428 : vector<2x256xf32>
      %430 = vector.broadcast %396 : f32 to vector<2x256xf32>
      %431 = arith.mulf %430, %392 : vector<2x256xf32>
      %432 = arith.addf %429, %431 : vector<2x256xf32>
      %c0_205 = arith.constant 0 : index
      %c3_206 = arith.constant 3 : index
      %c0_207 = arith.constant 0 : index
      %c0_208 = arith.constant 0 : index
      %433 = vector.load %arg1[%c0_205, %c3_206, %c0_207, %c0_208] : memref<6x4x2x256xf32, #tpu.memory_space<vmem>>, vector<1x1x2x256xf32>
      %434 = vector.shape_cast %433 : vector<1x1x2x256xf32> to vector<2x256xf32>
      %c1_209 = arith.constant 1 : index
      %c3_210 = arith.constant 3 : index
      %c0_211 = arith.constant 0 : index
      %c0_212 = arith.constant 0 : index
      %435 = vector.load %arg1[%c1_209, %c3_210, %c0_211, %c0_212] : memref<6x4x2x256xf32, #tpu.memory_space<vmem>>, vector<1x1x2x256xf32>
      %436 = vector.shape_cast %435 : vector<1x1x2x256xf32> to vector<2x256xf32>
      %c2_213 = arith.constant 2 : index
      %c3_214 = arith.constant 3 : index
      %c0_215 = arith.constant 0 : index
      %c0_216 = arith.constant 0 : index
      %437 = vector.load %arg1[%c2_213, %c3_214, %c0_215, %c0_216] : memref<6x4x2x256xf32, #tpu.memory_space<vmem>>, vector<1x1x2x256xf32>
      %438 = vector.shape_cast %437 : vector<1x1x2x256xf32> to vector<2x256xf32>
      %c3_217 = arith.constant 3 : index
      %c3_218 = arith.constant 3 : index
      %c0_219 = arith.constant 0 : index
      %c0_220 = arith.constant 0 : index
      %439 = vector.load %arg1[%c3_217, %c3_218, %c0_219, %c0_220] : memref<6x4x2x256xf32, #tpu.memory_space<vmem>>, vector<1x1x2x256xf32>
      %440 = vector.shape_cast %439 : vector<1x1x2x256xf32> to vector<2x256xf32>
      %c4_221 = arith.constant 4 : index
      %c3_222 = arith.constant 3 : index
      %c0_223 = arith.constant 0 : index
      %c0_224 = arith.constant 0 : index
      %441 = vector.load %arg1[%c4_221, %c3_222, %c0_223, %c0_224] : memref<6x4x2x256xf32, #tpu.memory_space<vmem>>, vector<1x1x2x256xf32>
      %442 = vector.shape_cast %441 : vector<1x1x2x256xf32> to vector<2x256xf32>
      %c5_225 = arith.constant 5 : index
      %c3_226 = arith.constant 3 : index
      %c0_227 = arith.constant 0 : index
      %c0_228 = arith.constant 0 : index
      %443 = vector.load %arg1[%c5_225, %c3_226, %c0_227, %c0_228] : memref<6x4x2x256xf32, #tpu.memory_space<vmem>>, vector<1x1x2x256xf32>
      %444 = vector.shape_cast %443 : vector<1x1x2x256xf32> to vector<2x256xf32>
      %c28 = arith.constant 28 : index
      %445 = memref.load %arg2[%c28] : memref<64xf32, #tpu.memory_space<smem>>
      %c29 = arith.constant 29 : index
      %446 = memref.load %arg2[%c29] : memref<64xf32, #tpu.memory_space<smem>>
      %c30 = arith.constant 30 : index
      %447 = memref.load %arg2[%c30] : memref<64xf32, #tpu.memory_space<smem>>
      %c31 = arith.constant 31 : index
      %448 = memref.load %arg2[%c31] : memref<64xf32, #tpu.memory_space<smem>>
      %449 = vector.broadcast %445 : f32 to vector<2x256xf32>
      %450 = arith.mulf %449, %434 : vector<2x256xf32>
      %451 = arith.addf %408, %450 : vector<2x256xf32>
      %452 = vector.broadcast %446 : f32 to vector<2x256xf32>
      %453 = arith.mulf %452, %436 : vector<2x256xf32>
      %454 = arith.addf %451, %453 : vector<2x256xf32>
      %455 = vector.broadcast %447 : f32 to vector<2x256xf32>
      %456 = arith.mulf %455, %438 : vector<2x256xf32>
      %457 = arith.addf %454, %456 : vector<2x256xf32>
      %458 = vector.broadcast %448 : f32 to vector<2x256xf32>
      %459 = arith.mulf %458, %440 : vector<2x256xf32>
      %460 = arith.addf %457, %459 : vector<2x256xf32>
      %461 = vector.broadcast %445 : f32 to vector<2x256xf32>
      %462 = arith.mulf %461, %436 : vector<2x256xf32>
      %463 = arith.addf %420, %462 : vector<2x256xf32>
      %464 = vector.broadcast %446 : f32 to vector<2x256xf32>
      %465 = arith.mulf %464, %438 : vector<2x256xf32>
      %466 = arith.addf %463, %465 : vector<2x256xf32>
      %467 = vector.broadcast %447 : f32 to vector<2x256xf32>
      %468 = arith.mulf %467, %440 : vector<2x256xf32>
      %469 = arith.addf %466, %468 : vector<2x256xf32>
      %470 = vector.broadcast %448 : f32 to vector<2x256xf32>
      %471 = arith.mulf %470, %442 : vector<2x256xf32>
      %472 = arith.addf %469, %471 : vector<2x256xf32>
      %473 = vector.broadcast %445 : f32 to vector<2x256xf32>
      %474 = arith.mulf %473, %438 : vector<2x256xf32>
      %475 = arith.addf %432, %474 : vector<2x256xf32>
      %476 = vector.broadcast %446 : f32 to vector<2x256xf32>
      %477 = arith.mulf %476, %440 : vector<2x256xf32>
      %478 = arith.addf %475, %477 : vector<2x256xf32>
      %479 = vector.broadcast %447 : f32 to vector<2x256xf32>
      %480 = arith.mulf %479, %442 : vector<2x256xf32>
      %481 = arith.addf %478, %480 : vector<2x256xf32>
      %482 = vector.broadcast %448 : f32 to vector<2x256xf32>
      %483 = arith.mulf %482, %444 : vector<2x256xf32>
      %484 = arith.addf %481, %483 : vector<2x256xf32>
      %c1_229 = arith.constant 1 : index
      %485 = memref.load %arg3[%c1_229] : memref<4xf32, #tpu.memory_space<smem>>
      %486 = vector.broadcast %485 : f32 to vector<2x256xf32>
      %487 = arith.addf %460, %486 : vector<2x256xf32>
      %cst_230 = arith.constant 0.000000e+00 : f32
      %488 = vector.broadcast %cst_230 : f32 to vector<2x256xf32>
      %489 = arith.maximumf %487, %488 : vector<2x256xf32>
      %490 = vector.broadcast %485 : f32 to vector<2x256xf32>
      %491 = arith.addf %472, %490 : vector<2x256xf32>
      %cst_231 = arith.constant 0.000000e+00 : f32
      %492 = vector.broadcast %cst_231 : f32 to vector<2x256xf32>
      %493 = arith.maximumf %491, %492 : vector<2x256xf32>
      %494 = vector.broadcast %485 : f32 to vector<2x256xf32>
      %495 = arith.addf %484, %494 : vector<2x256xf32>
      %cst_232 = arith.constant 0.000000e+00 : f32
      %496 = vector.broadcast %cst_232 : f32 to vector<2x256xf32>
      %497 = arith.maximumf %495, %496 : vector<2x256xf32>
      %498 = arith.maximumf %489, %493 : vector<2x256xf32>
      %499 = arith.maximumf %498, %497 : vector<2x256xf32>
      %500 = arith.truncf %499 : vector<2x256xf32> to vector<2x256xbf16>
      %c0_233 = arith.constant 0 : index
      %c256 = arith.constant 256 : index
      %501 = vector.load %arg11[%c0_233, %c256] : memref<2x1024xbf16, #tpu.memory_space<vmem>>, vector<2x256xbf16>
      tpu.vector_store %arg11[%c0_233, %c256], %500 {strides = array<i32>} : memref<2x1024xbf16, #tpu.memory_space<vmem>>, vector<2x256xbf16>,
      %cst_234 = arith.constant 0.000000e+00 : f32
      %502 = vector.broadcast %cst_234 : f32 to vector<2x256xf32>
      %cst_235 = arith.constant 0.000000e+00 : f32
      %503 = vector.broadcast %cst_235 : f32 to vector<2x256xf32>
      %cst_236 = arith.constant 0.000000e+00 : f32
      %504 = vector.broadcast %cst_236 : f32 to vector<2x256xf32>
      %c0_237 = arith.constant 0 : index
      %c0_238 = arith.constant 0 : index
      %c0_239 = arith.constant 0 : index
      %c0_240 = arith.constant 0 : index
      %505 = vector.load %arg1[%c0_237, %c0_238, %c0_239, %c0_240] : memref<6x4x2x256xf32, #tpu.memory_space<vmem>>, vector<1x1x2x256xf32>
      %506 = vector.shape_cast %505 : vector<1x1x2x256xf32> to vector<2x256xf32>
      %c1_241 = arith.constant 1 : index
      %c0_242 = arith.constant 0 : index
      %c0_243 = arith.constant 0 : index
      %c0_244 = arith.constant 0 : index
      %507 = vector.load %arg1[%c1_241, %c0_242, %c0_243, %c0_244] : memref<6x4x2x256xf32, #tpu.memory_space<vmem>>, vector<1x1x2x256xf32>
      %508 = vector.shape_cast %507 : vector<1x1x2x256xf32> to vector<2x256xf32>
      %c2_245 = arith.constant 2 : index
      %c0_246 = arith.constant 0 : index
      %c0_247 = arith.constant 0 : index
      %c0_248 = arith.constant 0 : index
      %509 = vector.load %arg1[%c2_245, %c0_246, %c0_247, %c0_248] : memref<6x4x2x256xf32, #tpu.memory_space<vmem>>, vector<1x1x2x256xf32>
      %510 = vector.shape_cast %509 : vector<1x1x2x256xf32> to vector<2x256xf32>
      %c3_249 = arith.constant 3 : index
      %c0_250 = arith.constant 0 : index
      %c0_251 = arith.constant 0 : index
      %c0_252 = arith.constant 0 : index
      %511 = vector.load %arg1[%c3_249, %c0_250, %c0_251, %c0_252] : memref<6x4x2x256xf32, #tpu.memory_space<vmem>>, vector<1x1x2x256xf32>
      %512 = vector.shape_cast %511 : vector<1x1x2x256xf32> to vector<2x256xf32>
      %c4_253 = arith.constant 4 : index
      %c0_254 = arith.constant 0 : index
      %c0_255 = arith.constant 0 : index
      %c0_256 = arith.constant 0 : index
      %513 = vector.load %arg1[%c4_253, %c0_254, %c0_255, %c0_256] : memref<6x4x2x256xf32, #tpu.memory_space<vmem>>, vector<1x1x2x256xf32>
      %514 = vector.shape_cast %513 : vector<1x1x2x256xf32> to vector<2x256xf32>
      %c5_257 = arith.constant 5 : index
      %c0_258 = arith.constant 0 : index
      %c0_259 = arith.constant 0 : index
      %c0_260 = arith.constant 0 : index
      %515 = vector.load %arg1[%c5_257, %c0_258, %c0_259, %c0_260] : memref<6x4x2x256xf32, #tpu.memory_space<vmem>>, vector<1x1x2x256xf32>
      %516 = vector.shape_cast %515 : vector<1x1x2x256xf32> to vector<2x256xf32>
      %c32 = arith.constant 32 : index
      %517 = memref.load %arg2[%c32] : memref<64xf32, #tpu.memory_space<smem>>
      %c33 = arith.constant 33 : index
      %518 = memref.load %arg2[%c33] : memref<64xf32, #tpu.memory_space<smem>>
      %c34 = arith.constant 34 : index
      %519 = memref.load %arg2[%c34] : memref<64xf32, #tpu.memory_space<smem>>
      %c35 = arith.constant 35 : index
      %520 = memref.load %arg2[%c35] : memref<64xf32, #tpu.memory_space<smem>>
      %521 = vector.broadcast %517 : f32 to vector<2x256xf32>
      %522 = arith.mulf %521, %506 : vector<2x256xf32>
      %523 = arith.addf %502, %522 : vector<2x256xf32>
      %524 = vector.broadcast %518 : f32 to vector<2x256xf32>
      %525 = arith.mulf %524, %508 : vector<2x256xf32>
      %526 = arith.addf %523, %525 : vector<2x256xf32>
      %527 = vector.broadcast %519 : f32 to vector<2x256xf32>
      %528 = arith.mulf %527, %510 : vector<2x256xf32>
      %529 = arith.addf %526, %528 : vector<2x256xf32>
      %530 = vector.broadcast %520 : f32 to vector<2x256xf32>
      %531 = arith.mulf %530, %512 : vector<2x256xf32>
      %532 = arith.addf %529, %531 : vector<2x256xf32>
      %533 = vector.broadcast %517 : f32 to vector<2x256xf32>
      %534 = arith.mulf %533, %508 : vector<2x256xf32>
      %535 = arith.addf %503, %534 : vector<2x256xf32>
      %536 = vector.broadcast %518 : f32 to vector<2x256xf32>
      %537 = arith.mulf %536, %510 : vector<2x256xf32>
      %538 = arith.addf %535, %537 : vector<2x256xf32>
      %539 = vector.broadcast %519 : f32 to vector<2x256xf32>
      %540 = arith.mulf %539, %512 : vector<2x256xf32>
      %541 = arith.addf %538, %540 : vector<2x256xf32>
      %542 = vector.broadcast %520 : f32 to vector<2x256xf32>
      %543 = arith.mulf %542, %514 : vector<2x256xf32>
      %544 = arith.addf %541, %543 : vector<2x256xf32>
      %545 = vector.broadcast %517 : f32 to vector<2x256xf32>
      %546 = arith.mulf %545, %510 : vector<2x256xf32>
      %547 = arith.addf %504, %546 : vector<2x256xf32>
      %548 = vector.broadcast %518 : f32 to vector<2x256xf32>
      %549 = arith.mulf %548, %512 : vector<2x256xf32>
      %550 = arith.addf %547, %549 : vector<2x256xf32>
      %551 = vector.broadcast %519 : f32 to vector<2x256xf32>
      %552 = arith.mulf %551, %514 : vector<2x256xf32>
      %553 = arith.addf %550, %552 : vector<2x256xf32>
      %554 = vector.broadcast %520 : f32 to vector<2x256xf32>
      %555 = arith.mulf %554, %516 : vector<2x256xf32>
      %556 = arith.addf %553, %555 : vector<2x256xf32>
      %c0_261 = arith.constant 0 : index
      %c1_262 = arith.constant 1 : index
      %c0_263 = arith.constant 0 : index
      %c0_264 = arith.constant 0 : index
      %557 = vector.load %arg1[%c0_261, %c1_262, %c0_263, %c0_264] : memref<6x4x2x256xf32, #tpu.memory_space<vmem>>, vector<1x1x2x256xf32>
      %558 = vector.shape_cast %557 : vector<1x1x2x256xf32> to vector<2x256xf32>
      %c1_265 = arith.constant 1 : index
      %c1_266 = arith.constant 1 : index
      %c0_267 = arith.constant 0 : index
      %c0_268 = arith.constant 0 : index
      %559 = vector.load %arg1[%c1_265, %c1_266, %c0_267, %c0_268] : memref<6x4x2x256xf32, #tpu.memory_space<vmem>>, vector<1x1x2x256xf32>
      %560 = vector.shape_cast %559 : vector<1x1x2x256xf32> to vector<2x256xf32>
      %c2_269 = arith.constant 2 : index
      %c1_270 = arith.constant 1 : index
      %c0_271 = arith.constant 0 : index
      %c0_272 = arith.constant 0 : index
      %561 = vector.load %arg1[%c2_269, %c1_270, %c0_271, %c0_272] : memref<6x4x2x256xf32, #tpu.memory_space<vmem>>, vector<1x1x2x256xf32>
      %562 = vector.shape_cast %561 : vector<1x1x2x256xf32> to vector<2x256xf32>
      %c3_273 = arith.constant 3 : index
      %c1_274 = arith.constant 1 : index
      %c0_275 = arith.constant 0 : index
      %c0_276 = arith.constant 0 : index
      %563 = vector.load %arg1[%c3_273, %c1_274, %c0_275, %c0_276] : memref<6x4x2x256xf32, #tpu.memory_space<vmem>>, vector<1x1x2x256xf32>
      %564 = vector.shape_cast %563 : vector<1x1x2x256xf32> to vector<2x256xf32>
      %c4_277 = arith.constant 4 : index
      %c1_278 = arith.constant 1 : index
      %c0_279 = arith.constant 0 : index
      %c0_280 = arith.constant 0 : index
      %565 = vector.load %arg1[%c4_277, %c1_278, %c0_279, %c0_280] : memref<6x4x2x256xf32, #tpu.memory_space<vmem>>, vector<1x1x2x256xf32>
      %566 = vector.shape_cast %565 : vector<1x1x2x256xf32> to vector<2x256xf32>
      %c5_281 = arith.constant 5 : index
      %c1_282 = arith.constant 1 : index
      %c0_283 = arith.constant 0 : index
      %c0_284 = arith.constant 0 : index
      %567 = vector.load %arg1[%c5_281, %c1_282, %c0_283, %c0_284] : memref<6x4x2x256xf32, #tpu.memory_space<vmem>>, vector<1x1x2x256xf32>
      %568 = vector.shape_cast %567 : vector<1x1x2x256xf32> to vector<2x256xf32>
      %c36 = arith.constant 36 : index
      %569 = memref.load %arg2[%c36] : memref<64xf32, #tpu.memory_space<smem>>
      %c37 = arith.constant 37 : index
      %570 = memref.load %arg2[%c37] : memref<64xf32, #tpu.memory_space<smem>>
      %c38 = arith.constant 38 : index
      %571 = memref.load %arg2[%c38] : memref<64xf32, #tpu.memory_space<smem>>
      %c39 = arith.constant 39 : index
      %572 = memref.load %arg2[%c39] : memref<64xf32, #tpu.memory_space<smem>>
      %573 = vector.broadcast %569 : f32 to vector<2x256xf32>
      %574 = arith.mulf %573, %558 : vector<2x256xf32>
      %575 = arith.addf %532, %574 : vector<2x256xf32>
      %576 = vector.broadcast %570 : f32 to vector<2x256xf32>
      %577 = arith.mulf %576, %560 : vector<2x256xf32>
      %578 = arith.addf %575, %577 : vector<2x256xf32>
      %579 = vector.broadcast %571 : f32 to vector<2x256xf32>
      %580 = arith.mulf %579, %562 : vector<2x256xf32>
      %581 = arith.addf %578, %580 : vector<2x256xf32>
      %582 = vector.broadcast %572 : f32 to vector<2x256xf32>
      %583 = arith.mulf %582, %564 : vector<2x256xf32>
      %584 = arith.addf %581, %583 : vector<2x256xf32>
      %585 = vector.broadcast %569 : f32 to vector<2x256xf32>
      %586 = arith.mulf %585, %560 : vector<2x256xf32>
      %587 = arith.addf %544, %586 : vector<2x256xf32>
      %588 = vector.broadcast %570 : f32 to vector<2x256xf32>
      %589 = arith.mulf %588, %562 : vector<2x256xf32>
      %590 = arith.addf %587, %589 : vector<2x256xf32>
      %591 = vector.broadcast %571 : f32 to vector<2x256xf32>
      %592 = arith.mulf %591, %564 : vector<2x256xf32>
      %593 = arith.addf %590, %592 : vector<2x256xf32>
      %594 = vector.broadcast %572 : f32 to vector<2x256xf32>
      %595 = arith.mulf %594, %566 : vector<2x256xf32>
      %596 = arith.addf %593, %595 : vector<2x256xf32>
      %597 = vector.broadcast %569 : f32 to vector<2x256xf32>
      %598 = arith.mulf %597, %562 : vector<2x256xf32>
      %599 = arith.addf %556, %598 : vector<2x256xf32>
      %600 = vector.broadcast %570 : f32 to vector<2x256xf32>
      %601 = arith.mulf %600, %564 : vector<2x256xf32>
      %602 = arith.addf %599, %601 : vector<2x256xf32>
      %603 = vector.broadcast %571 : f32 to vector<2x256xf32>
      %604 = arith.mulf %603, %566 : vector<2x256xf32>
      %605 = arith.addf %602, %604 : vector<2x256xf32>
      %606 = vector.broadcast %572 : f32 to vector<2x256xf32>
      %607 = arith.mulf %606, %568 : vector<2x256xf32>
      %608 = arith.addf %605, %607 : vector<2x256xf32>
      %c0_285 = arith.constant 0 : index
      %c2_286 = arith.constant 2 : index
      %c0_287 = arith.constant 0 : index
      %c0_288 = arith.constant 0 : index
      %609 = vector.load %arg1[%c0_285, %c2_286, %c0_287, %c0_288] : memref<6x4x2x256xf32, #tpu.memory_space<vmem>>, vector<1x1x2x256xf32>
      %610 = vector.shape_cast %609 : vector<1x1x2x256xf32> to vector<2x256xf32>
      %c1_289 = arith.constant 1 : index
      %c2_290 = arith.constant 2 : index
      %c0_291 = arith.constant 0 : index
      %c0_292 = arith.constant 0 : index
      %611 = vector.load %arg1[%c1_289, %c2_290, %c0_291, %c0_292] : memref<6x4x2x256xf32, #tpu.memory_space<vmem>>, vector<1x1x2x256xf32>
      %612 = vector.shape_cast %611 : vector<1x1x2x256xf32> to vector<2x256xf32>
      %c2_293 = arith.constant 2 : index
      %c2_294 = arith.constant 2 : index
      %c0_295 = arith.constant 0 : index
      %c0_296 = arith.constant 0 : index
      %613 = vector.load %arg1[%c2_293, %c2_294, %c0_295, %c0_296] : memref<6x4x2x256xf32, #tpu.memory_space<vmem>>, vector<1x1x2x256xf32>
      %614 = vector.shape_cast %613 : vector<1x1x2x256xf32> to vector<2x256xf32>
      %c3_297 = arith.constant 3 : index
      %c2_298 = arith.constant 2 : index
      %c0_299 = arith.constant 0 : index
      %c0_300 = arith.constant 0 : index
      %615 = vector.load %arg1[%c3_297, %c2_298, %c0_299, %c0_300] : memref<6x4x2x256xf32, #tpu.memory_space<vmem>>, vector<1x1x2x256xf32>
      %616 = vector.shape_cast %615 : vector<1x1x2x256xf32> to vector<2x256xf32>
      %c4_301 = arith.constant 4 : index
      %c2_302 = arith.constant 2 : index
      %c0_303 = arith.constant 0 : index
      %c0_304 = arith.constant 0 : index
      %617 = vector.load %arg1[%c4_301, %c2_302, %c0_303, %c0_304] : memref<6x4x2x256xf32, #tpu.memory_space<vmem>>, vector<1x1x2x256xf32>
      %618 = vector.shape_cast %617 : vector<1x1x2x256xf32> to vector<2x256xf32>
      %c5_305 = arith.constant 5 : index
      %c2_306 = arith.constant 2 : index
      %c0_307 = arith.constant 0 : index
      %c0_308 = arith.constant 0 : index
      %619 = vector.load %arg1[%c5_305, %c2_306, %c0_307, %c0_308] : memref<6x4x2x256xf32, #tpu.memory_space<vmem>>, vector<1x1x2x256xf32>
      %620 = vector.shape_cast %619 : vector<1x1x2x256xf32> to vector<2x256xf32>
      %c40 = arith.constant 40 : index
      %621 = memref.load %arg2[%c40] : memref<64xf32, #tpu.memory_space<smem>>
      %c41 = arith.constant 41 : index
      %622 = memref.load %arg2[%c41] : memref<64xf32, #tpu.memory_space<smem>>
      %c42 = arith.constant 42 : index
      %623 = memref.load %arg2[%c42] : memref<64xf32, #tpu.memory_space<smem>>
      %c43 = arith.constant 43 : index
      %624 = memref.load %arg2[%c43] : memref<64xf32, #tpu.memory_space<smem>>
      %625 = vector.broadcast %621 : f32 to vector<2x256xf32>
      %626 = arith.mulf %625, %610 : vector<2x256xf32>
      %627 = arith.addf %584, %626 : vector<2x256xf32>
      %628 = vector.broadcast %622 : f32 to vector<2x256xf32>
      %629 = arith.mulf %628, %612 : vector<2x256xf32>
      %630 = arith.addf %627, %629 : vector<2x256xf32>
      %631 = vector.broadcast %623 : f32 to vector<2x256xf32>
      %632 = arith.mulf %631, %614 : vector<2x256xf32>
      %633 = arith.addf %630, %632 : vector<2x256xf32>
      %634 = vector.broadcast %624 : f32 to vector<2x256xf32>
      %635 = arith.mulf %634, %616 : vector<2x256xf32>
      %636 = arith.addf %633, %635 : vector<2x256xf32>
      %637 = vector.broadcast %621 : f32 to vector<2x256xf32>
      %638 = arith.mulf %637, %612 : vector<2x256xf32>
      %639 = arith.addf %596, %638 : vector<2x256xf32>
      %640 = vector.broadcast %622 : f32 to vector<2x256xf32>
      %641 = arith.mulf %640, %614 : vector<2x256xf32>
      %642 = arith.addf %639, %641 : vector<2x256xf32>
      %643 = vector.broadcast %623 : f32 to vector<2x256xf32>
      %644 = arith.mulf %643, %616 : vector<2x256xf32>
      %645 = arith.addf %642, %644 : vector<2x256xf32>
      %646 = vector.broadcast %624 : f32 to vector<2x256xf32>
      %647 = arith.mulf %646, %618 : vector<2x256xf32>
      %648 = arith.addf %645, %647 : vector<2x256xf32>
      %649 = vector.broadcast %621 : f32 to vector<2x256xf32>
      %650 = arith.mulf %649, %614 : vector<2x256xf32>
      %651 = arith.addf %608, %650 : vector<2x256xf32>
      %652 = vector.broadcast %622 : f32 to vector<2x256xf32>
      %653 = arith.mulf %652, %616 : vector<2x256xf32>
      %654 = arith.addf %651, %653 : vector<2x256xf32>
      %655 = vector.broadcast %623 : f32 to vector<2x256xf32>
      %656 = arith.mulf %655, %618 : vector<2x256xf32>
      %657 = arith.addf %654, %656 : vector<2x256xf32>
      %658 = vector.broadcast %624 : f32 to vector<2x256xf32>
      %659 = arith.mulf %658, %620 : vector<2x256xf32>
      %660 = arith.addf %657, %659 : vector<2x256xf32>
      %c0_309 = arith.constant 0 : index
      %c3_310 = arith.constant 3 : index
      %c0_311 = arith.constant 0 : index
      %c0_312 = arith.constant 0 : index
      %661 = vector.load %arg1[%c0_309, %c3_310, %c0_311, %c0_312] : memref<6x4x2x256xf32, #tpu.memory_space<vmem>>, vector<1x1x2x256xf32>
      %662 = vector.shape_cast %661 : vector<1x1x2x256xf32> to vector<2x256xf32>
      %c1_313 = arith.constant 1 : index
      %c3_314 = arith.constant 3 : index
      %c0_315 = arith.constant 0 : index
      %c0_316 = arith.constant 0 : index
      %663 = vector.load %arg1[%c1_313, %c3_314, %c0_315, %c0_316] : memref<6x4x2x256xf32, #tpu.memory_space<vmem>>, vector<1x1x2x256xf32>
      %664 = vector.shape_cast %663 : vector<1x1x2x256xf32> to vector<2x256xf32>
      %c2_317 = arith.constant 2 : index
      %c3_318 = arith.constant 3 : index
      %c0_319 = arith.constant 0 : index
      %c0_320 = arith.constant 0 : index
      %665 = vector.load %arg1[%c2_317, %c3_318, %c0_319, %c0_320] : memref<6x4x2x256xf32, #tpu.memory_space<vmem>>, vector<1x1x2x256xf32>
      %666 = vector.shape_cast %665 : vector<1x1x2x256xf32> to vector<2x256xf32>
      %c3_321 = arith.constant 3 : index
      %c3_322 = arith.constant 3 : index
      %c0_323 = arith.constant 0 : index
      %c0_324 = arith.constant 0 : index
      %667 = vector.load %arg1[%c3_321, %c3_322, %c0_323, %c0_324] : memref<6x4x2x256xf32, #tpu.memory_space<vmem>>, vector<1x1x2x256xf32>
      %668 = vector.shape_cast %667 : vector<1x1x2x256xf32> to vector<2x256xf32>
      %c4_325 = arith.constant 4 : index
      %c3_326 = arith.constant 3 : index
      %c0_327 = arith.constant 0 : index
      %c0_328 = arith.constant 0 : index
      %669 = vector.load %arg1[%c4_325, %c3_326, %c0_327, %c0_328] : memref<6x4x2x256xf32, #tpu.memory_space<vmem>>, vector<1x1x2x256xf32>
      %670 = vector.shape_cast %669 : vector<1x1x2x256xf32> to vector<2x256xf32>
      %c5_329 = arith.constant 5 : index
      %c3_330 = arith.constant 3 : index
      %c0_331 = arith.constant 0 : index
      %c0_332 = arith.constant 0 : index
      %671 = vector.load %arg1[%c5_329, %c3_330, %c0_331, %c0_332] : memref<6x4x2x256xf32, #tpu.memory_space<vmem>>, vector<1x1x2x256xf32>
      %672 = vector.shape_cast %671 : vector<1x1x2x256xf32> to vector<2x256xf32>
      %c44 = arith.constant 44 : index
      %673 = memref.load %arg2[%c44] : memref<64xf32, #tpu.memory_space<smem>>
      %c45 = arith.constant 45 : index
      %674 = memref.load %arg2[%c45] : memref<64xf32, #tpu.memory_space<smem>>
      %c46 = arith.constant 46 : index
      %675 = memref.load %arg2[%c46] : memref<64xf32, #tpu.memory_space<smem>>
      %c47 = arith.constant 47 : index
      %676 = memref.load %arg2[%c47] : memref<64xf32, #tpu.memory_space<smem>>
      %677 = vector.broadcast %673 : f32 to vector<2x256xf32>
      %678 = arith.mulf %677, %662 : vector<2x256xf32>
      %679 = arith.addf %636, %678 : vector<2x256xf32>
      %680 = vector.broadcast %674 : f32 to vector<2x256xf32>
      %681 = arith.mulf %680, %664 : vector<2x256xf32>
      %682 = arith.addf %679, %681 : vector<2x256xf32>
      %683 = vector.broadcast %675 : f32 to vector<2x256xf32>
      %684 = arith.mulf %683, %666 : vector<2x256xf32>
      %685 = arith.addf %682, %684 : vector<2x256xf32>
      %686 = vector.broadcast %676 : f32 to vector<2x256xf32>
      %687 = arith.mulf %686, %668 : vector<2x256xf32>
      %688 = arith.addf %685, %687 : vector<2x256xf32>
      %689 = vector.broadcast %673 : f32 to vector<2x256xf32>
      %690 = arith.mulf %689, %664 : vector<2x256xf32>
      %691 = arith.addf %648, %690 : vector<2x256xf32>
      %692 = vector.broadcast %674 : f32 to vector<2x256xf32>
      %693 = arith.mulf %692, %666 : vector<2x256xf32>
      %694 = arith.addf %691, %693 : vector<2x256xf32>
      %695 = vector.broadcast %675 : f32 to vector<2x256xf32>
      %696 = arith.mulf %695, %668 : vector<2x256xf32>
      %697 = arith.addf %694, %696 : vector<2x256xf32>
      %698 = vector.broadcast %676 : f32 to vector<2x256xf32>
      %699 = arith.mulf %698, %670 : vector<2x256xf32>
      %700 = arith.addf %697, %699 : vector<2x256xf32>
      %701 = vector.broadcast %673 : f32 to vector<2x256xf32>
      %702 = arith.mulf %701, %666 : vector<2x256xf32>
      %703 = arith.addf %660, %702 : vector<2x256xf32>
      %704 = vector.broadcast %674 : f32 to vector<2x256xf32>
      %705 = arith.mulf %704, %668 : vector<2x256xf32>
      %706 = arith.addf %703, %705 : vector<2x256xf32>
      %707 = vector.broadcast %675 : f32 to vector<2x256xf32>
      %708 = arith.mulf %707, %670 : vector<2x256xf32>
      %709 = arith.addf %706, %708 : vector<2x256xf32>
      %710 = vector.broadcast %676 : f32 to vector<2x256xf32>
      %711 = arith.mulf %710, %672 : vector<2x256xf32>
      %712 = arith.addf %709, %711 : vector<2x256xf32>
      %c2_333 = arith.constant 2 : index
      %713 = memref.load %arg3[%c2_333] : memref<4xf32, #tpu.memory_space<smem>>
      %714 = vector.broadcast %713 : f32 to vector<2x256xf32>
      %715 = arith.addf %688, %714 : vector<2x256xf32>
      %cst_334 = arith.constant 0.000000e+00 : f32
      %716 = vector.broadcast %cst_334 : f32 to vector<2x256xf32>
      %717 = arith.maximumf %715, %716 : vector<2x256xf32>
      %718 = vector.broadcast %713 : f32 to vector<2x256xf32>
      %719 = arith.addf %700, %718 : vector<2x256xf32>
      %cst_335 = arith.constant 0.000000e+00 : f32
      %720 = vector.broadcast %cst_335 : f32 to vector<2x256xf32>
      %721 = arith.maximumf %719, %720 : vector<2x256xf32>
      %722 = vector.broadcast %713 : f32 to vector<2x256xf32>
      %723 = arith.addf %712, %722 : vector<2x256xf32>
      %cst_336 = arith.constant 0.000000e+00 : f32
      %724 = vector.broadcast %cst_336 : f32 to vector<2x256xf32>
      %725 = arith.maximumf %723, %724 : vector<2x256xf32>
      %726 = arith.maximumf %717, %721 : vector<2x256xf32>
      %727 = arith.maximumf %726, %725 : vector<2x256xf32>
      %728 = arith.truncf %727 : vector<2x256xf32> to vector<2x256xbf16>
      %c0_337 = arith.constant 0 : index
      %c512 = arith.constant 512 : index
      %729 = vector.load %arg11[%c0_337, %c512] : memref<2x1024xbf16, #tpu.memory_space<vmem>>, vector<2x256xbf16>
      tpu.vector_store %arg11[%c0_337, %c512], %728 {strides = array<i32>} : memref<2x1024xbf16, #tpu.memory_space<vmem>>, vector<2x256xbf16>,
      %cst_338 = arith.constant 0.000000e+00 : f32
      %730 = vector.broadcast %cst_338 : f32 to vector<2x256xf32>
      %cst_339 = arith.constant 0.000000e+00 : f32
      %731 = vector.broadcast %cst_339 : f32 to vector<2x256xf32>
      %cst_340 = arith.constant 0.000000e+00 : f32
      %732 = vector.broadcast %cst_340 : f32 to vector<2x256xf32>
      %c0_341 = arith.constant 0 : index
      %c0_342 = arith.constant 0 : index
      %c0_343 = arith.constant 0 : index
      %c0_344 = arith.constant 0 : index
      %733 = vector.load %arg1[%c0_341, %c0_342, %c0_343, %c0_344] : memref<6x4x2x256xf32, #tpu.memory_space<vmem>>, vector<1x1x2x256xf32>
      %734 = vector.shape_cast %733 : vector<1x1x2x256xf32> to vector<2x256xf32>
      %c1_345 = arith.constant 1 : index
      %c0_346 = arith.constant 0 : index
      %c0_347 = arith.constant 0 : index
      %c0_348 = arith.constant 0 : index
      %735 = vector.load %arg1[%c1_345, %c0_346, %c0_347, %c0_348] : memref<6x4x2x256xf32, #tpu.memory_space<vmem>>, vector<1x1x2x256xf32>
      %736 = vector.shape_cast %735 : vector<1x1x2x256xf32> to vector<2x256xf32>
      %c2_349 = arith.constant 2 : index
      %c0_350 = arith.constant 0 : index
      %c0_351 = arith.constant 0 : index
      %c0_352 = arith.constant 0 : index
      %737 = vector.load %arg1[%c2_349, %c0_350, %c0_351, %c0_352] : memref<6x4x2x256xf32, #tpu.memory_space<vmem>>, vector<1x1x2x256xf32>
      %738 = vector.shape_cast %737 : vector<1x1x2x256xf32> to vector<2x256xf32>
      %c3_353 = arith.constant 3 : index
      %c0_354 = arith.constant 0 : index
      %c0_355 = arith.constant 0 : index
      %c0_356 = arith.constant 0 : index
      %739 = vector.load %arg1[%c3_353, %c0_354, %c0_355, %c0_356] : memref<6x4x2x256xf32, #tpu.memory_space<vmem>>, vector<1x1x2x256xf32>
      %740 = vector.shape_cast %739 : vector<1x1x2x256xf32> to vector<2x256xf32>
      %c4_357 = arith.constant 4 : index
      %c0_358 = arith.constant 0 : index
      %c0_359 = arith.constant 0 : index
      %c0_360 = arith.constant 0 : index
      %741 = vector.load %arg1[%c4_357, %c0_358, %c0_359, %c0_360] : memref<6x4x2x256xf32, #tpu.memory_space<vmem>>, vector<1x1x2x256xf32>
      %742 = vector.shape_cast %741 : vector<1x1x2x256xf32> to vector<2x256xf32>
      %c5_361 = arith.constant 5 : index
      %c0_362 = arith.constant 0 : index
      %c0_363 = arith.constant 0 : index
      %c0_364 = arith.constant 0 : index
      %743 = vector.load %arg1[%c5_361, %c0_362, %c0_363, %c0_364] : memref<6x4x2x256xf32, #tpu.memory_space<vmem>>, vector<1x1x2x256xf32>
      %744 = vector.shape_cast %743 : vector<1x1x2x256xf32> to vector<2x256xf32>
      %c48 = arith.constant 48 : index
      %745 = memref.load %arg2[%c48] : memref<64xf32, #tpu.memory_space<smem>>
      %c49 = arith.constant 49 : index
      %746 = memref.load %arg2[%c49] : memref<64xf32, #tpu.memory_space<smem>>
      %c50 = arith.constant 50 : index
      %747 = memref.load %arg2[%c50] : memref<64xf32, #tpu.memory_space<smem>>
      %c51 = arith.constant 51 : index
      %748 = memref.load %arg2[%c51] : memref<64xf32, #tpu.memory_space<smem>>
      %749 = vector.broadcast %745 : f32 to vector<2x256xf32>
      %750 = arith.mulf %749, %734 : vector<2x256xf32>
      %751 = arith.addf %730, %750 : vector<2x256xf32>
      %752 = vector.broadcast %746 : f32 to vector<2x256xf32>
      %753 = arith.mulf %752, %736 : vector<2x256xf32>
      %754 = arith.addf %751, %753 : vector<2x256xf32>
      %755 = vector.broadcast %747 : f32 to vector<2x256xf32>
      %756 = arith.mulf %755, %738 : vector<2x256xf32>
      %757 = arith.addf %754, %756 : vector<2x256xf32>
      %758 = vector.broadcast %748 : f32 to vector<2x256xf32>
      %759 = arith.mulf %758, %740 : vector<2x256xf32>
      %760 = arith.addf %757, %759 : vector<2x256xf32>
      %761 = vector.broadcast %745 : f32 to vector<2x256xf32>
      %762 = arith.mulf %761, %736 : vector<2x256xf32>
      %763 = arith.addf %731, %762 : vector<2x256xf32>
      %764 = vector.broadcast %746 : f32 to vector<2x256xf32>
      %765 = arith.mulf %764, %738 : vector<2x256xf32>
      %766 = arith.addf %763, %765 : vector<2x256xf32>
      %767 = vector.broadcast %747 : f32 to vector<2x256xf32>
      %768 = arith.mulf %767, %740 : vector<2x256xf32>
      %769 = arith.addf %766, %768 : vector<2x256xf32>
      %770 = vector.broadcast %748 : f32 to vector<2x256xf32>
      %771 = arith.mulf %770, %742 : vector<2x256xf32>
      %772 = arith.addf %769, %771 : vector<2x256xf32>
      %773 = vector.broadcast %745 : f32 to vector<2x256xf32>
      %774 = arith.mulf %773, %738 : vector<2x256xf32>
      %775 = arith.addf %732, %774 : vector<2x256xf32>
      %776 = vector.broadcast %746 : f32 to vector<2x256xf32>
      %777 = arith.mulf %776, %740 : vector<2x256xf32>
      %778 = arith.addf %775, %777 : vector<2x256xf32>
      %779 = vector.broadcast %747 : f32 to vector<2x256xf32>
      %780 = arith.mulf %779, %742 : vector<2x256xf32>
      %781 = arith.addf %778, %780 : vector<2x256xf32>
      %782 = vector.broadcast %748 : f32 to vector<2x256xf32>
      %783 = arith.mulf %782, %744 : vector<2x256xf32>
      %784 = arith.addf %781, %783 : vector<2x256xf32>
      %c0_365 = arith.constant 0 : index
      %c1_366 = arith.constant 1 : index
      %c0_367 = arith.constant 0 : index
      %c0_368 = arith.constant 0 : index
      %785 = vector.load %arg1[%c0_365, %c1_366, %c0_367, %c0_368] : memref<6x4x2x256xf32, #tpu.memory_space<vmem>>, vector<1x1x2x256xf32>
      %786 = vector.shape_cast %785 : vector<1x1x2x256xf32> to vector<2x256xf32>
      %c1_369 = arith.constant 1 : index
      %c1_370 = arith.constant 1 : index
      %c0_371 = arith.constant 0 : index
      %c0_372 = arith.constant 0 : index
      %787 = vector.load %arg1[%c1_369, %c1_370, %c0_371, %c0_372] : memref<6x4x2x256xf32, #tpu.memory_space<vmem>>, vector<1x1x2x256xf32>
      %788 = vector.shape_cast %787 : vector<1x1x2x256xf32> to vector<2x256xf32>
      %c2_373 = arith.constant 2 : index
      %c1_374 = arith.constant 1 : index
      %c0_375 = arith.constant 0 : index
      %c0_376 = arith.constant 0 : index
      %789 = vector.load %arg1[%c2_373, %c1_374, %c0_375, %c0_376] : memref<6x4x2x256xf32, #tpu.memory_space<vmem>>, vector<1x1x2x256xf32>
      %790 = vector.shape_cast %789 : vector<1x1x2x256xf32> to vector<2x256xf32>
      %c3_377 = arith.constant 3 : index
      %c1_378 = arith.constant 1 : index
      %c0_379 = arith.constant 0 : index
      %c0_380 = arith.constant 0 : index
      %791 = vector.load %arg1[%c3_377, %c1_378, %c0_379, %c0_380] : memref<6x4x2x256xf32, #tpu.memory_space<vmem>>, vector<1x1x2x256xf32>
      %792 = vector.shape_cast %791 : vector<1x1x2x256xf32> to vector<2x256xf32>
      %c4_381 = arith.constant 4 : index
      %c1_382 = arith.constant 1 : index
      %c0_383 = arith.constant 0 : index
      %c0_384 = arith.constant 0 : index
      %793 = vector.load %arg1[%c4_381, %c1_382, %c0_383, %c0_384] : memref<6x4x2x256xf32, #tpu.memory_space<vmem>>, vector<1x1x2x256xf32>
      %794 = vector.shape_cast %793 : vector<1x1x2x256xf32> to vector<2x256xf32>
      %c5_385 = arith.constant 5 : index
      %c1_386 = arith.constant 1 : index
      %c0_387 = arith.constant 0 : index
      %c0_388 = arith.constant 0 : index
      %795 = vector.load %arg1[%c5_385, %c1_386, %c0_387, %c0_388] : memref<6x4x2x256xf32, #tpu.memory_space<vmem>>, vector<1x1x2x256xf32>
      %796 = vector.shape_cast %795 : vector<1x1x2x256xf32> to vector<2x256xf32>
      %c52 = arith.constant 52 : index
      %797 = memref.load %arg2[%c52] : memref<64xf32, #tpu.memory_space<smem>>
      %c53 = arith.constant 53 : index
      %798 = memref.load %arg2[%c53] : memref<64xf32, #tpu.memory_space<smem>>
      %c54 = arith.constant 54 : index
      %799 = memref.load %arg2[%c54] : memref<64xf32, #tpu.memory_space<smem>>
      %c55 = arith.constant 55 : index
      %800 = memref.load %arg2[%c55] : memref<64xf32, #tpu.memory_space<smem>>
      %801 = vector.broadcast %797 : f32 to vector<2x256xf32>
      %802 = arith.mulf %801, %786 : vector<2x256xf32>
      %803 = arith.addf %760, %802 : vector<2x256xf32>
      %804 = vector.broadcast %798 : f32 to vector<2x256xf32>
      %805 = arith.mulf %804, %788 : vector<2x256xf32>
      %806 = arith.addf %803, %805 : vector<2x256xf32>
      %807 = vector.broadcast %799 : f32 to vector<2x256xf32>
      %808 = arith.mulf %807, %790 : vector<2x256xf32>
      %809 = arith.addf %806, %808 : vector<2x256xf32>
      %810 = vector.broadcast %800 : f32 to vector<2x256xf32>
      %811 = arith.mulf %810, %792 : vector<2x256xf32>
      %812 = arith.addf %809, %811 : vector<2x256xf32>
      %813 = vector.broadcast %797 : f32 to vector<2x256xf32>
      %814 = arith.mulf %813, %788 : vector<2x256xf32>
      %815 = arith.addf %772, %814 : vector<2x256xf32>
      %816 = vector.broadcast %798 : f32 to vector<2x256xf32>
      %817 = arith.mulf %816, %790 : vector<2x256xf32>
      %818 = arith.addf %815, %817 : vector<2x256xf32>
      %819 = vector.broadcast %799 : f32 to vector<2x256xf32>
      %820 = arith.mulf %819, %792 : vector<2x256xf32>
      %821 = arith.addf %818, %820 : vector<2x256xf32>
      %822 = vector.broadcast %800 : f32 to vector<2x256xf32>
      %823 = arith.mulf %822, %794 : vector<2x256xf32>
      %824 = arith.addf %821, %823 : vector<2x256xf32>
      %825 = vector.broadcast %797 : f32 to vector<2x256xf32>
      %826 = arith.mulf %825, %790 : vector<2x256xf32>
      %827 = arith.addf %784, %826 : vector<2x256xf32>
      %828 = vector.broadcast %798 : f32 to vector<2x256xf32>
      %829 = arith.mulf %828, %792 : vector<2x256xf32>
      %830 = arith.addf %827, %829 : vector<2x256xf32>
      %831 = vector.broadcast %799 : f32 to vector<2x256xf32>
      %832 = arith.mulf %831, %794 : vector<2x256xf32>
      %833 = arith.addf %830, %832 : vector<2x256xf32>
      %834 = vector.broadcast %800 : f32 to vector<2x256xf32>
      %835 = arith.mulf %834, %796 : vector<2x256xf32>
      %836 = arith.addf %833, %835 : vector<2x256xf32>
      %c0_389 = arith.constant 0 : index
      %c2_390 = arith.constant 2 : index
      %c0_391 = arith.constant 0 : index
      %c0_392 = arith.constant 0 : index
      %837 = vector.load %arg1[%c0_389, %c2_390, %c0_391, %c0_392] : memref<6x4x2x256xf32, #tpu.memory_space<vmem>>, vector<1x1x2x256xf32>
      %838 = vector.shape_cast %837 : vector<1x1x2x256xf32> to vector<2x256xf32>
      %c1_393 = arith.constant 1 : index
      %c2_394 = arith.constant 2 : index
      %c0_395 = arith.constant 0 : index
      %c0_396 = arith.constant 0 : index
      %839 = vector.load %arg1[%c1_393, %c2_394, %c0_395, %c0_396] : memref<6x4x2x256xf32, #tpu.memory_space<vmem>>, vector<1x1x2x256xf32>
      %840 = vector.shape_cast %839 : vector<1x1x2x256xf32> to vector<2x256xf32>
      %c2_397 = arith.constant 2 : index
      %c2_398 = arith.constant 2 : index
      %c0_399 = arith.constant 0 : index
      %c0_400 = arith.constant 0 : index
      %841 = vector.load %arg1[%c2_397, %c2_398, %c0_399, %c0_400] : memref<6x4x2x256xf32, #tpu.memory_space<vmem>>, vector<1x1x2x256xf32>
      %842 = vector.shape_cast %841 : vector<1x1x2x256xf32> to vector<2x256xf32>
      %c3_401 = arith.constant 3 : index
      %c2_402 = arith.constant 2 : index
      %c0_403 = arith.constant 0 : index
      %c0_404 = arith.constant 0 : index
      %843 = vector.load %arg1[%c3_401, %c2_402, %c0_403, %c0_404] : memref<6x4x2x256xf32, #tpu.memory_space<vmem>>, vector<1x1x2x256xf32>
      %844 = vector.shape_cast %843 : vector<1x1x2x256xf32> to vector<2x256xf32>
      %c4_405 = arith.constant 4 : index
      %c2_406 = arith.constant 2 : index
      %c0_407 = arith.constant 0 : index
      %c0_408 = arith.constant 0 : index
      %845 = vector.load %arg1[%c4_405, %c2_406, %c0_407, %c0_408] : memref<6x4x2x256xf32, #tpu.memory_space<vmem>>, vector<1x1x2x256xf32>
      %846 = vector.shape_cast %845 : vector<1x1x2x256xf32> to vector<2x256xf32>
      %c5_409 = arith.constant 5 : index
      %c2_410 = arith.constant 2 : index
      %c0_411 = arith.constant 0 : index
      %c0_412 = arith.constant 0 : index
      %847 = vector.load %arg1[%c5_409, %c2_410, %c0_411, %c0_412] : memref<6x4x2x256xf32, #tpu.memory_space<vmem>>, vector<1x1x2x256xf32>
      %848 = vector.shape_cast %847 : vector<1x1x2x256xf32> to vector<2x256xf32>
      %c56 = arith.constant 56 : index
      %849 = memref.load %arg2[%c56] : memref<64xf32, #tpu.memory_space<smem>>
      %c57 = arith.constant 57 : index
      %850 = memref.load %arg2[%c57] : memref<64xf32, #tpu.memory_space<smem>>
      %c58 = arith.constant 58 : index
      %851 = memref.load %arg2[%c58] : memref<64xf32, #tpu.memory_space<smem>>
      %c59 = arith.constant 59 : index
      %852 = memref.load %arg2[%c59] : memref<64xf32, #tpu.memory_space<smem>>
      %853 = vector.broadcast %849 : f32 to vector<2x256xf32>
      %854 = arith.mulf %853, %838 : vector<2x256xf32>
      %855 = arith.addf %812, %854 : vector<2x256xf32>
      %856 = vector.broadcast %850 : f32 to vector<2x256xf32>
      %857 = arith.mulf %856, %840 : vector<2x256xf32>
      %858 = arith.addf %855, %857 : vector<2x256xf32>
      %859 = vector.broadcast %851 : f32 to vector<2x256xf32>
      %860 = arith.mulf %859, %842 : vector<2x256xf32>
      %861 = arith.addf %858, %860 : vector<2x256xf32>
      %862 = vector.broadcast %852 : f32 to vector<2x256xf32>
      %863 = arith.mulf %862, %844 : vector<2x256xf32>
      %864 = arith.addf %861, %863 : vector<2x256xf32>
      %865 = vector.broadcast %849 : f32 to vector<2x256xf32>
      %866 = arith.mulf %865, %840 : vector<2x256xf32>
      %867 = arith.addf %824, %866 : vector<2x256xf32>
      %868 = vector.broadcast %850 : f32 to vector<2x256xf32>
      %869 = arith.mulf %868, %842 : vector<2x256xf32>
      %870 = arith.addf %867, %869 : vector<2x256xf32>
      %871 = vector.broadcast %851 : f32 to vector<2x256xf32>
      %872 = arith.mulf %871, %844 : vector<2x256xf32>
      %873 = arith.addf %870, %872 : vector<2x256xf32>
      %874 = vector.broadcast %852 : f32 to vector<2x256xf32>
      %875 = arith.mulf %874, %846 : vector<2x256xf32>
      %876 = arith.addf %873, %875 : vector<2x256xf32>
      %877 = vector.broadcast %849 : f32 to vector<2x256xf32>
      %878 = arith.mulf %877, %842 : vector<2x256xf32>
      %879 = arith.addf %836, %878 : vector<2x256xf32>
      %880 = vector.broadcast %850 : f32 to vector<2x256xf32>
      %881 = arith.mulf %880, %844 : vector<2x256xf32>
      %882 = arith.addf %879, %881 : vector<2x256xf32>
      %883 = vector.broadcast %851 : f32 to vector<2x256xf32>
      %884 = arith.mulf %883, %846 : vector<2x256xf32>
      %885 = arith.addf %882, %884 : vector<2x256xf32>
      %886 = vector.broadcast %852 : f32 to vector<2x256xf32>
      %887 = arith.mulf %886, %848 : vector<2x256xf32>
      %888 = arith.addf %885, %887 : vector<2x256xf32>
      %c0_413 = arith.constant 0 : index
      %c3_414 = arith.constant 3 : index
      %c0_415 = arith.constant 0 : index
      %c0_416 = arith.constant 0 : index
      %889 = vector.load %arg1[%c0_413, %c3_414, %c0_415, %c0_416] : memref<6x4x2x256xf32, #tpu.memory_space<vmem>>, vector<1x1x2x256xf32>
      %890 = vector.shape_cast %889 : vector<1x1x2x256xf32> to vector<2x256xf32>
      %c1_417 = arith.constant 1 : index
      %c3_418 = arith.constant 3 : index
      %c0_419 = arith.constant 0 : index
      %c0_420 = arith.constant 0 : index
      %891 = vector.load %arg1[%c1_417, %c3_418, %c0_419, %c0_420] : memref<6x4x2x256xf32, #tpu.memory_space<vmem>>, vector<1x1x2x256xf32>
      %892 = vector.shape_cast %891 : vector<1x1x2x256xf32> to vector<2x256xf32>
      %c2_421 = arith.constant 2 : index
      %c3_422 = arith.constant 3 : index
      %c0_423 = arith.constant 0 : index
      %c0_424 = arith.constant 0 : index
      %893 = vector.load %arg1[%c2_421, %c3_422, %c0_423, %c0_424] : memref<6x4x2x256xf32, #tpu.memory_space<vmem>>, vector<1x1x2x256xf32>
      %894 = vector.shape_cast %893 : vector<1x1x2x256xf32> to vector<2x256xf32>
      %c3_425 = arith.constant 3 : index
      %c3_426 = arith.constant 3 : index
      %c0_427 = arith.constant 0 : index
      %c0_428 = arith.constant 0 : index
      %895 = vector.load %arg1[%c3_425, %c3_426, %c0_427, %c0_428] : memref<6x4x2x256xf32, #tpu.memory_space<vmem>>, vector<1x1x2x256xf32>
      %896 = vector.shape_cast %895 : vector<1x1x2x256xf32> to vector<2x256xf32>
      %c4_429 = arith.constant 4 : index
      %c3_430 = arith.constant 3 : index
      %c0_431 = arith.constant 0 : index
      %c0_432 = arith.constant 0 : index
      %897 = vector.load %arg1[%c4_429, %c3_430, %c0_431, %c0_432] : memref<6x4x2x256xf32, #tpu.memory_space<vmem>>, vector<1x1x2x256xf32>
      %898 = vector.shape_cast %897 : vector<1x1x2x256xf32> to vector<2x256xf32>
      %c5_433 = arith.constant 5 : index
      %c3_434 = arith.constant 3 : index
      %c0_435 = arith.constant 0 : index
      %c0_436 = arith.constant 0 : index
      %899 = vector.load %arg1[%c5_433, %c3_434, %c0_435, %c0_436] : memref<6x4x2x256xf32, #tpu.memory_space<vmem>>, vector<1x1x2x256xf32>
      %900 = vector.shape_cast %899 : vector<1x1x2x256xf32> to vector<2x256xf32>
      %c60 = arith.constant 60 : index
      %901 = memref.load %arg2[%c60] : memref<64xf32, #tpu.memory_space<smem>>
      %c61 = arith.constant 61 : index
      %902 = memref.load %arg2[%c61] : memref<64xf32, #tpu.memory_space<smem>>
      %c62 = arith.constant 62 : index
      %903 = memref.load %arg2[%c62] : memref<64xf32, #tpu.memory_space<smem>>
      %c63 = arith.constant 63 : index
      %904 = memref.load %arg2[%c63] : memref<64xf32, #tpu.memory_space<smem>>
      %905 = vector.broadcast %901 : f32 to vector<2x256xf32>
      %906 = arith.mulf %905, %890 : vector<2x256xf32>
      %907 = arith.addf %864, %906 : vector<2x256xf32>
      %908 = vector.broadcast %902 : f32 to vector<2x256xf32>
      %909 = arith.mulf %908, %892 : vector<2x256xf32>
      %910 = arith.addf %907, %909 : vector<2x256xf32>
      %911 = vector.broadcast %903 : f32 to vector<2x256xf32>
      %912 = arith.mulf %911, %894 : vector<2x256xf32>
      %913 = arith.addf %910, %912 : vector<2x256xf32>
      %914 = vector.broadcast %904 : f32 to vector<2x256xf32>
      %915 = arith.mulf %914, %896 : vector<2x256xf32>
      %916 = arith.addf %913, %915 : vector<2x256xf32>
      %917 = vector.broadcast %901 : f32 to vector<2x256xf32>
      %918 = arith.mulf %917, %892 : vector<2x256xf32>
      %919 = arith.addf %876, %918 : vector<2x256xf32>
      %920 = vector.broadcast %902 : f32 to vector<2x256xf32>
      %921 = arith.mulf %920, %894 : vector<2x256xf32>
      %922 = arith.addf %919, %921 : vector<2x256xf32>
      %923 = vector.broadcast %903 : f32 to vector<2x256xf32>
      %924 = arith.mulf %923, %896 : vector<2x256xf32>
      %925 = arith.addf %922, %924 : vector<2x256xf32>
      %926 = vector.broadcast %904 : f32 to vector<2x256xf32>
      %927 = arith.mulf %926, %898 : vector<2x256xf32>
      %928 = arith.addf %925, %927 : vector<2x256xf32>
      %929 = vector.broadcast %901 : f32 to vector<2x256xf32>
      %930 = arith.mulf %929, %894 : vector<2x256xf32>
      %931 = arith.addf %888, %930 : vector<2x256xf32>
      %932 = vector.broadcast %902 : f32 to vector<2x256xf32>
      %933 = arith.mulf %932, %896 : vector<2x256xf32>
      %934 = arith.addf %931, %933 : vector<2x256xf32>
      %935 = vector.broadcast %903 : f32 to vector<2x256xf32>
      %936 = arith.mulf %935, %898 : vector<2x256xf32>
      %937 = arith.addf %934, %936 : vector<2x256xf32>
      %938 = vector.broadcast %904 : f32 to vector<2x256xf32>
      %939 = arith.mulf %938, %900 : vector<2x256xf32>
      %940 = arith.addf %937, %939 : vector<2x256xf32>
      %c3_437 = arith.constant 3 : index
      %941 = memref.load %arg3[%c3_437] : memref<4xf32, #tpu.memory_space<smem>>
      %942 = vector.broadcast %941 : f32 to vector<2x256xf32>
      %943 = arith.addf %916, %942 : vector<2x256xf32>
      %cst_438 = arith.constant 0.000000e+00 : f32
      %944 = vector.broadcast %cst_438 : f32 to vector<2x256xf32>
      %945 = arith.maximumf %943, %944 : vector<2x256xf32>
      %946 = vector.broadcast %941 : f32 to vector<2x256xf32>
      %947 = arith.addf %928, %946 : vector<2x256xf32>
      %cst_439 = arith.constant 0.000000e+00 : f32
      %948 = vector.broadcast %cst_439 : f32 to vector<2x256xf32>
      %949 = arith.maximumf %947, %948 : vector<2x256xf32>
      %950 = vector.broadcast %941 : f32 to vector<2x256xf32>
      %951 = arith.addf %940, %950 : vector<2x256xf32>
      %cst_440 = arith.constant 0.000000e+00 : f32
      %952 = vector.broadcast %cst_440 : f32 to vector<2x256xf32>
      %953 = arith.maximumf %951, %952 : vector<2x256xf32>
      %954 = arith.maximumf %945, %949 : vector<2x256xf32>
      %955 = arith.maximumf %954, %953 : vector<2x256xf32>
      %956 = arith.truncf %955 : vector<2x256xf32> to vector<2x256xbf16>
      %c0_441 = arith.constant 0 : index
      %c768 = arith.constant 768 : index
      %957 = vector.load %arg11[%c0_441, %c768] : memref<2x1024xbf16, #tpu.memory_space<vmem>>, vector<2x256xbf16>
      tpu.vector_store %arg11[%c0_441, %c768], %956 {strides = array<i32>} : memref<2x1024xbf16, #tpu.memory_space<vmem>>, vector<2x256xbf16>,
      %c0_442 = arith.constant 0 : index
      %c0_443 = arith.constant 0 : index
      %958 = vector.load %arg9[%c0_442, %c0_443] : memref<1x512xf32, #tpu.memory_space<vmem>>, vector<1x512xf32>
      %959 = vector.shape_cast %958 : vector<1x512xf32> to vector<1x512xf32>
      %960 = vector.broadcast %959 : vector<1x512xf32> to vector<2x512xf32>
      %c0_444 = arith.constant 0 : index
      %c0_445 = arith.constant 0 : index
      %961 = vector.load %arg12[%c0_444, %c0_445] : memref<2x512xf32, #tpu.memory_space<vmem>>, vector<2x512xf32>
      tpu.vector_store %arg12[%c0_444, %c0_445], %960 {strides = array<i32>} : memref<2x512xf32, #tpu.memory_space<vmem>>, vector<2x512xf32>,
    } else {
    }
    %c0 = arith.constant 0 : index
    %c0_1 = arith.constant 0 : index
    %3 = vector.load %arg11[%c0, %c0_1] : memref<2x1024xbf16, #tpu.memory_space<vmem>>, vector<2x1024xbf16>
    %c0_2 = arith.constant 0 : index
    %c0_3 = arith.constant 0 : index
    %4 = vector.load %arg4[%c0_2, %c0_3] : memref<1024x256xbf16, #tpu.memory_space<vmem>>, vector<1024x256xbf16>
    %cst = arith.constant dense<0.000000e+00> : vector<2x256xf32>
    %5 = tpu.matmul %3, %4, %cst {dimension_numbers = #tpu.dot_dimension_numbers<[1], [0], [0], [1], [0, 0, 1, 1], [], []>} : vector<2x1024xbf16>, vector<1024x256xbf16>, vector<2x256xf32> -> vector<2x256xf32>
    %c0_4 = arith.constant 0 : index
    %c0_5 = arith.constant 0 : index
    %6 = vector.load %arg5[%c0_4, %c0_5] : memref<1x256xf32, #tpu.memory_space<vmem>>, vector<1x256xf32>
    %7 = vector.broadcast %6 : vector<1x256xf32> to vector<2x256xf32>
    %8 = arith.addf %5, %7 : vector<2x256xf32>
    %cst_6 = arith.constant 0.000000e+00 : f32
    %9 = vector.broadcast %cst_6 : f32 to vector<2x256xf32>
    %10 = arith.maximumf %8, %9 : vector<2x256xf32>
    %cst_7 = arith.constant dense<0.000000e+00> : vector<256xf32>
    %11 = vector.multi_reduction <add>, %10, %cst_7 [0] : vector<2x256xf32> to vector<256xf32>
    %12 = vector.shape_cast %11 : vector<256xf32> to vector<1x256xf32>
    %cst_8 = arith.constant 2.000000e+00 : f32
    %13 = vector.broadcast %cst_8 : f32 to vector<1x256xf32>
    %14 = arith.divf %12, %13 : vector<1x256xf32>
    %15 = vector.broadcast %14 : vector<1x256xf32> to vector<2x256xf32>
    %16 = arith.subf %10, %15 : vector<2x256xf32>
    %17 = vector.broadcast %14 : vector<1x256xf32> to vector<2x256xf32>
    %18 = arith.subf %10, %17 : vector<2x256xf32>
    %19 = arith.mulf %16, %18 : vector<2x256xf32>
    %cst_9 = arith.constant dense<0.000000e+00> : vector<256xf32>
    %20 = vector.multi_reduction <add>, %19, %cst_9 [0] : vector<2x256xf32> to vector<256xf32>
    %21 = vector.shape_cast %20 : vector<256xf32> to vector<1x256xf32>
    %cst_10 = arith.constant 2.000000e+00 : f32
    %22 = vector.broadcast %cst_10 : f32 to vector<1x256xf32>
    %23 = arith.divf %21, %22 : vector<1x256xf32>
    %24 = vector.broadcast %14 : vector<1x256xf32> to vector<2x256xf32>
    %25 = arith.subf %10, %24 : vector<2x256xf32>
    %cst_11 = arith.constant 9.99999974E-6 : f32
    %26 = vector.broadcast %cst_11 : f32 to vector<1x256xf32>
    %27 = arith.addf %23, %26 : vector<1x256xf32>
    %28 = math.rsqrt %27 : vector<1x256xf32>
    %29 = vector.broadcast %28 : vector<1x256xf32> to vector<2x256xf32>
    %30 = arith.mulf %25, %29 : vector<2x256xf32>
    %c0_12 = arith.constant 0 : index
    %c0_13 = arith.constant 0 : index
    %31 = vector.load %arg6[%c0_12, %c0_13] : memref<1x256xf32, #tpu.memory_space<vmem>>, vector<1x256xf32>
    %32 = vector.broadcast %31 : vector<1x256xf32> to vector<2x256xf32>
    %33 = arith.mulf %30, %32 : vector<2x256xf32>
    %c0_14 = arith.constant 0 : index
    %c0_15 = arith.constant 0 : index
    %34 = vector.load %arg7[%c0_14, %c0_15] : memref<1x256xf32, #tpu.memory_space<vmem>>, vector<1x256xf32>
    %35 = vector.broadcast %34 : vector<1x256xf32> to vector<2x256xf32>
    %36 = arith.addf %33, %35 : vector<2x256xf32>
    %c0_16 = arith.constant 0 : index
    %c0_17 = arith.constant 0 : index
    %37 = vector.load %arg12[%c0_16, %c0_17] : memref<2x512xf32, #tpu.memory_space<vmem>>, vector<2x512xf32>
    %38 = arith.truncf %36 : vector<2x256xf32> to vector<2x256xbf16>
    %c0_18 = arith.constant 0 : index
    %c0_19 = arith.constant 0 : index
    %39 = vector.load %arg8[%c0_18, %c0_19] : memref<256x512xbf16, #tpu.memory_space<vmem>>, vector<256x512xbf16>
    %cst_20 = arith.constant dense<0.000000e+00> : vector<2x512xf32>
    %40 = tpu.matmul %38, %39, %cst_20 {dimension_numbers = #tpu.dot_dimension_numbers<[1], [0], [0], [1], [0, 0, 1, 1], [], []>} : vector<2x256xbf16>, vector<256x512xbf16>, vector<2x512xf32> -> vector<2x512xf32>
    %41 = arith.addf %37, %40 : vector<2x512xf32>
    %c0_21 = arith.constant 0 : index
    %c0_22 = arith.constant 0 : index
    %42 = vector.load %arg12[%c0_21, %c0_22] : memref<2x512xf32, #tpu.memory_space<vmem>>, vector<2x512xf32>
    tpu.vector_store %arg12[%c0_21, %c0_22], %41 {strides = array<i32>} : memref<2x512xf32, #tpu.memory_space<vmem>>, vector<2x512xf32>,
    %c1_i32 = arith.constant 1 : i32
    %43 = arith.cmpi eq, %arg0, %c1_i32 : i32
    %44 = arith.extui %43 : i1 to i32
    %c0_i32_23 = arith.constant 0 : i32
    %45 = arith.cmpi ne, %44, %c0_i32_23 : i32
    scf.if %45 {
      %c0_24 = arith.constant 0 : index
      %c0_25 = arith.constant 0 : index
      %46 = vector.load %arg12[%c0_24, %c0_25] : memref<2x512xf32, #tpu.memory_space<vmem>>, vector<2x512xf32>
      %c0_26 = arith.constant 0 : index
      %c0_27 = arith.constant 0 : index
      %47 = vector.load %arg10[%c0_26, %c0_27] : memref<2x512xf32, #tpu.memory_space<vmem>>, vector<2x512xf32>
      tpu.vector_store %arg10[%c0_26, %c0_27], %46 {strides = array<i32>} : memref<2x512xf32, #tpu.memory_space<vmem>>, vector<2x512xf32>,
    } else {
    }
    return
  }
  func.func @transform_0(%arg0: i32) -> (i32, i32, i32, i32) {
    %c0_i32 = arith.constant 0 : i32
    %c0_i32_0 = arith.constant 0 : i32
    %c0_i32_1 = arith.constant 0 : i32
    %c0_i32_2 = arith.constant 0 : i32
    %c0_i32_3 = arith.constant 0 : i32
    return %c0_i32, %c0_i32_0, %c0_i32_1, %c0_i32_2 : i32, i32, i32, i32
  }
  func.func @transform_1(%arg0: i32) -> i32 {
    %c0_i32 = arith.constant 0 : i32
    %c0_i32_0 = arith.constant 0 : i32
    return %c0_i32 : i32
  }
  func.func @transform_2(%arg0: i32) -> i32 {
    %c0_i32 = arith.constant 0 : i32
    %c0_i32_0 = arith.constant 0 : i32
    return %c0_i32 : i32
  }
  func.func @transform_3(%arg0: i32) -> (i32, i32) {
    %c0_i32 = arith.constant 0 : i32
    %c0_i32_0 = arith.constant 0 : i32
    return %c0_i32, %arg0 : i32, i32
  }
  func.func @transform_4(%arg0: i32) -> (i32, i32) {
    %c0_i32 = arith.constant 0 : i32
    %c0_i32_0 = arith.constant 0 : i32
    return %c0_i32, %arg0 : i32, i32
  }
  func.func @transform_5(%arg0: i32) -> (i32, i32) {
    %c0_i32 = arith.constant 0 : i32
    %c0_i32_0 = arith.constant 0 : i32
    return %c0_i32, %arg0 : i32, i32
  }
  func.func @transform_6(%arg0: i32) -> (i32, i32) {
    %c0_i32 = arith.constant 0 : i32
    %c0_i32_0 = arith.constant 0 : i32
    return %c0_i32, %arg0 : i32, i32
  }
  func.func @transform_7(%arg0: i32) -> (i32, i32) {
    %c0_i32 = arith.constant 0 : i32
    %c0_i32_0 = arith.constant 0 : i32
    return %arg0, %c0_i32 : i32, i32
  }
  func.func @transform_8(%arg0: i32) -> (i32, i32) {
    %c0_i32 = arith.constant 0 : i32
    %c0_i32_0 = arith.constant 0 : i32
    %c0_i32_1 = arith.constant 0 : i32
    return %c0_i32, %c0_i32_0 : i32, i32
  }
  func.func @transform_9(%arg0: i32) -> (i32, i32) {
    %c0_i32 = arith.constant 0 : i32
    %c0_i32_0 = arith.constant 0 : i32
    %c0_i32_1 = arith.constant 0 : i32
    return %c0_i32, %c0_i32_0 : i32, i32
  }
}

</mosaic_0001>

<bundles_post_ra>
// kernel: cnn_forward.1
= control target key start
LH: loop header
LB: loop body
LE: loop exit
PB: predicated region body
PF: predicated region fallthrough
CT: control target
= control target key end

     0   :  { %s5443_s0 = inlined_call_operand.vmem [shape: f32[6,4,2,256], index: 0, kind: input, shape index: {}]   ;;  %s5444_s1 = inlined_call_operand.vmem [shape: f32[64], index: 1, kind: input, shape index: {}]   ;;  %s5445_s2 = inlined_call_operand.vmem [shape: f32[4], index: 2, kind: input, shape index: {}]   ;;  %s5446_s3 = inlined_call_operand.vmem [shape: bf16[1024,512], index: 3, kind: input, shape index: {}]   ;;  %s5447_s4 = inlined_call_operand.vmem [shape: f32[1,512], index: 4, kind: input, shape index: {}]   ;;  %s5448_s5 = inlined_call_operand.vmem [shape: f32[1,512], index: 5, kind: input, shape index: {}]   ;;  %s5449_s6 = inlined_call_operand.vmem [shape: f32[1,512], index: 6, kind: input, shape index: {}]   ;;  %s5450_s7 = inlined_call_operand.vmem [shape: bf16[512,512], index: 7, kind: input, shape index: {}]   ;;  %s5451_s8 = inlined_call_operand.vmem [shape: f32[1,512], index: 8, kind: input, shape index: {}]   ;;  %s5452_s9 = inlined_call_operand.vmem [shape: f32[2,512], index: 9, kind: output, shape index: {}]  }
   0x1   :  { %5455 = sst [smem:[#allocation11_spill]] %s5444_s1 }
   0x2   :  { %5456 = sst [smem:[#allocation12_spill]] %s5445_s2 }
   0x3   :  { %14 = vsyncpa [#allocation5], 0 }
   0x4   :  { %15 = vsyncpa [#allocation7], 0  ;;  %s4325_s30 = smov 0   ;;  %s4327_s10 = smov 0  }
   0x5   :  { %s4329_s11 = smov 0  }
   0x6 LB: > { %s4341_s12 = sadd.s32 4294967295, %s4267_s11   ;;  %s4344_s13 = sadd.s32 1, %s4267_s11   ;;  %s4267_s11 = sphi %s4329_s11, %s5474_s11   ;;  %s4263_s10 = sphi %s4327_s10, %s5473_s10   ;;  %s4259_s30 = sphi %s4325_s30, %s5472_s30  }
   0x7   : > { %s88_s14 = ssub.s32 %s4267_s11, %s4344_s13  ;;  %s91_s15 = sadd.s32 1, %s4263_s10 }
   0x8   : > { %p89_p0 = scmp.eq.s32.totalorder %s88_s14, 0  ;;  %p98_p1 = scmp.ne.s32.totalorder %s4263_s10, %s4259_s30 }
   0x9   : > { %p99_p2 = scmp.eq.s32.totalorder %s4267_s11, 0  ;;  %p3484_p3 = scmp.ge.s32.totalorder %s4267_s11, 1 }
   0xa   : > { %s4354_s16 = scalar_select %p89_p0, %s4263_s10, %s91_s15  }
   0xb   : > { %p4356_p4 = por %p99_p2, %p98_p1  ;;  %p261_p5 = scmp.lt.s32.totalorder %s4267_s11, 3 }
   0xc   : > { %p5453_p7 = scmp.eq.s32.totalorder %s4341_s12, 0  ;;  %s5459_s1 = sld [smem:[#allocation11_spill]] }
   0xd   : > { %s5457_s17 = scalar_select %p4356_p4, 1, 0 }
   0xe   : > { %p4363_p8 = pnand %p3484_p3, %p261_p5  ;;  %s5460_s2 = sld [smem:[#allocation12_spill]] }
  0x10   : > { %s5458_s18 = scalar_select %p4363_p8, 1, 0 }
  0x11   : > { %p3873_p9 = pneg %p4363_p8 }
  0x12   : > { %s277_s21 = sshll.u32 %s5459_s1, 4  ;;  %s278_s21 = int_to_ptr.vmem [resolvable:$true] %s277_s21 }
  0x13   : > { %p4377_p10 = pnand %p5453_p7, %p3873_p9  ;;  %s4207_s26 = scalar_lea.vmem %s278_s21, 16 }
  0x14   : > { %s288_s24 = sshll.u32 %s5460_s2, 4  ;;  %p4208_p11 = scmp.ne.s32.totalorder %s278_s21, %s4207_s26  ;;  %s289_s24 = int_to_ptr.vmem [resolvable:$true] %s288_s24 }
  0x15   : > { %p4209_p12 = pneg %p4377_p10  ;;  %p4215_p1 = scmp.lt.s32.totalorder %s278_s21, %s278_s21 }
  0x16   : > { %p4216_p2 = scmp.lt.s32.totalorder %s4207_s26, %s4207_s26 }
  0x17   : > { %p4210_p13 = pnand %p4209_p12, %p4208_p11 }
  0x18   : > { %p4217_p3 = por %p4216_p2, %p4215_p1 }
  0x19   : > { %p4211_p0 = pneg %p4210_p13 }
  0x1b   : > { %p4218_p5 = pnand %p4217_p3, %p4211_p0 }
  0x1d   : > { %4221 = shalt.err (!%p4218_p5)
}
  0x1e   : > { %s4269_s27 = smov [#allocation4]   ;;  %s4222_s28 = scalar_lea.vmem %s289_s24, 16 }
  0x1f   : > { %3876 = dma.vmem_to_smem (!%p4377_p10), %s278_s21, 16, %s4269_s27, [#allocation5]  }
  0x20   : > { %p4223_p9 = scmp.ne.s32.totalorder %s289_s24, %s4222_s28  ;;  %p4230_p8 = scmp.lt.s32.totalorder %s289_s24, %s289_s24 }
  0x21   : > { %p4231_p4 = scmp.lt.s32.totalorder %s4222_s28, %s4222_s28 }
  0x22   : > { %p4225_p6 = pnand %p4223_p9, %p4209_p12 }
  0x23   : > { %p4232_p11 = por %p4231_p4, %p4230_p8 }
  0x24   : > { %p4226_p7 = pneg %p4225_p6 }
  0x26   : > { %p4233_p13 = pnand %p4232_p11, %p4226_p7 }
  0x28   : > { %4236 = shalt.err (!%p4233_p13)
}
  0x29   : > { %s4270_s29 = smov [#allocation6]   ;;  %p3487_p0 = scmp.ge.s32.totalorder %s4267_s11, 2 }
  0x2a   : > { %3879 = dma.vmem_to_smem (!%p4377_p10), %s289_s24, 16, %s4270_s29, [#allocation7]  }
  0x2b   : > { %298 = sbr.rel (%p3487_p0) target bundleno = 116 (0x74), region = 32  ;;  %p5462_p1 = scmp.ne.s32.totalorder (!%p3487_p0), %s5457_s17, 0 }
  0x30   : > { %301 = sbr.rel (!%p5462_p1) target bundleno = 116 (0x74), region = 36  ;;  %s303_s14 = sand.u32 (%p5462_p1), 1, %s4263_s10  }
  0x31   : > { %s3863_s15 = sshll.u32 (%p5462_p1), %s4267_s11, 3  ;;  %s3488_s19 = sshll.u32 (%p5462_p1), %s303_s14, 10 }
  0x32   : > { %s4395_s22 = scalar_lea.vmem (%p5462_p1), %s5446_s3, %s3863_s15  ;;  %s4400_s17 = scalar_lea.vmem (%p5462_p1), [#allocation8], %s3488_s19 }
  0x33   : > { %v591_v0 = vld [vmem:[%s4395_s22] sm:$0xff] (%p5462_p1)  ;;  %v593_v1 = vld [vmem:[%s4395_s22 + $0x10] sm:$0xff] (%p5462_p1) }
  0x34   : > { %v595_v2 = vld [vmem:[%s4395_s22 + $0x20] sm:$0xff] (%p5462_p1)  ;;  %592 = vst [vmem:[%s4400_s17] sm:$0xff] (%p5462_p1), %v591_v0  ;;  %594 = vst [vmem:[%s4400_s17 + $0x8] sm:$0xff] (%p5462_p1), %v593_v1  ;;  %v597_v3 = vld [vmem:[%s4395_s22 + $0x30] sm:$0xff] (%p5462_p1) }
  0x35   : > { %596 = vst [vmem:[%s4400_s17 + $0x10] sm:$0xff] %v595_v2  ;;  %v599_v4 = vld [vmem:[%s4395_s22 + $0x40] sm:$0xff]  ;;  %v601_v5 = vld [vmem:[%s4395_s22 + $0x50] sm:$0xff]  ;;  %598 = vst [vmem:[%s4400_s17 + $0x18] sm:$0xff] %v597_v3 }
  0x36   : > { %600 = vst [vmem:[%s4400_s17 + $0x20] sm:$0xff] %v599_v4  ;;  %602 = vst [vmem:[%s4400_s17 + $0x28] sm:$0xff] %v601_v5  ;;  %v603_v6 = vld [vmem:[%s4395_s22 + $0x60] sm:$0xff]  ;;  %v605_v7 = vld [vmem:[%s4395_s22 + $0x70] sm:$0xff] }
  0x37   : > { %v607_v8 = vld [vmem:[%s4395_s22 + $0x80] sm:$0xff]  ;;  %604 = vst [vmem:[%s4400_s17 + $0x30] sm:$0xff] %v603_v6  ;;  %606 = vst [vmem:[%s4400_s17 + $0x38] sm:$0xff] %v605_v7  ;;  %v609_v9 = vld [vmem:[%s4395_s22 + $0x90] sm:$0xff] }
  0x38   : > { %608 = vst [vmem:[%s4400_s17 + $0x40] sm:$0xff] %v607_v8  ;;  %v611_v10 = vld [vmem:[%s4395_s22 + $0xa0] sm:$0xff]  ;;  %v613_v11 = vld [vmem:[%s4395_s22 + $0xb0] sm:$0xff]  ;;  %610 = vst [vmem:[%s4400_s17 + $0x48] sm:$0xff] %v609_v9 }
  0x39   : > { %612 = vst [vmem:[%s4400_s17 + $0x50] sm:$0xff] %v611_v10  ;;  %614 = vst [vmem:[%s4400_s17 + $0x58] sm:$0xff] %v613_v11  ;;  %v615_v12 = vld [vmem:[%s4395_s22 + $0xc0] sm:$0xff]  ;;  %v617_v13 = vld [vmem:[%s4395_s22 + $0xd0] sm:$0xff] }
  0x3a   : > { %v619_v14 = vld [vmem:[%s4395_s22 + $0xe0] sm:$0xff]  ;;  %616 = vst [vmem:[%s4400_s17 + $0x60] sm:$0xff] %v615_v12  ;;  %618 = vst [vmem:[%s4400_s17 + $0x68] sm:$0xff] %v617_v13  ;;  %v621_v15 = vld [vmem:[%s4395_s22 + $0xf0] sm:$0xff] }
  0x3b   : > { %620 = vst [vmem:[%s4400_s17 + $0x70] sm:$0xff] %v619_v14  ;;  %v623_v16 = vld [vmem:[%s4395_s22 + $0x100] sm:$0xff]  ;;  %v625_v17 = vld [vmem:[%s4395_s22 + $0x110] sm:$0xff]  ;;  %622 = vst [vmem:[%s4400_s17 + $0x78] sm:$0xff] %v621_v15 }
  0x3c   : > { %624 = vst [vmem:[%s4400_s17 + $0x80] sm:$0xff] %v623_v16  ;;  %626 = vst [vmem:[%s4400_s17 + $0x88] sm:$0xff] %v625_v17  ;;  %v627_v18 = vld [vmem:[%s4395_s22 + $0x120] sm:$0xff]  ;;  %v629_v19 = vld [vmem:[%s4395_s22 + $0x130] sm:$0xff] }
  0x3d   : > { %v631_v20 = vld [vmem:[%s4395_s22 + $0x140] sm:$0xff]  ;;  %628 = vst [vmem:[%s4400_s17 + $0x90] sm:$0xff] %v627_v18  ;;  %630 = vst [vmem:[%s4400_s17 + $0x98] sm:$0xff] %v629_v19  ;;  %v633_v21 = vld [vmem:[%s4395_s22 + $0x150] sm:$0xff] }
  0x3e   : > { %632 = vst [vmem:[%s4400_s17 + $0xa0] sm:$0xff] %v631_v20  ;;  %v635_v22 = vld [vmem:[%s4395_s22 + $0x160] sm:$0xff]  ;;  %v637_v23 = vld [vmem:[%s4395_s22 + $0x170] sm:$0xff]  ;;  %634 = vst [vmem:[%s4400_s17 + $0xa8] sm:$0xff] %v633_v21 }
  0x3f   : > { %636 = vst [vmem:[%s4400_s17 + $0xb0] sm:$0xff] %v635_v22  ;;  %638 = vst [vmem:[%s4400_s17 + $0xb8] sm:$0xff] %v637_v23  ;;  %v639_v24 = vld [vmem:[%s4395_s22 + $0x180] sm:$0xff]  ;;  %v641_v25 = vld [vmem:[%s4395_s22 + $0x190] sm:$0xff] }
  0x40   : > { %v643_v26 = vld [vmem:[%s4395_s22 + $0x1a0] sm:$0xff]  ;;  %640 = vst [vmem:[%s4400_s17 + $0xc0] sm:$0xff] %v639_v24  ;;  %642 = vst [vmem:[%s4400_s17 + $0xc8] sm:$0xff] %v641_v25  ;;  %v645_v27 = vld [vmem:[%s4395_s22 + $0x1b0] sm:$0xff] }
  0x41   : > { %644 = vst [vmem:[%s4400_s17 + $0xd0] sm:$0xff] %v643_v26  ;;  %v647_v28 = vld [vmem:[%s4395_s22 + $0x1c0] sm:$0xff]  ;;  %v649_v29 = vld [vmem:[%s4395_s22 + $0x1d0] sm:$0xff]  ;;  %646 = vst [vmem:[%s4400_s17 + $0xd8] sm:$0xff] %v645_v27 }
  0x42   : > { %648 = vst [vmem:[%s4400_s17 + $0xe0] sm:$0xff] %v647_v28  ;;  %650 = vst [vmem:[%s4400_s17 + $0xe8] sm:$0xff] %v649_v29  ;;  %v651_v30 = vld [vmem:[%s4395_s22 + $0x1e0] sm:$0xff]  ;;  %v653_v31 = vld [vmem:[%s4395_s22 + $0x1f0] sm:$0xff] }
  0x43   : > { %v655_v32 = vld [vmem:[%s4395_s22 + $0x200] sm:$0xff]  ;;  %652 = vst [vmem:[%s4400_s17 + $0xf0] sm:$0xff] %v651_v30  ;;  %654 = vst [vmem:[%s4400_s17 + $0xf8] sm:$0xff] %v653_v31  ;;  %v657_v33 = vld [vmem:[%s4395_s22 + $0x210] sm:$0xff] }
  0x44   : > { %656 = vst [vmem:[%s4400_s17 + $0x100] sm:$0xff] %v655_v32  ;;  %v659_v34 = vld [vmem:[%s4395_s22 + $0x220] sm:$0xff]  ;;  %v661_v35 = vld [vmem:[%s4395_s22 + $0x230] sm:$0xff]  ;;  %658 = vst [vmem:[%s4400_s17 + $0x108] sm:$0xff] %v657_v33 }
  0x45   : > { %660 = vst [vmem:[%s4400_s17 + $0x110] sm:$0xff] %v659_v34  ;;  %662 = vst [vmem:[%s4400_s17 + $0x118] sm:$0xff] %v661_v35  ;;  %v663_v36 = vld [vmem:[%s4395_s22 + $0x240] sm:$0xff]  ;;  %v665_v37 = vld [vmem:[%s4395_s22 + $0x250] sm:$0xff] }
  0x46   : > { %v667_v38 = vld [vmem:[%s4395_s22 + $0x260] sm:$0xff]  ;;  %664 = vst [vmem:[%s4400_s17 + $0x120] sm:$0xff] %v663_v36  ;;  %666 = vst [vmem:[%s4400_s17 + $0x128] sm:$0xff] %v665_v37  ;;  %v669_v39 = vld [vmem:[%s4395_s22 + $0x270] sm:$0xff] }
  0x47   : > { %668 = vst [vmem:[%s4400_s17 + $0x130] sm:$0xff] %v667_v38  ;;  %v671_v40 = vld [vmem:[%s4395_s22 + $0x280] sm:$0xff]  ;;  %v673_v41 = vld [vmem:[%s4395_s22 + $0x290] sm:$0xff]  ;;  %670 = vst [vmem:[%s4400_s17 + $0x138] sm:$0xff] %v669_v39 }
  0x48   : > { %672 = vst [vmem:[%s4400_s17 + $0x140] sm:$0xff] %v671_v40  ;;  %674 = vst [vmem:[%s4400_s17 + $0x148] sm:$0xff] %v673_v41  ;;  %v675_v42 = vld [vmem:[%s4395_s22 + $0x2a0] sm:$0xff]  ;;  %v677_v43 = vld [vmem:[%s4395_s22 + $0x2b0] sm:$0xff] }
  0x49   : > { %v679_v44 = vld [vmem:[%s4395_s22 + $0x2c0] sm:$0xff]  ;;  %676 = vst [vmem:[%s4400_s17 + $0x150] sm:$0xff] %v675_v42  ;;  %678 = vst [vmem:[%s4400_s17 + $0x158] sm:$0xff] %v677_v43  ;;  %v681_v45 = vld [vmem:[%s4395_s22 + $0x2d0] sm:$0xff] }
  0x4a   : > { %680 = vst [vmem:[%s4400_s17 + $0x160] sm:$0xff] %v679_v44  ;;  %v683_v46 = vld [vmem:[%s4395_s22 + $0x2e0] sm:$0xff]  ;;  %v685_v47 = vld [vmem:[%s4395_s22 + $0x2f0] sm:$0xff]  ;;  %682 = vst [vmem:[%s4400_s17 + $0x168] sm:$0xff] %v681_v45 }
  0x4b   : > { %684 = vst [vmem:[%s4400_s17 + $0x170] sm:$0xff] %v683_v46  ;;  %686 = vst [vmem:[%s4400_s17 + $0x178] sm:$0xff] %v685_v47  ;;  %v687_v48 = vld [vmem:[%s4395_s22 + $0x300] sm:$0xff]  ;;  %v689_v49 = vld [vmem:[%s4395_s22 + $0x310] sm:$0xff] }
  0x4c   : > { %v691_v50 = vld [vmem:[%s4395_s22 + $0x320] sm:$0xff]  ;;  %688 = vst [vmem:[%s4400_s17 + $0x180] sm:$0xff] %v687_v48  ;;  %690 = vst [vmem:[%s4400_s17 + $0x188] sm:$0xff] %v689_v49  ;;  %v693_v51 = vld [vmem:[%s4395_s22 + $0x330] sm:$0xff] }
  0x4d   : > { %692 = vst [vmem:[%s4400_s17 + $0x190] sm:$0xff] %v691_v50  ;;  %v695_v52 = vld [vmem:[%s4395_s22 + $0x340] sm:$0xff]  ;;  %v697_v53 = vld [vmem:[%s4395_s22 + $0x350] sm:$0xff]  ;;  %694 = vst [vmem:[%s4400_s17 + $0x198] sm:$0xff] %v693_v51 }
  0x4e   : > { %696 = vst [vmem:[%s4400_s17 + $0x1a0] sm:$0xff] %v695_v52  ;;  %698 = vst [vmem:[%s4400_s17 + $0x1a8] sm:$0xff] %v697_v53  ;;  %v699_v54 = vld [vmem:[%s4395_s22 + $0x360] sm:$0xff]  ;;  %v701_v55 = vld [vmem:[%s4395_s22 + $0x370] sm:$0xff] }
  0x4f   : > { %v703_v56 = vld [vmem:[%s4395_s22 + $0x380] sm:$0xff]  ;;  %700 = vst [vmem:[%s4400_s17 + $0x1b0] sm:$0xff] %v699_v54  ;;  %702 = vst [vmem:[%s4400_s17 + $0x1b8] sm:$0xff] %v701_v55  ;;  %v705_v57 = vld [vmem:[%s4395_s22 + $0x390] sm:$0xff] }
  0x50   : > { %704 = vst [vmem:[%s4400_s17 + $0x1c0] sm:$0xff] %v703_v56  ;;  %v707_v58 = vld [vmem:[%s4395_s22 + $0x3a0] sm:$0xff]  ;;  %v709_v59 = vld [vmem:[%s4395_s22 + $0x3b0] sm:$0xff]  ;;  %706 = vst [vmem:[%s4400_s17 + $0x1c8] sm:$0xff] %v705_v57 }
  0x51   : > { %708 = vst [vmem:[%s4400_s17 + $0x1d0] sm:$0xff] %v707_v58  ;;  %710 = vst [vmem:[%s4400_s17 + $0x1d8] sm:$0xff] %v709_v59  ;;  %v711_v60 = vld [vmem:[%s4395_s22 + $0x3c0] sm:$0xff]  ;;  %v713_v61 = vld [vmem:[%s4395_s22 + $0x3d0] sm:$0xff] }
  0x52   : > { %v715_v62 = vld [vmem:[%s4395_s22 + $0x3e0] sm:$0xff]  ;;  %712 = vst [vmem:[%s4400_s17 + $0x1e0] sm:$0xff] %v711_v60  ;;  %714 = vst [vmem:[%s4400_s17 + $0x1e8] sm:$0xff] %v713_v61  ;;  %v717_v63 = vld [vmem:[%s4395_s22 + $0x3f0] sm:$0xff] }
  0x53   : > { %716 = vst [vmem:[%s4400_s17 + $0x1f0] sm:$0xff] %v715_v62  ;;  %v719_v0 = vld [vmem:[%s4395_s22 + $0x400] sm:$0xff]  ;;  %v721_v1 = vld [vmem:[%s4395_s22 + $0x410] sm:$0xff]  ;;  %718 = vst [vmem:[%s4400_s17 + $0x1f8] sm:$0xff] %v717_v63 }
  0x54   : > { %720 = vst [vmem:[%s4400_s17 + $0x200] sm:$0xff] %v719_v0  ;;  %722 = vst [vmem:[%s4400_s17 + $0x208] sm:$0xff] %v721_v1  ;;  %v723_v2 = vld [vmem:[%s4395_s22 + $0x420] sm:$0xff]  ;;  %v725_v3 = vld [vmem:[%s4395_s22 + $0x430] sm:$0xff] }
  0x55   : > { %v727_v4 = vld [vmem:[%s4395_s22 + $0x440] sm:$0xff]  ;;  %724 = vst [vmem:[%s4400_s17 + $0x210] sm:$0xff] %v723_v2  ;;  %726 = vst [vmem:[%s4400_s17 + $0x218] sm:$0xff] %v725_v3  ;;  %v729_v5 = vld [vmem:[%s4395_s22 + $0x450] sm:$0xff] }
  0x56   : > { %728 = vst [vmem:[%s4400_s17 + $0x220] sm:$0xff] %v727_v4  ;;  %v731_v6 = vld [vmem:[%s4395_s22 + $0x460] sm:$0xff]  ;;  %v733_v7 = vld [vmem:[%s4395_s22 + $0x470] sm:$0xff]  ;;  %730 = vst [vmem:[%s4400_s17 + $0x228] sm:$0xff] %v729_v5 }
  0x57   : > { %732 = vst [vmem:[%s4400_s17 + $0x230] sm:$0xff] %v731_v6  ;;  %734 = vst [vmem:[%s4400_s17 + $0x238] sm:$0xff] %v733_v7  ;;  %v735_v8 = vld [vmem:[%s4395_s22 + $0x480] sm:$0xff]  ;;  %v737_v9 = vld [vmem:[%s4395_s22 + $0x490] sm:$0xff] }
  0x58   : > { %v739_v10 = vld [vmem:[%s4395_s22 + $0x4a0] sm:$0xff]  ;;  %736 = vst [vmem:[%s4400_s17 + $0x240] sm:$0xff] %v735_v8  ;;  %738 = vst [vmem:[%s4400_s17 + $0x248] sm:$0xff] %v737_v9  ;;  %v741_v11 = vld [vmem:[%s4395_s22 + $0x4b0] sm:$0xff] }
  0x59   : > { %740 = vst [vmem:[%s4400_s17 + $0x250] sm:$0xff] %v739_v10  ;;  %v743_v12 = vld [vmem:[%s4395_s22 + $0x4c0] sm:$0xff]  ;;  %v745_v13 = vld [vmem:[%s4395_s22 + $0x4d0] sm:$0xff]  ;;  %742 = vst [vmem:[%s4400_s17 + $0x258] sm:$0xff] %v741_v11 }
  0x5a   : > { %744 = vst [vmem:[%s4400_s17 + $0x260] sm:$0xff] %v743_v12  ;;  %746 = vst [vmem:[%s4400_s17 + $0x268] sm:$0xff] %v745_v13  ;;  %v747_v14 = vld [vmem:[%s4395_s22 + $0x4e0] sm:$0xff]  ;;  %v749_v15 = vld [vmem:[%s4395_s22 + $0x4f0] sm:$0xff] }
  0x5b   : > { %v751_v16 = vld [vmem:[%s4395_s22 + $0x500] sm:$0xff]  ;;  %748 = vst [vmem:[%s4400_s17 + $0x270] sm:$0xff] %v747_v14  ;;  %750 = vst [vmem:[%s4400_s17 + $0x278] sm:$0xff] %v749_v15  ;;  %v753_v17 = vld [vmem:[%s4395_s22 + $0x510] sm:$0xff] }
  0x5c   : > { %752 = vst [vmem:[%s4400_s17 + $0x280] sm:$0xff] %v751_v16  ;;  %v755_v18 = vld [vmem:[%s4395_s22 + $0x520] sm:$0xff]  ;;  %v757_v19 = vld [vmem:[%s4395_s22 + $0x530] sm:$0xff]  ;;  %754 = vst [vmem:[%s4400_s17 + $0x288] sm:$0xff] %v753_v17 }
  0x5d   : > { %756 = vst [vmem:[%s4400_s17 + $0x290] sm:$0xff] %v755_v18  ;;  %758 = vst [vmem:[%s4400_s17 + $0x298] sm:$0xff] %v757_v19  ;;  %v759_v20 = vld [vmem:[%s4395_s22 + $0x540] sm:$0xff]  ;;  %v761_v21 = vld [vmem:[%s4395_s22 + $0x550] sm:$0xff] }
  0x5e   : > { %v763_v22 = vld [vmem:[%s4395_s22 + $0x560] sm:$0xff]  ;;  %760 = vst [vmem:[%s4400_s17 + $0x2a0] sm:$0xff] %v759_v20  ;;  %762 = vst [vmem:[%s4400_s17 + $0x2a8] sm:$0xff] %v761_v21  ;;  %v765_v23 = vld [vmem:[%s4395_s22 + $0x570] sm:$0xff] }
  0x5f   : > { %764 = vst [vmem:[%s4400_s17 + $0x2b0] sm:$0xff] %v763_v22  ;;  %v767_v24 = vld [vmem:[%s4395_s22 + $0x580] sm:$0xff]  ;;  %v769_v25 = vld [vmem:[%s4395_s22 + $0x590] sm:$0xff]  ;;  %766 = vst [vmem:[%s4400_s17 + $0x2b8] sm:$0xff] %v765_v23 }
  0x60   : > { %768 = vst [vmem:[%s4400_s17 + $0x2c0] sm:$0xff] %v767_v24  ;;  %770 = vst [vmem:[%s4400_s17 + $0x2c8] sm:$0xff] %v769_v25  ;;  %v771_v26 = vld [vmem:[%s4395_s22 + $0x5a0] sm:$0xff]  ;;  %v773_v27 = vld [vmem:[%s4395_s22 + $0x5b0] sm:$0xff] }
  0x61   : > { %v775_v28 = vld [vmem:[%s4395_s22 + $0x5c0] sm:$0xff]  ;;  %772 = vst [vmem:[%s4400_s17 + $0x2d0] sm:$0xff] %v771_v26  ;;  %774 = vst [vmem:[%s4400_s17 + $0x2d8] sm:$0xff] %v773_v27  ;;  %v777_v29 = vld [vmem:[%s4395_s22 + $0x5d0] sm:$0xff] }
  0x62   : > { %776 = vst [vmem:[%s4400_s17 + $0x2e0] sm:$0xff] %v775_v28  ;;  %v779_v30 = vld [vmem:[%s4395_s22 + $0x5e0] sm:$0xff]  ;;  %v781_v31 = vld [vmem:[%s4395_s22 + $0x5f0] sm:$0xff]  ;;  %778 = vst [vmem:[%s4400_s17 + $0x2e8] sm:$0xff] %v777_v29 }
  0x63   : > { %780 = vst [vmem:[%s4400_s17 + $0x2f0] sm:$0xff] %v779_v30  ;;  %782 = vst [vmem:[%s4400_s17 + $0x2f8] sm:$0xff] %v781_v31  ;;  %v783_v32 = vld [vmem:[%s4395_s22 + $0x600] sm:$0xff]  ;;  %v785_v33 = vld [vmem:[%s4395_s22 + $0x610] sm:$0xff] }
  0x64   : > { %v787_v34 = vld [vmem:[%s4395_s22 + $0x620] sm:$0xff]  ;;  %784 = vst [vmem:[%s4400_s17 + $0x300] sm:$0xff] %v783_v32  ;;  %786 = vst [vmem:[%s4400_s17 + $0x308] sm:$0xff] %v785_v33  ;;  %v789_v35 = vld [vmem:[%s4395_s22 + $0x630] sm:$0xff] }
  0x65   : > { %788 = vst [vmem:[%s4400_s17 + $0x310] sm:$0xff] %v787_v34  ;;  %v791_v36 = vld [vmem:[%s4395_s22 + $0x640] sm:$0xff]  ;;  %v793_v37 = vld [vmem:[%s4395_s22 + $0x650] sm:$0xff]  ;;  %790 = vst [vmem:[%s4400_s17 + $0x318] sm:$0xff] %v789_v35 }
  0x66   : > { %792 = vst [vmem:[%s4400_s17 + $0x320] sm:$0xff] %v791_v36  ;;  %794 = vst [vmem:[%s4400_s17 + $0x328] sm:$0xff] %v793_v37  ;;  %v795_v38 = vld [vmem:[%s4395_s22 + $0x660] sm:$0xff]  ;;  %v797_v39 = vld [vmem:[%s4395_s22 + $0x670] sm:$0xff] }
  0x67   : > { %v799_v40 = vld [vmem:[%s4395_s22 + $0x680] sm:$0xff]  ;;  %796 = vst [vmem:[%s4400_s17 + $0x330] sm:$0xff] %v795_v38  ;;  %798 = vst [vmem:[%s4400_s17 + $0x338] sm:$0xff] %v797_v39  ;;  %v801_v41 = vld [vmem:[%s4395_s22 + $0x690] sm:$0xff] }
  0x68   : > { %800 = vst [vmem:[%s4400_s17 + $0x340] sm:$0xff] %v799_v40  ;;  %v803_v42 = vld [vmem:[%s4395_s22 + $0x6a0] sm:$0xff]  ;;  %v805_v43 = vld [vmem:[%s4395_s22 + $0x6b0] sm:$0xff]  ;;  %802 = vst [vmem:[%s4400_s17 + $0x348] sm:$0xff] %v801_v41 }
  0x69   : > { %804 = vst [vmem:[%s4400_s17 + $0x350] sm:$0xff] %v803_v42  ;;  %806 = vst [vmem:[%s4400_s17 + $0x358] sm:$0xff] %v805_v43  ;;  %v807_v44 = vld [vmem:[%s4395_s22 + $0x6c0] sm:$0xff]  ;;  %v809_v45 = vld [vmem:[%s4395_s22 + $0x6d0] sm:$0xff] }
  0x6a   : > { %v811_v46 = vld [vmem:[%s4395_s22 + $0x6e0] sm:$0xff]  ;;  %808 = vst [vmem:[%s4400_s17 + $0x360] sm:$0xff] %v807_v44  ;;  %810 = vst [vmem:[%s4400_s17 + $0x368] sm:$0xff] %v809_v45  ;;  %v813_v47 = vld [vmem:[%s4395_s22 + $0x6f0] sm:$0xff] }
  0x6b   : > { %812 = vst [vmem:[%s4400_s17 + $0x370] sm:$0xff] %v811_v46  ;;  %v815_v48 = vld [vmem:[%s4395_s22 + $0x700] sm:$0xff]  ;;  %v817_v49 = vld [vmem:[%s4395_s22 + $0x710] sm:$0xff]  ;;  %814 = vst [vmem:[%s4400_s17 + $0x378] sm:$0xff] %v813_v47 }
  0x6c   : > { %816 = vst [vmem:[%s4400_s17 + $0x380] sm:$0xff] %v815_v48  ;;  %818 = vst [vmem:[%s4400_s17 + $0x388] sm:$0xff] %v817_v49  ;;  %v819_v50 = vld [vmem:[%s4395_s22 + $0x720] sm:$0xff]  ;;  %v821_v51 = vld [vmem:[%s4395_s22 + $0x730] sm:$0xff] }
  0x6d   : > { %v823_v52 = vld [vmem:[%s4395_s22 + $0x740] sm:$0xff]  ;;  %820 = vst [vmem:[%s4400_s17 + $0x390] sm:$0xff] %v819_v50  ;;  %822 = vst [vmem:[%s4400_s17 + $0x398] sm:$0xff] %v821_v51  ;;  %v825_v53 = vld [vmem:[%s4395_s22 + $0x750] sm:$0xff] }
  0x6e   : > { %824 = vst [vmem:[%s4400_s17 + $0x3a0] sm:$0xff] %v823_v52  ;;  %v827_v54 = vld [vmem:[%s4395_s22 + $0x760] sm:$0xff]  ;;  %v829_v55 = vld [vmem:[%s4395_s22 + $0x770] sm:$0xff]  ;;  %826 = vst [vmem:[%s4400_s17 + $0x3a8] sm:$0xff] %v825_v53 }
  0x6f   : > { %828 = vst [vmem:[%s4400_s17 + $0x3b0] sm:$0xff] %v827_v54  ;;  %830 = vst [vmem:[%s4400_s17 + $0x3b8] sm:$0xff] %v829_v55  ;;  %v831_v56 = vld [vmem:[%s4395_s22 + $0x780] sm:$0xff]  ;;  %v833_v57 = vld [vmem:[%s4395_s22 + $0x790] sm:$0xff] }
  0x70   : > { %v835_v58 = vld [vmem:[%s4395_s22 + $0x7a0] sm:$0xff]  ;;  %832 = vst [vmem:[%s4400_s17 + $0x3c0] sm:$0xff] %v831_v56  ;;  %834 = vst [vmem:[%s4400_s17 + $0x3c8] sm:$0xff] %v833_v57  ;;  %v837_v59 = vld [vmem:[%s4395_s22 + $0x7b0] sm:$0xff] }
  0x71   : > { %836 = vst [vmem:[%s4400_s17 + $0x3d0] sm:$0xff] %v835_v58  ;;  %v839_v60 = vld [vmem:[%s4395_s22 + $0x7c0] sm:$0xff]  ;;  %v841_v61 = vld [vmem:[%s4395_s22 + $0x7d0] sm:$0xff]  ;;  %838 = vst [vmem:[%s4400_s17 + $0x3d8] sm:$0xff] %v837_v59 }
  0x72   : > { %840 = vst [vmem:[%s4400_s17 + $0x3e0] sm:$0xff] %v839_v60  ;;  %842 = vst [vmem:[%s4400_s17 + $0x3e8] sm:$0xff] %v841_v61  ;;  %v843_v62 = vld [vmem:[%s4395_s22 + $0x7e0] sm:$0xff]  ;;  %v845_v63 = vld [vmem:[%s4395_s22 + $0x7f0] sm:$0xff] }
  0x73   : > { %844 = vst [vmem:[%s4400_s17 + $0x3f0] sm:$0xff] %v843_v62  ;;  %846 = vst [vmem:[%s4400_s17 + $0x3f8] sm:$0xff] %v845_v63 }
  0x74 PF: > { %p5463_p4 = scmp.ne.s32.totalorder %s5458_s18, 0 }
  0x75   : > { %p5464_p6 = scmp.eq.s32.totalorder (!%p5463_p4), %s4341_s12, 0 }
  0x76   : > { %889 = sbr.rel (%p5463_p4) target bundleno = 887 (0x377), region = 90 }
  0x7b   : > { %4250 = dma.done.wait (%p5464_p6), [#allocation5], 16   ;;  %p5465_p7 = pmov %p5464_p6 }
  0x7c   : > { %p5466_p8 = pmov %p5464_p6 }
  0x7d   : > { %4252 = vsyncadd (%p5465_p7), [#allocation5], 4294967280 }
  0x7e   : > { %4254 = dma.done.wait (%p5466_p8), [#allocation7], 16   ;;  %p5467_p10 = pmov %p5464_p6 }
  0x7f   : > { %s900_s11 = sand.u32 1, %s4259_s30  }
  0x80   : > { %4256 = vsyncadd (%p5467_p10), [#allocation7], 4294967280  ;;  %s3494_s23 = sshll.u32 %s900_s11, 10 }
  0x81   : > { %s4666_s24 = scalar_lea.vmem [#allocation8], %s3494_s23 }
  0x82   : > { %906 = sfence }
  0x83   : > { %s3495_s18 = sshll.u32 %s4341_s12, 1  ;;  %s3498_s25 = sshll.u32 %s4341_s12, 5 }
  0x84   : > { %p951_p12 = scmp.lt.s32.totalorder %s3495_s18, 3  ;;  %p966_p2 = scmp.lt.s32.totalorder %s3498_s25, 63 }
  0x85   : > { %p5468_p3 = scmp.ne.s32.totalorder %s4341_s12, 0 }
  0x86   : > { %s5476_s18 = smov (!%p951_p12, %s3495_s18), 3  ;;  %s5478_s25 = smov (!%p966_p2, %s3498_s25), 63 }
  0x87   : > { %s3864_s21 = sshll.u32 %s5478_s25, 4  ;;  %975 = sbr.rel (%p5468_p3) target bundleno = 286 (0x11e), region = 106 }
  0x88   : > { %s4687_s11 = scalar_lea.vmem %s5450_s7, %s3864_s21  ;;  %s987_s23 = sld [smem:[#allocation4]] (!%p5468_p3) }
  0x89   : > { %s3507_s26 = sld [smem:[#allocation4 + $0x1]] (!%p5468_p3) }
  0x8a   : > { %s3508_s27 = sld [smem:[#allocation4 + $0x2]] (!%p5468_p3) }
  0x8b   : > { %s3509_s30 = sld [smem:[#allocation4 + $0x3]] (!%p5468_p3) }
  0x8c   : > { %v976_v0 = vld [vmem:[%s5443_s0] sm:$0xf]  ;;  %v3502_v1 = vld [vmem:[%s5443_s0 + $0x10] sm:$0xf]  ;;  %s4697_s25 = sld [smem:[#allocation4 + $0x4]]  ;;  %v1165_v6 = vlaneseq }
  0x8d   : > { %v3503_v2 = vld [vmem:[%s5443_s0 + $0x20] sm:$0xf]  ;;  %v3504_v3 = vld [vmem:[%s5443_s0 + $0x30] sm:$0xf]  ;;  %s4705_s20 = sld [smem:[#allocation4 + $0x5]] }
  0x8e   : > { %v3505_v4 = vld [vmem:[%s5443_s0 + $0x40] sm:$0xf]  ;;  %v991_v5 = vstv %s987_s23  ;;  %s4710_s1 = sld [smem:[#allocation4 + $0x6]]  ;;  %v3506_v11 = vld [vmem:[%s5443_s0 + $0x50] sm:$0xf] }
  0x8f   : > { %v992_v7 = vmul.f32 %v991_v5, %v976_v0  ;;  %v994_v8 = vstv %s3507_s26  ;;  %v1003_v9 = vmul.f32 %v3502_v1, %v991_v5  ;;  %v1011_v10 = vmul.f32 %v3503_v2, %v991_v5  ;;  %s4712_s28 = sld [smem:[#allocation4 + $0x7]]  ;;  %v3510_v20 = vld [vmem:[%s5443_s0 + $0x4] sm:$0xf]  ;;  %v3511_v25 = vld [vmem:[%s5443_s0 + $0x14] sm:$0xf] }
  0x90   : > { %v995_v12 = vmul.f32 %v3502_v1, %v994_v8  ;;  %v997_v13 = vstv %s3508_s27  ;;  %v1005_v14 = vmul.f32 %v3503_v2, %v994_v8  ;;  %v1013_v15 = vmul.f32 %v3504_v3, %v994_v8  ;;  %s4717_s2 = sld [smem:[#allocation4 + $0x8]]  ;;  %v3512_v32 = vld [vmem:[%s5443_s0 + $0x24] sm:$0xf]  ;;  %v3513_v33 = vld [vmem:[%s5443_s0 + $0x34] sm:$0xf] }
  0x91   : > { %v998_v16 = vmul.f32 %v3503_v2, %v997_v13  ;;  %v1000_v17 = vstv %s3509_s30  ;;  %v1007_v18 = vmul.f32 %v3504_v3, %v997_v13  ;;  %v1015_v19 = vmul.f32 %v3505_v4, %v997_v13  ;;  %s4722_s26 = sld [smem:[#allocation4 + $0x9]]  ;;  %v3514_v34 = vld [vmem:[%s5443_s0 + $0x44] sm:$0xf]  ;;  %v3515_v43 = vld [vmem:[%s5443_s0 + $0x54] sm:$0xf] }
  0x92   : > { %v996_v21 = vadd.f32 %v995_v12, %v992_v7  ;;  %v1001_v22 = vmul.f32 %v3504_v3, %v1000_v17  ;;  %v1006_v23 = vadd.f32 %v1005_v14, %v1003_v9  ;;  %v1009_v24 = vmul.f32 %v3505_v4, %v1000_v17  ;;  %s4727_s21 = sld [smem:[#allocation4 + $0xa]]  ;;  %v3520_v50 = vld [vmem:[%s5443_s0 + $0x8] sm:$0xf]  ;;  %v3521_v55 = vld [vmem:[%s5443_s0 + $0x18] sm:$0xf] }
  0x93   : > { %v1014_v26 = vadd.f32 %v1013_v15, %v1011_v10  ;;  %v1017_v27 = vmul.f32 %v3506_v11, %v1000_v17  ;;  %v1035_v28 = vstv %s4697_s25  ;;  %v1038_v29 = vstv %s4705_s20  ;;  %s4731_s30 = sld [smem:[#allocation4 + $0xb]]  ;;  %v3522_v63 = vld [vmem:[%s5443_s0 + $0x28] sm:$0xf]  ;;  %v3523_v0 = vld [vmem:[%s5443_s0 + $0x38] sm:$0xf] }
  0x94   : > { %v999_v30 = vadd.f32 %v998_v16, %v996_v21  ;;  %v1008_v31 = vadd.f32 %v1007_v18, %v1006_v23  ;;  %v1036_v35 = vmul.f32 %v3510_v20, %v1035_v28  ;;  %v1039_v36 = vmul.f32 %v3511_v25, %v1038_v29  ;;  %s4747_s27 = sld [smem:[#allocation4 + $0xc]]  ;;  %v3524_v1 = vld [vmem:[%s5443_s0 + $0x48] sm:$0xf]  ;;  %v3525_v11 = vld [vmem:[%s5443_s0 + $0x58] sm:$0xf] }
  0x95   : > { %v1016_v37 = vadd.f32 %v1015_v19, %v1014_v26  ;;  %v1041_v38 = vstv %s4710_s1  ;;  %v1044_v39 = vstv %s4712_s28  ;;  %v1047_v40 = vmul.f32 %v3511_v25, %v1035_v28  ;;  %s4752_s28 = sld [smem:[#allocation4 + $0xd]]  ;;  %v3530_v17 = vld [vmem:[%s5443_s0 + $0xc] sm:$0xf] }
  0x96   : > { %v1002_v41 = vadd.f32 %v1001_v22, %v999_v30  ;;  %v1010_v42 = vadd.f32 %v1009_v24, %v1008_v31  ;;  %v1042_v44 = vmul.f32 %v3512_v32, %v1041_v38  ;;  %v1045_v45 = vmul.f32 %v3513_v33, %v1044_v39  ;;  %s4757_s29 = sld [smem:[#allocation4 + $0xe]]  ;;  %v3531_v22 = vld [vmem:[%s5443_s0 + $0x1c] sm:$0xf]  ;;  %v3532_v30 = vld [vmem:[%s5443_s0 + $0x2c] sm:$0xf] }
  0x97   : > { %v1018_v46 = vadd.f32 %v1017_v27, %v1016_v37  ;;  %v1049_v47 = vmul.f32 %v3512_v32, %v1038_v29  ;;  %v1051_v48 = vmul.f32 %v3513_v33, %v1041_v38  ;;  %v1053_v49 = vmul.f32 %v3514_v34, %v1044_v39  ;;  %s4761_s15 = sld [smem:[#allocation4 + $0xf]]  ;;  %v3533_v31 = vld [vmem:[%s5443_s0 + $0x3c] sm:$0xf] }
  0x98   : > { %v1037_v51 = vadd.f32 %v1036_v35, %v1002_v41  ;;  %v1048_v52 = vadd.f32 %v1047_v40, %v1010_v42  ;;  %v1055_v53 = vmul.f32 %v3512_v32, %v1035_v28  ;;  %v1057_v54 = vmul.f32 %v3513_v33, %v1038_v29  ;;  %s4783_s14 = sld [smem:[#allocation6]]  ;;  %v3534_v33 = vld [vmem:[%s5443_s0 + $0x4c] sm:$0xf]  ;;  %v3535_v41 = vld [vmem:[%s5443_s0 + $0x5c] sm:$0xf] }
  0x99   : > { %v1059_v56 = vmul.f32 %v3514_v34, %v1041_v38  ;;  %v1061_v57 = vmul.f32 %v3515_v43, %v1044_v39  ;;  %v1079_v58 = vstv %s4717_s2  ;;  %v1082_v59 = vstv %s4722_s26  ;;  %s4786_s23 = sld [smem:[#allocation4 + $0x10]] }
  0x9a   : > { %v1040_v60 = vadd.f32 %v1039_v36, %v1037_v51  ;;  %v1050_v61 = vadd.f32 %v1049_v47, %v1048_v52  ;;  %v1056_v62 = vadd.f32 %v1055_v53, %v1018_v46  ;;  %v1080_v2 = vmul.f32 %v3520_v50, %v1079_v58  ;;  %s4794_s2 = sld [smem:[#allocation4 + $0x11]] }
  0x9b   : > { %v1083_v3 = vmul.f32 %v3521_v55, %v1082_v59  ;;  %v1085_v4 = vstv %s4727_s21  ;;  %v1088_v5 = vstv %s4731_s30  ;;  %v1091_v7 = vmul.f32 %v3521_v55, %v1079_v58  ;;  %s4827_s19 = sld [smem:[#allocation4 + $0x15]] }
  0x9c   : > { %v1043_v8 = vadd.f32 %v1042_v44, %v1040_v60  ;;  %v1052_v9 = vadd.f32 %v1051_v48, %v1050_v61  ;;  %v1058_v10 = vadd.f32 %v1057_v54, %v1056_v62  ;;  %v1086_v12 = vmul.f32 %v3522_v63, %v1085_v4  ;;  %s4830_s1 = sld [smem:[#allocation4 + $0x16]] }
  0x9d   : > { %v1089_v13 = vmul.f32 %v3523_v0, %v1088_v5  ;;  %v1093_v14 = vmul.f32 %v3522_v63, %v1082_v59  ;;  %v1095_v15 = vmul.f32 %v3523_v0, %v1085_v4  ;;  %v1097_v16 = vmul.f32 %v3524_v1, %v1088_v5  ;;  %s4844_s17 = sld [smem:[#allocation4 + $0x17]] }
  0x9e   : > { %v1046_v18 = vadd.f32 %v1045_v45, %v1043_v8  ;;  %v1054_v19 = vadd.f32 %v1053_v49, %v1052_v9  ;;  %v1060_v20 = vadd.f32 %v1059_v56, %v1058_v10  ;;  %v1099_v21 = vmul.f32 %v3522_v63, %v1079_v58  ;;  %s4854_s20 = sld [smem:[#allocation4 + $0x19]] }
  0x9f   : > { %v1101_v23 = vmul.f32 %v3523_v0, %v1082_v59  ;;  %v1103_v24 = vmul.f32 %v3524_v1, %v1085_v4  ;;  %v1105_v25 = vmul.f32 %v3525_v11, %v1088_v5  ;;  %v1123_v26 = vstv %s4747_s27  ;;  %s4802_s27 = sld [smem:[#allocation4 + $0x12]]  ;;  %v1193_v59 = vld [vmem:[%s5443_s0] sm:$0xf] }
  0xa0   : > { %v1062_v27 = vadd.f32 %v1061_v57, %v1060_v20  ;;  %v1081_v28 = vadd.f32 %v1080_v2, %v1046_v18  ;;  %v1092_v29 = vadd.f32 %v1091_v7, %v1054_v19  ;;  %v1124_v32 = vmul.f32 %v3530_v17, %v1123_v26  ;;  %s4886_s25 = sld [smem:[#allocation4 + $0x1d]] }
  0xa1   : > { %v1126_v34 = vstv %s4752_s28  ;;  %v1129_v35 = vstv %s4757_s29  ;;  %v1132_v36 = vstv %s4761_s15  ;;  %v1135_v37 = vmul.f32 %v3531_v22, %v1123_v26  ;;  %s4807_s28 = sld [smem:[#allocation4 + $0x13]] }
  0xa2   : > { %v1084_v38 = vadd.f32 %v1083_v3, %v1081_v28  ;;  %v1094_v39 = vadd.f32 %v1093_v14, %v1092_v29  ;;  %v1100_v40 = vadd.f32 %v1099_v21, %v1062_v27  ;;  %v1127_v42 = vmul.f32 %v3531_v22, %v1126_v34  ;;  %v3542_v3 = vld [vmem:[%s5443_s0 + $0x10] sm:$0xf]  ;;  %s4849_s29 = sld [smem:[#allocation4 + $0x18]] }
  0xa3   : > { %v1130_v43 = vmul.f32 %v3532_v30, %v1129_v35  ;;  %v1133_v44 = vmul.f32 %v3533_v31, %v1132_v36  ;;  %v1137_v45 = vmul.f32 %v3532_v30, %v1126_v34  ;;  %v1139_v46 = vmul.f32 %v3533_v31, %v1129_v35  ;;  %v3544_v22 = vld [vmem:[%s5443_s0 + $0x30] sm:$0xf]  ;;  %s4891_s21 = sld [smem:[#allocation4 + $0x1e]] }
  0xa4   : > { %v1087_v47 = vadd.f32 %v1086_v12, %v1084_v38  ;;  %v1096_v48 = vadd.f32 %v1095_v15, %v1094_v39  ;;  %v1102_v49 = vadd.f32 %v1101_v23, %v1100_v40  ;;  %v1141_v50 = vmul.f32 %v3534_v33, %v1132_v36  ;;  %v3545_v23 = vld [vmem:[%s5443_s0 + $0x40] sm:$0xf]  ;;  %s4954_s26 = sld [smem:[#allocation4 + $0x24]] }
  0xa5   : > { %v1143_v51 = vmul.f32 %v3532_v30, %v1123_v26  ;;  %v1145_v52 = vmul.f32 %v3533_v31, %v1126_v34  ;;  %v1147_v53 = vmul.f32 %v3534_v33, %v1129_v35  ;;  %v1149_v54 = vmul.f32 %v3535_v41, %v1132_v36  ;;  %v3546_v31 = vld [vmem:[%s5443_s0 + $0x50] sm:$0xf]  ;;  %s4959_s22 = sld [smem:[#allocation4 + $0x25]] }
  0xa6   : > { %v1090_v55 = vadd.f32 %v1089_v13, %v1087_v47  ;;  %v1098_v56 = vadd.f32 %v1097_v16, %v1096_v48  ;;  %v1104_v57 = vadd.f32 %v1103_v24, %v1102_v49  ;;  %v1152_v58 = vstv %s4783_s14  ;;  %s4822_s14 = sld [smem:[#allocation4 + $0x14]]  ;;  %v3543_v13 = vld [vmem:[%s5443_s0 + $0x20] sm:$0xf] }
  0xa7   : > { %v4814_v60 = vshrl.u32 %v1165_v6, 7  ;;  %v1203_v61 = vstv %s4786_s23  ;;  %v4271_v1 = vmov 1983009808   ;;  %v4272_v4 = vmov 1966171168   ;;  %s4883_s23 = sld [smem:[#allocation4 + $0x1c]] }
  0xa8   : > { %v1106_v62 = vadd.f32 %v1105_v25, %v1104_v57  ;;  %v1125_v63 = vadd.f32 %v1124_v32, %v1090_v55  ;;  %v1136_v0 = vadd.f32 %v1135_v37, %v1098_v56  ;;  %v1163_v2 = vunpack.c.l.s4 %v4271_v1  ;;  %s5007_s30 = sld [smem:[#allocation4 + $0x2c]] }
  0xa9   : > { %v1178_v5 = vunpack.c.l.s4 %v4272_v4  ;;  %v1204_v7 = vmul.f32 %v1203_v61, %v1193_v59  ;;  %v1206_v8 = vstv %s4794_s2  ;;  %v1209_v9 = vstv %s4802_s27  ;;  %s4859_s2 = sld [smem:[#allocation4 + $0x1a]]  ;;  %v3554_v59 = vld [vmem:[%s5443_s0 + $0x34] sm:$0xf] }
  0xaa   : > { %v1128_v6 = vadd.f32 %v1127_v42, %v1125_v63  ;;  %v1138_v10 = vadd.f32 %v1137_v45, %v1136_v0  ;;  %v1144_v11 = vadd.f32 %v1143_v51, %v1106_v62  ;;  %v1164_v12 = vunpack.c.0.s8 %v1163_v2  ;;  %v3551_v45 = vld [vmem:[%s5443_s0 + $0x4] sm:$0xf]  ;;  %s4867_s27 = sld [smem:[#allocation4 + $0x1b]]  ;;  %v3556_v4 = vld [vmem:[%s5443_s0 + $0x54] sm:$0xf] }
  0xab   : > { %v1179_v14 = vunpack.c.0.s8 %v1178_v5  ;;  %v1207_v15 = vmul.f32 %v3542_v3, %v1206_v8  ;;  %v1210_v16 = vmul.f32 %v3543_v13, %v1209_v9  ;;  %v1212_v17 = vstv %s4807_s28  ;;  %s4896_s28 = sld [smem:[#allocation4 + $0x1f]] }
  0xac   : > { %v1131_v18 = vadd.f32 %v1130_v43, %v1128_v6  ;;  %v1140_v19 = vadd.f32 %v1139_v46, %v1138_v10  ;;  %v1146_v20 = vadd.f32 %v1145_v52, %v1144_v11  ;;  %v4833_v21 = vsub.s32 %v1164_v12, %v4814_v60  ;;  %v3553_v52 = vld [vmem:[%s5443_s0 + $0x24] sm:$0xf]  ;;  %s5135_s15 = sld [smem:[#allocation4 + $0x3d]] }
  0xad   : > { %v4842_v24 = vsub.s32 %v1179_v14, %v4814_v60  ;;  %v1208_v25 = vadd.f32 %v1207_v15, %v1204_v7  ;;  %v1213_v26 = vmul.f32 %v3544_v22, %v1212_v17  ;;  %v1215_v27 = vmul.f32 %v3542_v3, %v1203_v61 }
  0xae   : > { %v1134_v28 = vadd.f32 %v1133_v44, %v1131_v18  ;;  %v1142_v29 = vadd.f32 %v1141_v50, %v1140_v19  ;;  %v1148_v30 = vadd.f32 %v1147_v53, %v1146_v20  ;;  %v1217_v32 = vmul.f32 %v3543_v13, %v1206_v8  ;;  %v3552_v50 = vld [vmem:[%s5443_s0 + $0x14] sm:$0xf] }
  0xaf   : > { %v1211_v33 = vadd.f32 %v1210_v16, %v1208_v25  ;;  %v1219_v34 = vmul.f32 %v3544_v22, %v1209_v9  ;;  %v1221_v35 = vmul.f32 %v3545_v23, %v1212_v17  ;;  %v1223_v36 = vmul.f32 %v3543_v13, %v1203_v61  ;;  %v3555_v61 = vld [vmem:[%s5443_s0 + $0x44] sm:$0xf]  ;;  %v3561_v16 = vld [vmem:[%s5443_s0 + $0x8] sm:$0xf] }
  0xb0   : > { %v1150_v37 = vadd.f32 %v1149_v54, %v1148_v30  ;;  %v1153_v38 = vadd.f32 %v1152_v58, %v1134_v28  ;;  %v1155_v39 = vadd.f32 %v1152_v58, %v1142_v29  ;;  %v1218_v40 = vadd.f32 %v1217_v32, %v1215_v27  ;;  %v3562_v27 = vld [vmem:[%s5443_s0 + $0x18] sm:$0xf] }
  0xb1   : > { %v1214_v41 = vadd.f32 %v1213_v26, %v1211_v33  ;;  %v1225_v42 = vmul.f32 %v3544_v22, %v1206_v8  ;;  %v1227_v43 = vmul.f32 %v3545_v23, %v1209_v9  ;;  %v1229_v44 = vmul.f32 %v3546_v31, %v1212_v17 }
  0xb2   : > { %v1154_v46 = vmax.f32 %v1153_v38, 0.0  ;;  %v1156_v47 = vmax.f32 %v1155_v39, 0.0  ;;  %v1157_v48 = vadd.f32 %v1152_v58, %v1150_v37  ;;  %v1220_v49 = vadd.f32 %v1219_v34, %v1218_v40  ;;  %v3564_v37 = vld [vmem:[%s5443_s0 + $0x38] sm:$0xf]  ;;  %v3565_v38 = vld [vmem:[%s5443_s0 + $0x48] sm:$0xf] }
  0xb3   : > { %v1226_v51 = vadd.f32 %v1225_v42, %v1223_v36  ;;  %v1241_v53 = vstv %s4822_s14  ;;  %v1244_v54 = vstv %s4827_s19  ;;  %v1247_v55 = vstv %s4830_s1  ;;  %v3563_v36 = vld [vmem:[%s5443_s0 + $0x28] sm:$0xf]  ;;  %s4923_s14 = sld [smem:[#allocation4 + $0x22]] }
  0xb4   : > { %v1158_v56 = vmax.f32 %v1157_v48, 0.0  ;;  %v1159_v57 = vmax.f32 %v1154_v46, %v1156_v47  ;;  %v1222_v58 = vadd.f32 %v1221_v35, %v1220_v49  ;;  %v1242_v62 = vmul.f32 %v3551_v45, %v1241_v53  ;;  %v3566_v46 = vld [vmem:[%s5443_s0 + $0x58] sm:$0xf]  ;;  %s4927_s19 = sld [smem:[#allocation4 + $0x23]] }
  0xb5   : > { %v1228_v63 = vadd.f32 %v1227_v43, %v1226_v51  ;;  %v1245_v0 = vmul.f32 %v3552_v50, %v1244_v54  ;;  %v1248_v1 = vmul.f32 %v3553_v52, %v1247_v55  ;;  %v1250_v2 = vstv %s4844_s17  ;;  %s4913_s17 = sld [smem:[#allocation4 + $0x20]] }
  0xb6   : > { %v1160_v3 = vmax.f32 %v1159_v57, %v1158_v56  ;;  %v1243_v5 = vadd.f32 %v1242_v62, %v1214_v41  ;;  %v1251_v7 = vmul.f32 %v3554_v59, %v1250_v2  ;;  %v1253_v8 = vmul.f32 %v3552_v50, %v1241_v53  ;;  %v3572_v57 = vld [vmem:[%s5443_s0 + $0x1c] sm:$0xf]  ;;  %s5011_s1 = sld [smem:[#allocation4 + $0x2d]] }
  0xb7   : > { %v1230_v9 = vadd.f32 %v1229_v44, %v1228_v63  ;;  %v1255_v6 = vmul.f32 %v3553_v52, %v1244_v54  ;;  %v1257_v10 = vmul.f32 %v3554_v59, %v1247_v55  ;;  %v1259_v11 = vmul.f32 %v3555_v61, %v1250_v2 }
  0xb8   : > { %v1168_v12 = vrot.slane %v1160_v3, %v4833_v21  ;;  %v1246_v13 = vadd.f32 %v1245_v0, %v1243_v5  ;;  %v1254_v14 = vadd.f32 %v1253_v8, %v1222_v58  ;;  %v1261_v15 = vmul.f32 %v3553_v52, %v1241_v53  ;;  %v3571_v52 = vld [vmem:[%s5443_s0 + $0xc] sm:$0xf]  ;;  %v3574_v3 = vld [vmem:[%s5443_s0 + $0x3c] sm:$0xf] }
  0xb9   : > { %v1263_v17 = vmul.f32 %v3554_v59, %v1244_v54  ;;  %v1265_v18 = vmul.f32 %v3555_v61, %v1247_v55  ;;  %v1267_v19 = vmul.f32 %v3556_v4, %v1250_v2  ;;  %v1279_v20 = vstv %s4849_s29  ;;  %s4918_s29 = sld [smem:[#allocation4 + $0x21]]  ;;  %v3573_v2 = vld [vmem:[%s5443_s0 + $0x2c] sm:$0xf] }
  0xba   : > { %v1169_v22 = vcombine.high %v1168_v12, %v1168_v12  ;;  %v1249_v23 = vadd.f32 %v1248_v1, %v1246_v13  ;;  %v1256_v25 = vadd.f32 %v1255_v6, %v1254_v14  ;;  %v1262_v26 = vadd.f32 %v1261_v15, %v1230_v9  ;;  %v3575_v4 = vld [vmem:[%s5443_s0 + $0x4c] sm:$0xf]  ;;  %v3576_v13 = vld [vmem:[%s5443_s0 + $0x5c] sm:$0xf] }
  0xbb   : > { %v1280_v28 = vmul.f32 %v3561_v16, %v1279_v20  ;;  %v1282_v29 = vstv %s4854_s20  ;;  %v1285_v30 = vstv %s4859_s2  ;;  %v1288_v31 = vstv %s4867_s27  ;;  %s4907_s20 = sld [smem:[#allocation6 + $0x1]] }
  0xbc   : > { %v3540_v32 = vpack.c.bf16 %v1169_v22, %v1168_v12  ;;  %v1252_v33 = vadd.f32 %v1251_v7, %v1249_v23  ;;  %v1258_v34 = vadd.f32 %v1257_v10, %v1256_v25  ;;  %v1264_v35 = vadd.f32 %v1263_v17, %v1262_v26  ;;  %v1387_v25 = vld [vmem:[%s5443_s0] sm:$0xf]  ;;  %s4980_s2 = sld [smem:[#allocation4 + $0x28]] }
  0xbd   : > { %v1283_v39 = vmul.f32 %v3562_v27, %v1282_v29  ;;  %v1286_v40 = vmul.f32 %v3563_v36, %v1285_v30  ;;  %v1289_v41 = vmul.f32 %v3564_v37, %v1288_v31  ;;  %v1291_v42 = vmul.f32 %v3562_v27, %v1279_v20  ;;  %s4984_s27 = sld [smem:[#allocation4 + $0x29]] }
  0xbe   : > { %v1183_v43 = vrot.slane %v3540_v32, %v4842_v24  ;;  %v1260_v44 = vadd.f32 %v1259_v11, %v1258_v34  ;;  %v1266_v45 = vadd.f32 %v1265_v18, %v1264_v35  ;;  %v1281_v47 = vadd.f32 %v1280_v28, %v1252_v33  ;;  %v3585_v34 = vld [vmem:[%s5443_s0 + $0x20] sm:$0xf] }
  0xbf   : > { %v1293_v48 = vmul.f32 %v3563_v36, %v1282_v29  ;;  %v1295_v49 = vmul.f32 %v3564_v37, %v1285_v30  ;;  %v1297_v50 = vmul.f32 %v3565_v38, %v1288_v31  ;;  %v1299_v51 = vmul.f32 %v3563_v36, %v1279_v20 }
  0xc0   : > { %3541 = vst.sshfl [vmem:[#allocation2] sm:$0x5 pattern:$0x73625140] %v1183_v43  ;;  %v1268_v53 = vadd.f32 %v1267_v19, %v1266_v45  ;;  %v1284_v54 = vadd.f32 %v1283_v39, %v1281_v47  ;;  %v1292_v55 = vadd.f32 %v1291_v42, %v1260_v44  ;;  %v1301_v56 = vmul.f32 %v3564_v37, %v1282_v29  ;;  %v3586_v43 = vld [vmem:[%s5443_s0 + $0x30] sm:$0xf] }
  0xc1   : > { %v1303_v58 = vmul.f32 %v3565_v38, %v1285_v30  ;;  %v1305_v59 = vmul.f32 %v3566_v46, %v1288_v31  ;;  %v1317_v61 = vstv %s4883_s23  ;;  %v1320_v62 = vstv %s4886_s25  ;;  %v3584_v30 = vld [vmem:[%s5443_s0 + $0x10] sm:$0xf]  ;;  %v3587_v44 = vld [vmem:[%s5443_s0 + $0x40] sm:$0xf]  ;;  %s4989_s23 = sld [smem:[#allocation4 + $0x2a]] }
  0xc2   : > { %v1287_v63 = vadd.f32 %v1286_v40, %v1284_v54  ;;  %v1294_v0 = vadd.f32 %v1293_v48, %v1292_v55  ;;  %v1300_v1 = vadd.f32 %v1299_v51, %v1268_v53  ;;  %v1318_v5 = vmul.f32 %v3571_v52, %v1317_v61  ;;  %v3588_v53 = vld [vmem:[%s5443_s0 + $0x50] sm:$0xf]  ;;  %s5043_s25 = sld [smem:[#allocation4 + $0x31]] }
  0xc3   : > { %v1321_v7 = vmul.f32 %v3572_v57, %v1320_v62  ;;  %v1323_v8 = vstv %s4891_s21  ;;  %v1326_v9 = vstv %s4896_s28  ;;  %v1329_v6 = vmul.f32 %v3572_v57, %v1317_v61  ;;  %s5075_s28 = sld [smem:[#allocation4 + $0x34]] }
  0xc4   : > { %v1290_v10 = vadd.f32 %v1289_v41, %v1287_v63  ;;  %v1296_v11 = vadd.f32 %v1295_v49, %v1294_v0  ;;  %v1302_v12 = vadd.f32 %v1301_v56, %v1300_v1  ;;  %v1324_v14 = vmul.f32 %v3573_v2, %v1323_v8  ;;  %s5104_s21 = sld [smem:[#allocation4 + $0x39]] }
  0xc5   : > { %v1327_v15 = vmul.f32 %v3574_v3, %v1326_v9  ;;  %v1331_v16 = vmul.f32 %v3573_v2, %v1320_v62  ;;  %v1333_v17 = vmul.f32 %v3574_v3, %v1323_v8  ;;  %v1335_v18 = vmul.f32 %v3575_v4, %v1326_v9 }
  0xc6   : > { %v1298_v19 = vadd.f32 %v1297_v50, %v1296_v11  ;;  %v1304_v20 = vadd.f32 %v1303_v58, %v1302_v12  ;;  %v1319_v22 = vadd.f32 %v1318_v5, %v1290_v10  ;;  %v1337_v23 = vmul.f32 %v3573_v2, %v1317_v61 }
  0xc7   : > { %v1339_v26 = vmul.f32 %v3574_v3, %v1320_v62  ;;  %v1341_v27 = vmul.f32 %v3575_v4, %v1323_v8  ;;  %v1343_v28 = vmul.f32 %v3576_v13, %v1326_v9  ;;  %v1346_v29 = vstv %s4907_s20  ;;  %v3593_v4 = vld [vmem:[%s5443_s0 + $0x4] sm:$0xf]  ;;  %s5035_s20 = sld [smem:[#allocation6 + $0x2]] }
  0xc8   : > { %v1306_v31 = vadd.f32 %v1305_v59, %v1304_v20  ;;  %v1322_v32 = vadd.f32 %v1321_v7, %v1319_v22  ;;  %v1330_v33 = vadd.f32 %v1329_v6, %v1298_v19  ;;  %v1397_v35 = vstv %s4913_s17  ;;  %s4967_s17 = sld [smem:[#allocation4 + $0x26]]  ;;  %v3594_v6 = vld [vmem:[%s5443_s0 + $0x14] sm:$0xf]  ;;  %v3597_v22 = vld [vmem:[%s5443_s0 + $0x44] sm:$0xf] }
  0xc9   : > { %v1398_v36 = vmul.f32 %v1397_v35, %v1387_v25  ;;  %v1400_v37 = vstv %s4918_s29  ;;  %v1403_v38 = vstv %s4923_s14  ;;  %v1406_v39 = vstv %s4927_s19  ;;  %s4969_s29 = sld [smem:[#allocation4 + $0x27]]  ;;  %v3596_v20 = vld [vmem:[%s5443_s0 + $0x34] sm:$0xf] }
  0xca   : > { %v1325_v40 = vadd.f32 %v1324_v14, %v1322_v32  ;;  %v1332_v41 = vadd.f32 %v1331_v16, %v1330_v33  ;;  %v1338_v42 = vadd.f32 %v1337_v23, %v1306_v31  ;;  %v1401_v45 = vmul.f32 %v3584_v30, %v1400_v37  ;;  %v3595_v16 = vld [vmem:[%s5443_s0 + $0x24] sm:$0xf]  ;;  %v3598_v32 = vld [vmem:[%s5443_s0 + $0x54] sm:$0xf]  ;;  %s5020_s19 = sld [smem:[#allocation4 + $0x2e]] }
  0xcb   : > { %v1404_v46 = vmul.f32 %v3585_v34, %v1403_v38  ;;  %v1407_v47 = vmul.f32 %v3586_v43, %v1406_v39  ;;  %v1409_v48 = vmul.f32 %v3584_v30, %v1397_v35  ;;  %v1411_v49 = vmul.f32 %v3585_v34, %v1400_v37  ;;  %s5045_s14 = sld [smem:[#allocation4 + $0x32]] }
  0xcc   : > { %v1328_v50 = vadd.f32 %v1327_v15, %v1325_v40  ;;  %v1334_v51 = vadd.f32 %v1333_v17, %v1332_v41  ;;  %v1340_v52 = vadd.f32 %v1339_v26, %v1338_v42  ;;  %v1402_v54 = vadd.f32 %v1401_v45, %v1398_v36  ;;  %v3603_v40 = vld [vmem:[%s5443_s0 + $0x8] sm:$0xf] }
  0xcd   : > { %v1412_v55 = vadd.f32 %v1411_v49, %v1409_v48  ;;  %v1413_v56 = vmul.f32 %v3586_v43, %v1403_v38  ;;  %v1415_v57 = vmul.f32 %v3587_v44, %v1406_v39  ;;  %v1417_v58 = vmul.f32 %v3585_v34, %v1397_v35 }
  0xce   : > { %v1336_v59 = vadd.f32 %v1335_v18, %v1334_v51  ;;  %v1342_v61 = vadd.f32 %v1341_v27, %v1340_v52  ;;  %v1347_v62 = vadd.f32 %v1346_v29, %v1328_v50  ;;  %v1405_v63 = vadd.f32 %v1404_v46, %v1402_v54  ;;  %v3604_v51 = vld [vmem:[%s5443_s0 + $0x18] sm:$0xf]  ;;  %v3605_v52 = vld [vmem:[%s5443_s0 + $0x28] sm:$0xf] }
  0xcf   : > { %v1414_v0 = vadd.f32 %v1413_v56, %v1412_v55  ;;  %v1419_v1 = vmul.f32 %v3586_v43, %v1400_v37  ;;  %v1421_v2 = vmul.f32 %v3587_v44, %v1403_v38  ;;  %v1423_v3 = vmul.f32 %v3588_v53, %v1406_v39 }
  0xd0   : > { %v1344_v5 = vadd.f32 %v1343_v28, %v1342_v61  ;;  %v1348_v7 = vmax.f32 %v1347_v62, 0.0  ;;  %v1349_v8 = vadd.f32 %v1346_v29, %v1336_v59  ;;  %v1408_v9 = vadd.f32 %v1407_v47, %v1405_v63 }
  0xd1   : > { %v1416_v10 = vadd.f32 %v1415_v57, %v1414_v0  ;;  %v1420_v11 = vadd.f32 %v1419_v1, %v1417_v58  ;;  %v1435_v12 = vstv %s4954_s26  ;;  %v1438_v13 = vstv %s4959_s22  ;;  %s4999_s22 = sld [smem:[#allocation4 + $0x2b]]  ;;  %v3606_v57 = vld [vmem:[%s5443_s0 + $0x38] sm:$0xf]  ;;  %v3607_v58 = vld [vmem:[%s5443_s0 + $0x48] sm:$0xf] }
  0xd2   : > { %v1350_v14 = vmax.f32 %v1349_v8, 0.0  ;;  %v1351_v15 = vadd.f32 %v1346_v29, %v1344_v5  ;;  %v1436_v17 = vmul.f32 %v3593_v4, %v1435_v12  ;;  %v1439_v18 = vmul.f32 %v3594_v6, %v1438_v13  ;;  %s5102_s26 = sld [smem:[#allocation4 + $0x38]] }
  0xd3   : > { %v1422_v19 = vadd.f32 %v1421_v2, %v1420_v11  ;;  %v1441_v23 = vstv %s4967_s17  ;;  %v1444_v25 = vstv %s4969_s29  ;;  %v1447_v26 = vmul.f32 %v3594_v6, %v1435_v12  ;;  %s5029_s17 = sld [smem:[#allocation4 + $0x2f]] }
  0xd4   : > { %v1352_v27 = vmax.f32 %v1351_v15, 0.0  ;;  %v1353_v28 = vmax.f32 %v1348_v7, %v1350_v14  ;;  %v1437_v29 = vadd.f32 %v1436_v17, %v1408_v9  ;;  %v1442_v30 = vmul.f32 %v3595_v16, %v1441_v23  ;;  %v3613_v15 = vld [vmem:[%s5443_s0 + $0xc] sm:$0xf] }
  0xd5   : > { %v1424_v31 = vadd.f32 %v1423_v3, %v1422_v19  ;;  %v1445_v33 = vmul.f32 %v3596_v20, %v1444_v25  ;;  %v1448_v34 = vadd.f32 %v1447_v26, %v1416_v10  ;;  %v1449_v35 = vmul.f32 %v3595_v16, %v1438_v13  ;;  %v3608_v3 = vld [vmem:[%s5443_s0 + $0x58] sm:$0xf] }
  0xd6   : > { %v1354_v36 = vmax.f32 %v1353_v28, %v1352_v27  ;;  %v1440_v37 = vadd.f32 %v1439_v18, %v1437_v29  ;;  %v1451_v38 = vmul.f32 %v3596_v20, %v1441_v23  ;;  %v1453_v39 = vmul.f32 %v3597_v22, %v1444_v25  ;;  %v3616_v29 = vld [vmem:[%s5443_s0 + $0x3c] sm:$0xf] }
  0xd7   : > { %v1450_v41 = vadd.f32 %v1449_v35, %v1448_v34  ;;  %v1455_v42 = vmul.f32 %v3595_v16, %v1435_v12  ;;  %v1457_v43 = vmul.f32 %v3596_v20, %v1438_v13  ;;  %v1459_v44 = vmul.f32 %v3597_v22, %v1441_v23  ;;  %v3614_v23 = vld [vmem:[%s5443_s0 + $0x1c] sm:$0xf] }
  0xd8   : > { %v1362_v45 = vrot.slane %v1354_v36, %v4833_v21  ;;  %v1443_v46 = vadd.f32 %v1442_v30, %v1440_v37  ;;  %v1461_v47 = vmul.f32 %v3598_v32, %v1444_v25  ;;  %v1473_v48 = vstv %s4980_s2  ;;  %v3615_v25 = vld [vmem:[%s5443_s0 + $0x2c] sm:$0xf]  ;;  %s5062_s2 = sld [smem:[#allocation4 + $0x33]] }
  0xd9   : > { %v1452_v49 = vadd.f32 %v1451_v38, %v1450_v41  ;;  %v1456_v50 = vadd.f32 %v1455_v42, %v1424_v31  ;;  %v1474_v53 = vmul.f32 %v3603_v40, %v1473_v48  ;;  %v1476_v54 = vstv %s4984_s27  ;;  %v3617_v30 = vld [vmem:[%s5443_s0 + $0x4c] sm:$0xf]  ;;  %s5107_s27 = sld [smem:[#allocation4 + $0x3a]] }
  0xda   : > { %v1363_v55 = vcombine.high %v1362_v45, %v1362_v45  ;;  %v1446_v56 = vadd.f32 %v1445_v33, %v1443_v46  ;;  %v1477_v59 = vmul.f32 %v3604_v51, %v1476_v54  ;;  %v1479_v61 = vstv %s4989_s23  ;;  %s5037_s23 = sld [smem:[#allocation4 + $0x30]] }
  0xdb   : > { %v1454_v62 = vadd.f32 %v1453_v39, %v1452_v49  ;;  %v1458_v63 = vadd.f32 %v1457_v43, %v1456_v50  ;;  %v1480_v0 = vmul.f32 %v3605_v52, %v1479_v61  ;;  %v1482_v1 = vstv %s4999_s22  ;;  %v3618_v39 = vld [vmem:[%s5443_s0 + $0x5c] sm:$0xf]  ;;  %s5083_s22 = sld [smem:[#allocation4 + $0x35]] }
  0xdc   : > { %v3582_v2 = vpack.c.bf16 %v1363_v55, %v1362_v45  ;;  %v1475_v4 = vadd.f32 %v1474_v53, %v1446_v56  ;;  %v1483_v5 = vmul.f32 %v3606_v57, %v1482_v1  ;;  %v1485_v7 = vmul.f32 %v3604_v51, %v1473_v48  ;;  %v1581_v51 = vld [vmem:[%s5443_s0] sm:$0xf] }
  0xdd   : > { %v1460_v8 = vadd.f32 %v1459_v44, %v1458_v63  ;;  %v1487_v9 = vmul.f32 %v3605_v52, %v1476_v54  ;;  %v1489_v6 = vmul.f32 %v3606_v57, %v1479_v61  ;;  %v1491_v10 = vmul.f32 %v3607_v58, %v1482_v1 }
  0xde   : > { %v1377_v11 = vrot.slane %v3582_v2, %v4842_v24  ;;  %v1478_v12 = vadd.f32 %v1477_v59, %v1475_v4  ;;  %v1486_v13 = vadd.f32 %v1485_v7, %v1454_v62  ;;  %v1493_v14 = vmul.f32 %v3605_v52, %v1473_v48  ;;  %v3626_v52 = vld [vmem:[%s5443_s0 + $0x10] sm:$0xf]  ;;  %v3629_v2 = vld [vmem:[%s5443_s0 + $0x40] sm:$0xf] }
  0xdf   : > { %v1462_v16 = vadd.f32 %v1461_v47, %v1460_v8  ;;  %v1495_v17 = vmul.f32 %v3606_v57, %v1476_v54  ;;  %v1497_v18 = vmul.f32 %v3607_v58, %v1479_v61  ;;  %v1499_v19 = vmul.f32 %v3608_v3, %v1482_v1  ;;  %v3627_v58 = vld [vmem:[%s5443_s0 + $0x20] sm:$0xf]  ;;  %v3628_v1 = vld [vmem:[%s5443_s0 + $0x30] sm:$0xf] }
  0xe0   : > { %3583 = vst.sshfl [vmem:[#allocation2 + $0x2] sm:$0x5 pattern:$0x73625140] %v1377_v11  ;;  %v1481_v20 = vadd.f32 %v1480_v0, %v1478_v12  ;;  %v1488_v22 = vadd.f32 %v1487_v9, %v1486_v13  ;;  %v1511_v26 = vstv %s5007_s30  ;;  %v1514_v27 = vstv %s5011_s1  ;;  %s5114_s30 = sld [smem:[#allocation4 + $0x3b]] }
  0xe1   : > { %v1494_v28 = vadd.f32 %v1493_v14, %v1462_v16  ;;  %v1512_v31 = vmul.f32 %v3613_v15, %v1511_v26  ;;  %v1515_v32 = vmul.f32 %v3614_v23, %v1514_v27  ;;  %v1517_v33 = vstv %s5020_s19  ;;  %s5091_s19 = sld [smem:[#allocation4 + $0x36]]  ;;  %v3630_v14 = vld [vmem:[%s5443_s0 + $0x50] sm:$0xf] }
  0xe2   : > { %v1484_v34 = vadd.f32 %v1483_v5, %v1481_v20  ;;  %v1490_v35 = vadd.f32 %v1489_v6, %v1488_v22  ;;  %v1518_v36 = vmul.f32 %v3615_v25, %v1517_v33  ;;  %v1520_v37 = vstv %s5029_s17 }
  0xe3   : > { %v1496_v38 = vadd.f32 %v1495_v17, %v1494_v28  ;;  %v1521_v40 = vmul.f32 %v3616_v29, %v1520_v37  ;;  %v1523_v41 = vmul.f32 %v3614_v23, %v1511_v26  ;;  %v1525_v42 = vmul.f32 %v3615_v25, %v1514_v27  ;;  %v3635_v28 = vld [vmem:[%s5443_s0 + $0x4] sm:$0xf] }
  0xe4   : > { %v1492_v43 = vadd.f32 %v1491_v10, %v1490_v35  ;;  %v1513_v44 = vadd.f32 %v1512_v31, %v1484_v34  ;;  %v1527_v45 = vmul.f32 %v3616_v29, %v1517_v33  ;;  %v1529_v46 = vmul.f32 %v3617_v30, %v1520_v37 }
  0xe5   : > { %v1498_v47 = vadd.f32 %v1497_v18, %v1496_v38  ;;  %v1531_v48 = vmul.f32 %v3615_v25, %v1511_v26  ;;  %v1533_v49 = vmul.f32 %v3616_v29, %v1514_v27  ;;  %v1535_v50 = vmul.f32 %v3617_v30, %v1517_v33  ;;  %v3636_v38 = vld [vmem:[%s5443_s0 + $0x14] sm:$0xf] }
  0xe6   : > { %v1516_v53 = vadd.f32 %v1515_v32, %v1513_v44  ;;  %v1524_v54 = vadd.f32 %v1523_v41, %v1492_v43  ;;  %v1537_v55 = vmul.f32 %v3618_v39, %v1520_v37  ;;  %v1540_v56 = vstv %s5035_s20 }
  0xe7   : > { %v1500_v57 = vadd.f32 %v1499_v19, %v1498_v47  ;;  %v1591_v59 = vstv %s5037_s23  ;;  %v1594_v61 = vstv %s5043_s25  ;;  %v1597_v62 = vstv %s5045_s14  ;;  %s5094_s23 = sld [smem:[#allocation4 + $0x37]]  ;;  %v3639_v47 = vld [vmem:[%s5443_s0 + $0x44] sm:$0xf] }
  0xe8   : > { %v1519_v63 = vadd.f32 %v1518_v36, %v1516_v53  ;;  %v1526_v0 = vadd.f32 %v1525_v42, %v1524_v54  ;;  %v1592_v3 = vmul.f32 %v1591_v59, %v1581_v51  ;;  %v1595_v4 = vmul.f32 %v3626_v52, %v1594_v61  ;;  %s5169_s25 = sld [smem:[#allocation6 + $0x3]] }
  0xe9   : > { %v1532_v5 = vadd.f32 %v1531_v48, %v1500_v57  ;;  %v1598_v7 = vmul.f32 %v3627_v58, %v1597_v62  ;;  %v1600_v8 = vstv %s5062_s2  ;;  %v1603_v9 = vmul.f32 %v3626_v52, %v1591_v59 }
  0xea   : > { %v1522_v6 = vadd.f32 %v1521_v40, %v1519_v63  ;;  %v1528_v10 = vadd.f32 %v1527_v45, %v1526_v0  ;;  %v1596_v11 = vadd.f32 %v1595_v4, %v1592_v3  ;;  %v1601_v12 = vmul.f32 %v3628_v1, %v1600_v8  ;;  %v3637_v45 = vld [vmem:[%s5443_s0 + $0x24] sm:$0xf]  ;;  %v3645_v63 = vld [vmem:[%s5443_s0 + $0x8] sm:$0xf] }
  0xeb   : > { %v1534_v13 = vadd.f32 %v1533_v49, %v1532_v5  ;;  %v1605_v15 = vmul.f32 %v3627_v58, %v1594_v61  ;;  %v1607_v16 = vmul.f32 %v3628_v1, %v1597_v62  ;;  %v1609_v17 = vmul.f32 %v3629_v2, %v1600_v8 }
  0xec   : > { %v1530_v18 = vadd.f32 %v1529_v46, %v1528_v10  ;;  %v1541_v19 = vadd.f32 %v1540_v56, %v1522_v6  ;;  %v1599_v20 = vadd.f32 %v1598_v7, %v1596_v11  ;;  %v1611_v22 = vmul.f32 %v3627_v58, %v1591_v59  ;;  %v3638_v46 = vld [vmem:[%s5443_s0 + $0x34] sm:$0xf]  ;;  %v3646_v11 = vld [vmem:[%s5443_s0 + $0x18] sm:$0xf] }
  0xed   : > { %v1536_v23 = vadd.f32 %v1535_v50, %v1534_v13  ;;  %v1606_v25 = vadd.f32 %v1605_v15, %v1603_v9  ;;  %v1613_v26 = vmul.f32 %v3628_v1, %v1594_v61  ;;  %v1615_v27 = vmul.f32 %v3629_v2, %v1597_v62 }
  0xee   : > { %v1542_v29 = vmax.f32 %v1541_v19, 0.0  ;;  %v1543_v30 = vadd.f32 %v1540_v56, %v1530_v18  ;;  %v1602_v31 = vadd.f32 %v1601_v12, %v1599_v20  ;;  %v1617_v32 = vmul.f32 %v3630_v14, %v1600_v8  ;;  %v3647_v14 = vld [vmem:[%s5443_s0 + $0x28] sm:$0xf] }
  0xef   : > { %v1538_v33 = vadd.f32 %v1537_v55, %v1536_v23  ;;  %v1608_v34 = vadd.f32 %v1607_v16, %v1606_v25  ;;  %v1614_v35 = vadd.f32 %v1613_v26, %v1611_v22  ;;  %v1629_v36 = vstv %s5075_s28  ;;  %v3640_v55 = vld [vmem:[%s5443_s0 + $0x54] sm:$0xf]  ;;  %s5141_s28 = sld [smem:[#allocation4 + $0x3e]]  ;;  %v3648_v22 = vld [vmem:[%s5443_s0 + $0x38] sm:$0xf] }
  0xf0   : > { %v1544_v37 = vmax.f32 %v1543_v30, 0.0  ;;  %v1630_v39 = vmul.f32 %v3635_v28, %v1629_v36  ;;  %v1632_v40 = vstv %s5083_s22  ;;  %v1635_v41 = vstv %s5091_s19 }
  0xf1   : > { %v1545_v42 = vadd.f32 %v1540_v56, %v1538_v33  ;;  %v1610_v43 = vadd.f32 %v1609_v17, %v1608_v34  ;;  %v1616_v44 = vadd.f32 %v1615_v27, %v1614_v35  ;;  %v1633_v48 = vmul.f32 %v3636_v38, %v1632_v40 }
  0xf2   : > { %v1547_v49 = vmax.f32 %v1542_v29, %v1544_v37  ;;  %v1631_v50 = vadd.f32 %v1630_v39, %v1602_v31  ;;  %v1636_v51 = vmul.f32 %v3637_v45, %v1635_v41  ;;  %v1638_v52 = vstv %s5094_s23  ;;  %s5132_s23 = sld [smem:[#allocation4 + $0x3c]]  ;;  %v3649_v31 = vld [vmem:[%s5443_s0 + $0x48] sm:$0xf]  ;;  %v3655_v37 = vld [vmem:[%s5443_s0 + $0xc] sm:$0xf] }
  0xf3   : > { %v1546_v53 = vmax.f32 %v1545_v42, 0.0  ;;  %v1618_v54 = vadd.f32 %v1617_v32, %v1616_v44  ;;  %v1639_v56 = vmul.f32 %v3638_v46, %v1638_v52  ;;  %v1641_v57 = vmul.f32 %v3636_v38, %v1629_v36  ;;  %v3650_v42 = vld [vmem:[%s5443_s0 + $0x58] sm:$0xf] }
  0xf4   : > { %v1634_v58 = vadd.f32 %v1633_v48, %v1631_v50  ;;  %v1643_v59 = vmul.f32 %v3637_v45, %v1632_v40  ;;  %v1645_v61 = vmul.f32 %v3638_v46, %v1635_v41  ;;  %v1647_v62 = vmul.f32 %v3639_v47, %v1638_v52 }
  0xf5   : > { %v1548_v0 = vmax.f32 %v1547_v49, %v1546_v53  ;;  %v1642_v1 = vadd.f32 %v1641_v57, %v1610_v43  ;;  %v1649_v2 = vmul.f32 %v3637_v45, %v1629_v36  ;;  %v1651_v3 = vmul.f32 %v3638_v46, %v1632_v40  ;;  %v3656_v49 = vld [vmem:[%s5443_s0 + $0x1c] sm:$0xf]  ;;  %v3657_v53 = vld [vmem:[%s5443_s0 + $0x2c] sm:$0xf] }
  0xf6   : > { %v1637_v4 = vadd.f32 %v1636_v51, %v1634_v58  ;;  %v1653_v5 = vmul.f32 %v3639_v47, %v1635_v41  ;;  %v1655_v7 = vmul.f32 %v3640_v55, %v1638_v52  ;;  %v1667_v8 = vstv %s5102_s26  ;;  %s5149_s26 = sld [smem:[#allocation4 + $0x3f]] }
  0xf7   : > { %v1556_v9 = vrot.slane %v1548_v0, %v4833_v21  ;;  %v1644_v6 = vadd.f32 %v1643_v59, %v1642_v1  ;;  %v1650_v10 = vadd.f32 %v1649_v2, %v1618_v54  ;;  %v1668_v12 = vmul.f32 %v3645_v63, %v1667_v8 }
  0xf8   : > { %v1640_v13 = vadd.f32 %v1639_v56, %v1637_v4  ;;  %v1670_v15 = vstv %s5104_s21  ;;  %v1673_v16 = vstv %s5107_s27  ;;  %v1676_v17 = vstv %s5114_s30 }
  0xf9   : > { %v1557_v18 = vcombine.high %v1556_v9, %v1556_v9  ;;  %v1646_v19 = vadd.f32 %v1645_v61, %v1644_v6  ;;  %v1652_v20 = vadd.f32 %v1651_v3, %v1650_v10  ;;  %v1671_v23 = vmul.f32 %v3646_v11, %v1670_v15  ;;  %v3658_v61 = vld [vmem:[%s5443_s0 + $0x3c] sm:$0xf] }
  0xfa   : > { %v1669_v25 = vadd.f32 %v1668_v12, %v1640_v13  ;;  %v1674_v26 = vmul.f32 %v3647_v14, %v1673_v16  ;;  %v1679_v27 = vmul.f32 %v3646_v11, %v1667_v8  ;;  %v1681_v32 = vmul.f32 %v3647_v14, %v1670_v15  ;;  %v1775_v11 = vld [vmem:[%s5451_s8] sm:$0xf] }
  0xfb   : > { %v3624_v28 = vpack.c.bf16 %v1557_v18, %v1556_v9  ;;  %v1648_v29 = vadd.f32 %v1647_v62, %v1646_v19  ;;  %v1654_v30 = vadd.f32 %v1653_v5, %v1652_v20  ;;  %v1677_v34 = vmul.f32 %v3648_v22, %v1676_v17  ;;  %v3659_v62 = vld [vmem:[%s5443_s0 + $0x4c] sm:$0xf] }
  0xfc   : > { %v1672_v33 = vadd.f32 %v1671_v23, %v1669_v25  ;;  %v1683_v35 = vmul.f32 %v3648_v22, %v1673_v16  ;;  %v1687_v36 = vmul.f32 %v3647_v14, %v1667_v8  ;;  %v1689_v41 = vmul.f32 %v3648_v22, %v1670_v15 }
  0xfd   : > { %v1571_v38 = vrot.slane %v3624_v28, %v4842_v24  ;;  %v1656_v39 = vadd.f32 %v1655_v7, %v1654_v30  ;;  %v1680_v40 = vadd.f32 %v1679_v27, %v1648_v29  ;;  %v1685_v44 = vmul.f32 %v3649_v31, %v1676_v17 }
  0xfe   : > { %v1675_v43 = vadd.f32 %v1674_v26, %v1672_v33  ;;  %v1691_v45 = vmul.f32 %v3649_v31, %v1673_v16  ;;  %v1705_v46 = vstv %s5132_s23  ;;  %v1708_v51 = vstv %s5135_s15  ;;  %v3660_v16 = vld [vmem:[%s5443_s0 + $0x5c] sm:$0xf] }
  0xff   : > { %3625 = vst.sshfl [vmem:[#allocation2 + $0x4] sm:$0x5 pattern:$0x73625140] %v1571_v38  ;;  %v1682_v47 = vadd.f32 %v1681_v32, %v1680_v40  ;;  %v1688_v48 = vadd.f32 %v1687_v36, %v1656_v39  ;;  %v1706_v50 = vmul.f32 %v3655_v37, %v1705_v46  ;;  %v1709_v54 = vmul.f32 %v3656_v49, %v1708_v51 }
 0x100   : > { %v1678_v52 = vadd.f32 %v1677_v34, %v1675_v43  ;;  %v1711_v55 = vstv %s5141_s28  ;;  %v1714_v56 = vstv %s5149_s26  ;;  %v1693_v59 = vmul.f32 %v3650_v42, %v1676_v17 }
 0x101   : > { %v1684_v57 = vadd.f32 %v1683_v35, %v1682_v47  ;;  %v1690_v58 = vadd.f32 %v1689_v41, %v1688_v48  ;;  %v1712_v0 = vmul.f32 %v3657_v53, %v1711_v55  ;;  %v1715_v1 = vmul.f32 %v3658_v61, %v1714_v56 }
 0x102   : > { %v1707_v63 = vadd.f32 %v1706_v50, %v1678_v52  ;;  %v1717_v2 = vmul.f32 %v3656_v49, %v1705_v46  ;;  %v1719_v5 = vmul.f32 %v3657_v53, %v1708_v51  ;;  %v1725_v7 = vmul.f32 %v3657_v53, %v1705_v46 }
 0x103   : > { %v1686_v3 = vadd.f32 %v1685_v44, %v1684_v57  ;;  %v1692_v4 = vadd.f32 %v1691_v45, %v1690_v58  ;;  %v1721_v9 = vmul.f32 %v3658_v61, %v1711_v55  ;;  %v1723_v6 = vmul.f32 %v3659_v62, %v1714_v56 }
 0x104   : > { %v1710_v8 = vadd.f32 %v1709_v54, %v1707_v63  ;;  %v1727_v10 = vmul.f32 %v3658_v61, %v1708_v51  ;;  %v1729_v14 = vmul.f32 %v3659_v62, %v1711_v55  ;;  %v1779_v15 = vsub.s32 0, %v4814_v60 }
 0x105   : > { %v1694_v12 = vadd.f32 %v1693_v59, %v1692_v4  ;;  %v1718_v13 = vadd.f32 %v1717_v2, %v1686_v3  ;;  %v1783_v18 = vsub.s32 1, %v4814_v60  ;;  %v1787_v19 = vsub.s32 2, %v4814_v60 }
 0x106   : > { %v1713_v17 = vadd.f32 %v1712_v0, %v1710_v8  ;;  %v1791_v20 = vsub.s32 3, %v4814_v60  ;;  %v1734_v25 = vstv %s5169_s25  ;;  %v1780_v26 = vrot.slane %v1775_v11, %v1779_v15 }
 0x107   : > { %v1720_v22 = vadd.f32 %v1719_v5, %v1718_v13  ;;  %v1726_v23 = vadd.f32 %v1725_v7, %v1694_v12  ;;  %v1784_v28 = vrot.slane %v1775_v11, %v1783_v18  ;;  %v1788_v29 = vrot.slane %v1775_v11, %v1787_v19 }
 0x108   : > { %v1716_v27 = vadd.f32 %v1715_v1, %v1713_v17  ;;  %v1792_v30 = vrot.slane %v1775_v11, %v1791_v20  ;;  %v1731_v33 = vmul.f32 %v3660_v16, %v1714_v56 }
 0x109   : > { %v1722_v31 = vadd.f32 %v1721_v9, %v1720_v22  ;;  %v1728_v32 = vadd.f32 %v1727_v10, %v1726_v23  ;;  %v1793_v35 = vcombine.low %v1780_v26, %v1784_v28 }
 0x10a   : > { %v1735_v34 = vadd.f32 %v1734_v25, %v1716_v27  ;;  %v1794_v36 = vcombine.low %v1788_v29, %v1792_v30 }
 0x10b   : > { %v1724_v37 = vadd.f32 %v1723_v6, %v1722_v31  ;;  %v1730_v38 = vadd.f32 %v1729_v14, %v1728_v32  ;;  %v1801_v39 = vrot.slane %v1793_v35, %v4833_v21 }
 0x10c   : > { %v1808_v60 = vrot.slane %v1794_v36, %v4833_v21  ;;  %v1736_v41 = vmax.f32 %v1735_v34, 0.0 }
 0x10d   : > { %v1732_v40 = vadd.f32 %v1731_v33, %v1730_v38  ;;  %v1737_v42 = vadd.f32 %v1734_v25, %v1724_v37 }
 0x10e   : > { %v1809_v43 = vcombine.low %v1801_v39, %v1808_v60 }
 0x10f   : > { %v1738_v44 = vmax.f32 %v1737_v42, 0.0  ;;  %v1739_v45 = vadd.f32 %v1734_v25, %v1732_v40 }
 0x110   : > { %1811 = vst [vmem:[#allocation3] sm:$0xff] %v1809_v43 }
 0x111   : > { %v1740_v46 = vmax.f32 %v1739_v45, 0.0  ;;  %v1741_v47 = vmax.f32 %v1736_v41, %v1738_v44 }
 0x113   : > { %v1742_v48 = vmax.f32 %v1741_v47, %v1740_v46 }
 0x115   : > { %v1750_v49 = vrot.slane %v1742_v48, %v4833_v21 }
 0x117   : > { %v1751_v50 = vcombine.high %v1750_v49, %v1750_v49 }
 0x119   : > { %v3666_v51 = vpack.c.bf16 %v1751_v50, %v1750_v49 }
 0x11b   : > { %v1765_v52 = vrot.slane %v3666_v51, %v4842_v24 }
 0x11d   : > { %3667 = vst.sshfl [vmem:[#allocation2 + $0x6] sm:$0x5 pattern:$0x73625140] %v1765_v52 }
 0x11e PF: > { %v3914_v53 = vld [vmem:[%s4666_s24 + $0x74] ss:$8 sps:$4 sm:$0xff]   ;;  %v3918_v21 = vld [vmem:[%s4666_s24 + $0x70] ss:$8 sps:$4 sm:$0xff]   ;;  %v3920_v24 = vld [vmem:[%s4666_s24 + $0x64] ss:$8 sps:$4 sm:$0xff]   ;;  %v1943_v26 = vlaneseq  ;;  %s5469_s17 = scalar_lea.vmem %s5447_s4, %s5476_s18  ;;  %s5470_s20 = scalar_lea.vmem %s5448_s5, %s5476_s18 }
 0x11f   : > { %v3916_v54 = vld [vmem:[%s4666_s24 + $0x174] ss:$8 sps:$4 sm:$0xff]   ;;  %2651 = vmatprep.subr.bf16.mxu0 %v3914_v53  ;;  %v3919_v55 = vld [vmem:[%s4666_s24 + $0x170] ss:$8 sps:$4 sm:$0xff]   ;;  %v3922_v56 = vld [vmem:[%s4666_s24 + $0x164] ss:$8 sps:$4 sm:$0xff]   ;;  %s5471_s14 = scalar_lea.vmem %s5449_s6, %s5476_s18 }
 0x120   : > { %2692 = vmatprep.subr.bf16.mxu1 %v3916_v54  ;;  %2652 = vmatpush1.bf16.msra.mxu0 %v3918_v21  ;;  %v3924_v57 = vld [vmem:[%s4666_s24 + $0x60] ss:$8 sps:$4 sm:$0xff]   ;;  %v3926_v59 = vld [vmem:[%s4666_s24 + $0x54] ss:$8 sps:$4 sm:$0xff]   ;;  %v3930_v62 = vld [vmem:[%s4666_s24 + $0x50] ss:$8 sps:$4 sm:$0xff]  }
 0x121   : > { %2693 = vmatpush1.bf16.msra.mxu1 %v3919_v55  ;;  %2653 = vmatprep.subr.bf16.mxu0 %v3920_v24  ;;  %v3925_v58 = vld [vmem:[%s4666_s24 + $0x160] ss:$8 sps:$4 sm:$0xff]   ;;  %v3928_v61 = vld [vmem:[%s4666_s24 + $0x154] ss:$8 sps:$4 sm:$0xff]   ;;  %v3931_v63 = vld [vmem:[%s4666_s24 + $0x150] ss:$8 sps:$4 sm:$0xff]  }
 0x122   : > { %2694 = vmatprep.subr.bf16.mxu1 %v3922_v56  ;;  %v3932_v0 = vld [vmem:[%s4666_s24 + $0x44] ss:$8 sps:$4 sm:$0xff]   ;;  %v3936_v2 = vld [vmem:[%s4666_s24 + $0x40] ss:$8 sps:$4 sm:$0xff]   ;;  %v3938_v4 = vld [vmem:[%s4666_s24 + $0x34] ss:$8 sps:$4 sm:$0xff]  }
 0x123   : > { %v3934_v1 = vld [vmem:[%s4666_s24 + $0x144] ss:$8 sps:$4 sm:$0xff]   ;;  %v3937_v3 = vld [vmem:[%s4666_s24 + $0x140] ss:$8 sps:$4 sm:$0xff]   ;;  %v3940_v5 = vld [vmem:[%s4666_s24 + $0x134] ss:$8 sps:$4 sm:$0xff]  }
 0x124   : > { %2654 = vmatpush1.bf16.msra.mxu0 %v3924_v57  ;;  %v3942_v7 = vld [vmem:[%s4666_s24 + $0x30] ss:$8 sps:$4 sm:$0xff]   ;;  %v3944_v9 = vld [vmem:[%s4666_s24 + $0x24] ss:$8 sps:$4 sm:$0xff]   ;;  %v3948_v10 = vld [vmem:[%s4666_s24 + $0x20] ss:$8 sps:$4 sm:$0xff]  }
 0x125   : > { %2695 = vmatpush1.bf16.msra.mxu1 %v3925_v58  ;;  %2655 = vmatprep.subr.bf16.mxu0 %v3926_v59  ;;  %v3943_v8 = vld [vmem:[%s4666_s24 + $0x130] ss:$8 sps:$4 sm:$0xff]   ;;  %v3946_v6 = vld [vmem:[%s4666_s24 + $0x124] ss:$8 sps:$4 sm:$0xff]   ;;  %v3949_v11 = vld [vmem:[%s4666_s24 + $0x120] ss:$8 sps:$4 sm:$0xff]  }
 0x126   : > { %2696 = vmatprep.subr.bf16.mxu1 %v3928_v61  ;;  %v3950_v12 = vld [vmem:[%s4666_s24 + $0x14] ss:$8 sps:$4 sm:$0xff]   ;;  %v3954_v14 = vld [vmem:[%s4666_s24 + $0x10] ss:$8 sps:$4 sm:$0xff]   ;;  %v3956_v16 = vld [vmem:[%s4666_s24 + $0x4] ss:$8 sps:$4 sm:$0xff]  }
 0x127   : > { %v3952_v13 = vld [vmem:[%s4666_s24 + $0x114] ss:$8 sps:$4 sm:$0xff]   ;;  %v3955_v15 = vld [vmem:[%s4666_s24 + $0x110] ss:$8 sps:$4 sm:$0xff]   ;;  %v3958_v17 = vld [vmem:[%s4666_s24 + $0x104] ss:$8 sps:$4 sm:$0xff]  }
 0x128   : > { %2656 = vmatpush1.bf16.msra.mxu0 %v3930_v62  ;;  %v3960_v18 = vld [vmem:[%s4666_s24] ss:$8 sps:$4 sm:$0xff]   ;;  %v3962_v20 = vld [vmem:[%s4666_s24 + $0xf4] ss:$8 sps:$4 sm:$0xff]   ;;  %v3966_v23 = vld [vmem:[%s4666_s24 + $0xf0] ss:$8 sps:$4 sm:$0xff]  }
 0x129   : > { %2697 = vmatpush1.bf16.msra.mxu1 %v3931_v63  ;;  %2657 = vmatprep.subr.bf16.mxu0 %v3932_v0  ;;  %v3961_v19 = vld [vmem:[%s4666_s24 + $0x100] ss:$8 sps:$4 sm:$0xff]   ;;  %v3964_v22 = vld [vmem:[%s4666_s24 + $0x1f4] ss:$8 sps:$4 sm:$0xff]   ;;  %v3967_v25 = vld [vmem:[%s4666_s24 + $0x1f0] ss:$8 sps:$4 sm:$0xff]  }
 0x12a   : > { %2698 = vmatprep.subr.bf16.mxu1 %v3934_v1  ;;  %v4273_v27 = vmov 1966171168   ;;  %v3968_v29 = vld [vmem:[%s4666_s24 + $0xe4] ss:$8 sps:$4 sm:$0xff]   ;;  %v3972_v31 = vld [vmem:[%s4666_s24 + $0xe0] ss:$8 sps:$4 sm:$0xff]  }
 0x12b   : > { %v1956_v28 = vunpack.c.l.s4 %v4273_v27  ;;  %v3970_v30 = vld [vmem:[%s4666_s24 + $0x1e4] ss:$8 sps:$4 sm:$0xff]   ;;  %v5236_v32 = vshrl.u32 %v1943_v26, 7  ;;  %v3973_v34 = vld [vmem:[%s4666_s24 + $0x1e0] ss:$8 sps:$4 sm:$0xff]   ;;  %v1812_v41 = vld [vmem:[#allocation2] sm:$0xff] }
 0x12c   : > { %2658 = vmatpush1.bf16.msra.mxu0 %v3936_v2  ;;  %v3974_v35 = vld [vmem:[%s4666_s24 + $0xd4] ss:$8 sps:$4 sm:$0xff]   ;;  %v3978_v37 = vld [vmem:[%s4666_s24 + $0xd0] ss:$8 sps:$4 sm:$0xff]   ;;  %v3980_v60 = vld [vmem:[%s4666_s24 + $0xc4] ss:$8 sps:$4 sm:$0xff]   ;;  %v1954_v43 = vcombine.high %v1812_v41, %v1812_v41 }
 0x12d   : > { %2699 = vmatpush1.bf16.msra.mxu1 %v3937_v3  ;;  %2659 = vmatprep.subr.bf16.mxu0 %v3938_v4  ;;  %v1957_v33 = vunpack.c.0.s8 %v1956_v28  ;;  %v3976_v36 = vld [vmem:[%s4666_s24 + $0x1d4] ss:$8 sps:$4 sm:$0xff]   ;;  %v3979_v38 = vld [vmem:[%s4666_s24 + $0x1d0] ss:$8 sps:$4 sm:$0xff]   ;;  %v3982_v40 = vld [vmem:[%s4666_s24 + $0x1c4] ss:$8 sps:$4 sm:$0xff]  }
 0x12e   : > { %2700 = vmatprep.subr.bf16.mxu1 %v3940_v5  ;;  %v3984_v42 = vld [vmem:[%s4666_s24 + $0xc0] ss:$8 sps:$4 sm:$0xff]   ;;  %v3986_v46 = vld [vmem:[%s4666_s24 + $0xb4] ss:$8 sps:$4 sm:$0xff]   ;;  %v3990_v50 = vld [vmem:[%s4666_s24 + $0xb0] ss:$8 sps:$4 sm:$0xff]  }
 0x12f   : > { %v1960_v39 = vsub.s32 %v1957_v33, %v5236_v32  ;;  %v3985_v45 = vld [vmem:[%s4666_s24 + $0x1c0] ss:$8 sps:$4 sm:$0xff]   ;;  %v3988_v47 = vld [vmem:[%s4666_s24 + $0x1b4] ss:$8 sps:$4 sm:$0xff]   ;;  %v3991_v53 = vld [vmem:[%s4666_s24 + $0x1b0] ss:$8 sps:$4 sm:$0xff]  }
 0x130   : > { %2660 = vmatpush1.bf16.msra.mxu0 %v3942_v7  ;;  %v3992_v54 = vld [vmem:[%s4666_s24 + $0xa4] ss:$8 sps:$4 sm:$0xff]   ;;  %v3996_v24 = vld [vmem:[%s4666_s24 + $0xa0] ss:$8 sps:$4 sm:$0xff]   ;;  %v3998_v57 = vld [vmem:[%s4666_s24 + $0x94] ss:$8 sps:$4 sm:$0xff]  }
 0x131   : > { %2701 = vmatpush1.bf16.msra.mxu1 %v3943_v8  ;;  %2661 = vmatprep.subr.bf16.mxu0 %v3944_v9  ;;  %v1961_v44 = vrot.slane %v1812_v41, %v1960_v39  ;;  %v1968_v49 = vrot.slane %v1954_v43, %v1960_v39  ;;  %v3994_v21 = vld [vmem:[%s4666_s24 + $0x1a4] ss:$8 sps:$4 sm:$0xff]   ;;  %v3997_v56 = vld [vmem:[%s4666_s24 + $0x1a0] ss:$8 sps:$4 sm:$0xff]   ;;  %v4000_v58 = vld [vmem:[%s4666_s24 + $0x194] ss:$8 sps:$4 sm:$0xff]  }
 0x132   : > { %2702 = vmatprep.subr.bf16.mxu1 %v3946_v6  ;;  %v4002_v59 = vld [vmem:[%s4666_s24 + $0x90] ss:$8 sps:$4 sm:$0xff]   ;;  %v4004_v62 = vld [vmem:[%s4666_s24 + $0x84] ss:$8 sps:$4 sm:$0xff]   ;;  %v4008_v1 = vld [vmem:[%s4666_s24 + $0x80] ss:$8 sps:$4 sm:$0xff]  }
 0x133   : > { %v1969_v48 = vcombine.high %v1961_v44, %v1961_v44  ;;  %v5251_v52 = vrot.slane %v1968_v49, %v1960_v39  ;;  %v4003_v61 = vld [vmem:[%s4666_s24 + $0x190] ss:$8 sps:$4 sm:$0xff]   ;;  %v4006_v63 = vld [vmem:[%s4666_s24 + $0x184] ss:$8 sps:$4 sm:$0xff]   ;;  %v1970_v0 = vcombine.high %v1968_v49, %v1968_v49  ;;  %v1977_v2 = vrot.slane %v1961_v44, %v1960_v39  ;;  %v4009_v3 = vld [vmem:[%s4666_s24 + $0x180] ss:$8 sps:$4 sm:$0xff]  }
 0x134   : > { %2662 = vmatpush1.bf16.msra.mxu0 %v3948_v10  ;;  %v4013_v4 = vld [vmem:[%s4666_s24 + $0x274] ss:$8 sps:$4 sm:$0xff]   ;;  %v4011_v9 = vld [vmem:[%s4666_s24 + $0x270] ss:$8 sps:$4 sm:$0xff]   ;;  %v4019_v10 = vld [vmem:[%s4666_s24 + $0x264] ss:$8 sps:$4 sm:$0xff]  }
 0x135   : > { %2703 = vmatpush1.bf16.msra.mxu1 %v3949_v11  ;;  %2663 = vmatprep.subr.bf16.mxu0 %v3950_v12  ;;  %v1991_v51 = vrot.slane %v1969_v48, %v1960_v39  ;;  %v4016_v5 = vld [vmem:[%s4666_s24 + $0x374] ss:$8 sps:$4 sm:$0xff]   ;;  %v1998_v7 = vrot.slane %v1970_v0, %v1960_v39  ;;  %v1999_v8 = vcombine.high %v1977_v2, %v1977_v2  ;;  %v4014_v6 = vld [vmem:[%s4666_s24 + $0x370] ss:$8 sps:$4 sm:$0xff]   ;;  %v4022_v11 = vld [vmem:[%s4666_s24 + $0x364] ss:$8 sps:$4 sm:$0xff]  }
 0x136   : > { %2704 = vmatprep.subr.bf16.mxu1 %v3952_v13  ;;  %v4017_v13 = vld [vmem:[%s4666_s24 + $0x260] ss:$8 sps:$4 sm:$0xff]   ;;  %v4040_v26 = vld [vmem:[%s4666_s24 + $0x334] ss:$8 sps:$4 sm:$0xff]   ;;  %v4035_v27 = vld [vmem:[%s4666_s24 + $0x230] ss:$8 sps:$4 sm:$0xff]  }
 0x137   : > { %v2001_v55 = vcombine.high %v1991_v51, %v1991_v51  ;;  %2683 = vmatprep.mubr.bf16.mxu0 %v1991_v51  ;;  %v2002_v12 = vcombine.high %v1998_v7, %v1998_v7  ;;  %v4038_v28 = vld [vmem:[%s4666_s24 + $0x330] ss:$8 sps:$4 sm:$0xff]   ;;  %v4044_v33 = vld [vmem:[%s4666_s24 + $0x320] ss:$8 sps:$4 sm:$0xff]   ;;  %v4058_v39 = vld [vmem:[%s4666_s24 + $0x304] ss:$8 sps:$4 sm:$0xff]  }
 0x138   : > { %2664 = vmatpush1.bf16.msra.mxu0 %v3954_v14  ;;  %v4020_v14 = vld [vmem:[%s4666_s24 + $0x360] ss:$8 sps:$4 sm:$0xff]   ;;  %v4061_v41 = vld [vmem:[%s4666_s24 + $0x2f4] ss:$8 sps:$4 sm:$0xff]   ;;  %v4059_v43 = vld [vmem:[%s4666_s24 + $0x2f0] ss:$8 sps:$4 sm:$0xff]  }
 0x139   : > { %2705 = vmatpush1.bf16.msra.mxu1 %v3955_v15  ;;  %2665 = vmatprep.subr.bf16.mxu0 %v3956_v16  ;;  %v4025_v15 = vld [vmem:[%s4666_s24 + $0x254] ss:$8 sps:$4 sm:$0xff]   ;;  %v4062_v44 = vld [vmem:[%s4666_s24 + $0x3f0] ss:$8 sps:$4 sm:$0xff]   ;;  %v4068_v48 = vld [vmem:[%s4666_s24 + $0x3e0] ss:$8 sps:$4 sm:$0xff]  }
 0x13a   : > { %2706 = vmatprep.subr.bf16.mxu1 %v3958_v17  ;;  %2724 = vmatprep.mubr.bf16.mxu1 %v2001_v55  ;;  %v4028_v16 = vld [vmem:[%s4666_s24 + $0x354] ss:$8 sps:$4 sm:$0xff]   ;;  %v4023_v17 = vld [vmem:[%s4666_s24 + $0x250] ss:$8 sps:$4 sm:$0xff]   ;;  %v4077_v55 = vld [vmem:[%s4666_s24 + $0x2c0] ss:$8 sps:$4 sm:$0xff]  }
 0x13b   : > { %v4073_v49 = vld [vmem:[%s4666_s24 + $0x2d4] ss:$8 sps:$4 sm:$0xff]   ;;  %v4071_v51 = vld [vmem:[%s4666_s24 + $0x2d0] ss:$8 sps:$4 sm:$0xff]   ;;  %v4092_v0 = vld [vmem:[%s4666_s24 + $0x3a0] ss:$8 sps:$4 sm:$0xff]  }
 0x13c   : > { %2666 = vmatpush1.bf16.msra.mxu0 %v3960_v18  ;;  %v4026_v18 = vld [vmem:[%s4666_s24 + $0x350] ss:$8 sps:$4 sm:$0xff]   ;;  %vm2817_vm0 = vcmask 1041408   ;;  %p3860_p5 = scmp.ne.s32.totalorder %s4341_s12, 1 }
 0x13d   : > { %2707 = vmatpush1.bf16.msra.mxu1 %v3961_v19  ;;  %2667 = vmatprep.subr.bf16.mxu0 %v3962_v20  ;;  %v4031_v19 = vld [vmem:[%s4666_s24 + $0x244] ss:$8 sps:$4 sm:$0xff]  }
 0x13e   : > { %2708 = vmatprep.subr.bf16.mxu1 %v3964_v22  ;;  %v4034_v20 = vld [vmem:[%s4666_s24 + $0x344] ss:$8 sps:$4 sm:$0xff]   ;;  %v4029_v22 = vld [vmem:[%s4666_s24 + $0x240] ss:$8 sps:$4 sm:$0xff]  }
 0x140   : > { %2668 = vmatpush2.bf16.msra.mxu0 %v3966_v23  ;;  %v4032_v23 = vld [vmem:[%s4666_s24 + $0x340] ss:$8 sps:$4 sm:$0xff]  }
 0x141   : > { %2709 = vmatpush2.bf16.msra.mxu1 %v3967_v25  ;;  %2669 = vmatprep.subr.bf16.mxu0 %v3968_v29  ;;  %v4037_v25 = vld [vmem:[%s4666_s24 + $0x234] ss:$8 sps:$4 sm:$0xff]   ;;  %v4043_v29 = vld [vmem:[%s4666_s24 + $0x224] ss:$8 sps:$4 sm:$0xff]  }
 0x142   : > { %2710 = vmatprep.subr.bf16.mxu1 %v3970_v30  ;;  %v4046_v30 = vld [vmem:[%s4666_s24 + $0x324] ss:$8 sps:$4 sm:$0xff]  }
 0x144   : > { %2670 = vmatpush2.bf16.msra.mxu0 %v3972_v31  ;;  %v4041_v31 = vld [vmem:[%s4666_s24 + $0x220] ss:$8 sps:$4 sm:$0xff]  }
 0x145   : > { %2711 = vmatpush2.bf16.msra.mxu1 %v3973_v34  ;;  %2671 = vmatprep.subr.bf16.mxu0 %v3974_v35  ;;  %v4049_v34 = vld [vmem:[%s4666_s24 + $0x214] ss:$8 sps:$4 sm:$0xff]  }
 0x146   : > { %2712 = vmatprep.subr.bf16.mxu1 %v3976_v36  ;;  %v4052_v35 = vld [vmem:[%s4666_s24 + $0x314] ss:$8 sps:$4 sm:$0xff]   ;;  %v4047_v36 = vld [vmem:[%s4666_s24 + $0x210] ss:$8 sps:$4 sm:$0xff]  }
 0x148   : > { %2672 = vmatpush2.bf16.msra.mxu0 %v3978_v37  ;;  %v4050_v37 = vld [vmem:[%s4666_s24 + $0x310] ss:$8 sps:$4 sm:$0xff]  }
 0x149   : > { %2713 = vmatpush2.bf16.msra.mxu1 %v3979_v38  ;;  %2673 = vmatprep.subr.bf16.mxu0 %v3980_v60  ;;  %v4055_v38 = vld [vmem:[%s4666_s24 + $0x204] ss:$8 sps:$4 sm:$0xff]   ;;  %v4053_v60 = vld [vmem:[%s4666_s24 + $0x200] ss:$8 sps:$4 sm:$0xff]  }
 0x14a   : > { %2714 = vmatprep.subr.bf16.mxu1 %v3982_v40  ;;  %v4056_v40 = vld [vmem:[%s4666_s24 + $0x300] ss:$8 sps:$4 sm:$0xff]  }
 0x14c   : > { %2674 = vmatpush2.bf16.msra.mxu0 %v3984_v42  ;;  %v4064_v42 = vld [vmem:[%s4666_s24 + $0x3f4] ss:$8 sps:$4 sm:$0xff]  }
 0x14d   : > { %2715 = vmatpush2.bf16.msra.mxu1 %v3985_v45  ;;  %2675 = vmatprep.subr.bf16.mxu0 %v3986_v46  ;;  %v4067_v45 = vld [vmem:[%s4666_s24 + $0x2e4] ss:$8 sps:$4 sm:$0xff]  }
 0x14e   : > { %2716 = vmatprep.subr.bf16.mxu1 %v3988_v47  ;;  %v4070_v46 = vld [vmem:[%s4666_s24 + $0x3e4] ss:$8 sps:$4 sm:$0xff]   ;;  %v4065_v47 = vld [vmem:[%s4666_s24 + $0x2e0] ss:$8 sps:$4 sm:$0xff]  }
 0x150   : > { %2676 = vmatpush2.bf16.msra.mxu0 %v3990_v50  ;;  %v4076_v50 = vld [vmem:[%s4666_s24 + $0x3d4] ss:$8 sps:$4 sm:$0xff]  }
 0x151   : > { %2717 = vmatpush2.bf16.msra.mxu1 %v3991_v53  ;;  %2677 = vmatprep.subr.bf16.mxu0 %v3992_v54  ;;  %v4074_v53 = vld [vmem:[%s4666_s24 + $0x3d0] ss:$8 sps:$4 sm:$0xff]   ;;  %v4079_v54 = vld [vmem:[%s4666_s24 + $0x2c4] ss:$8 sps:$4 sm:$0xff]  }
 0x152   : > { %2718 = vmatprep.subr.bf16.mxu1 %v3994_v21  ;;  %v4082_v21 = vld [vmem:[%s4666_s24 + $0x3c4] ss:$8 sps:$4 sm:$0xff]  }
 0x154   : > { %2678 = vmatpush2.bf16.msra.mxu0 %v3996_v24  ;;  %v4080_v24 = vld [vmem:[%s4666_s24 + $0x3c0] ss:$8 sps:$4 sm:$0xff]  }
 0x155   : > { %2719 = vmatpush2.bf16.msra.mxu1 %v3997_v56  ;;  %2679 = vmatprep.subr.bf16.mxu0 %v3998_v57  ;;  %v4085_v56 = vld [vmem:[%s4666_s24 + $0x2b4] ss:$8 sps:$4 sm:$0xff]  }
 0x156   : > { %2720 = vmatprep.subr.bf16.mxu1 %v4000_v58  ;;  %v4088_v57 = vld [vmem:[%s4666_s24 + $0x3b4] ss:$8 sps:$4 sm:$0xff]   ;;  %v4083_v58 = vld [vmem:[%s4666_s24 + $0x2b0] ss:$8 sps:$4 sm:$0xff]  }
 0x158   : > { %2680 = vmatpush2.bf16.msra.mxu0 %v4002_v59  ;;  %v4086_v59 = vld [vmem:[%s4666_s24 + $0x3b0] ss:$8 sps:$4 sm:$0xff]  }
 0x159   : > { %2721 = vmatpush2.bf16.msra.mxu1 %v4003_v61  ;;  %2681 = vmatprep.subr.bf16.mxu0 %v4004_v62  ;;  %v4091_v61 = vld [vmem:[%s4666_s24 + $0x2a4] ss:$8 sps:$4 sm:$0xff]  }
 0x15a   : > { %2722 = vmatprep.subr.bf16.mxu1 %v4006_v63  ;;  %v4094_v62 = vld [vmem:[%s4666_s24 + $0x3a4] ss:$8 sps:$4 sm:$0xff]   ;;  %v4089_v63 = vld [vmem:[%s4666_s24 + $0x2a0] ss:$8 sps:$4 sm:$0xff]  }
 0x15c   : > { %2682 = vmatpush2.bf16.msra.mxu0 %v4008_v1  ;;  %v4097_v1 = vld [vmem:[%s4666_s24 + $0x294] ss:$8 sps:$4 sm:$0xff]  }
 0x15d   : > { %2723 = vmatpush2.bf16.msra.mxu1 %v4009_v3  ;;  %2733 = vmatprep.subr.bf16.mxu0 %v4013_v4  ;;  %v4095_v3 = vld [vmem:[%s4666_s24 + $0x290] ss:$8 sps:$4 sm:$0xff]  }
 0x15e   : > { %2774 = vmatprep.subr.bf16.mxu1 %v4016_v5  ;;  %v4098_v4 = vld [vmem:[%s4666_s24 + $0x390] ss:$8 sps:$4 sm:$0xff]   ;;  %v4103_v5 = vld [vmem:[%s4666_s24 + $0x284] ss:$8 sps:$4 sm:$0xff]  }
 0x15f   : > { %2684 = vmatmul.mubr.bf16.vlgmr.msra.gmra.mxu0 %v1977_v2  ;;  %v4100_v2 = vld [vmem:[%s4666_s24 + $0x394] ss:$8 sps:$4 sm:$0xff]  }
 0x160   : > { %2725 = vmatmul.mubr.bf16.vlgmr.msra.gmra.mxu1 %v1999_v8  ;;  %2734 = vmatpush1.bf16.msra.mxu0 %v4011_v9  ;;  %v4101_v8 = vld [vmem:[%s4666_s24 + $0x280] ss:$8 sps:$4 sm:$0xff]  }
 0x161   : > { %2775 = vmatpush1.bf16.msra.mxu1 %v4014_v6  ;;  %2735 = vmatprep.subr.bf16.mxu0 %v4019_v10  ;;  %v4104_v9 = vld [vmem:[%s4666_s24 + $0x380] ss:$8 sps:$4 sm:$0xff]   ;;  %v2000_v6 = vcombine.high %v5251_v52, %v5251_v52  ;;  %v4109_v10 = vld [vmem:[%s4687_s11 + $0xe4] ss:$16 sps:$4 sm:$0xff]  }
 0x162   : > { %2776 = vmatprep.subr.bf16.mxu1 %v4022_v11  ;;  %2765 = vmatprep.mubr.bf16.mxu0 %v1998_v7  ;;  %v4106_v7 = vld [vmem:[%s4666_s24 + $0x384] ss:$8 sps:$4 sm:$0xff]  }
 0x163   : > { %2806 = vmatprep.mubr.bf16.mxu1 %v2002_v12  ;;  %v4112_v11 = vld [vmem:[%s4687_s11 + $0xec] ss:$16 sps:$4 sm:$0xff]   ;;  %v4107_v12 = vld [vmem:[%s4687_s11 + $0xe0] ss:$16 sps:$4 sm:$0xff]  }
 0x164   : > { %2736 = vmatpush1.bf16.msra.mxu0 %v4017_v13  ;;  %v4110_v13 = vld [vmem:[%s4687_s11 + $0xe8] ss:$16 sps:$4 sm:$0xff]  }
 0x165   : > { %2777 = vmatpush1.bf16.msra.mxu1 %v4020_v14  ;;  %2737 = vmatprep.subr.bf16.mxu0 %v4025_v15  ;;  %v4115_v14 = vld [vmem:[%s4687_s11 + $0xc4] ss:$16 sps:$4 sm:$0xff]   ;;  %v4118_v15 = vld [vmem:[%s4687_s11 + $0xcc] ss:$16 sps:$4 sm:$0xff]  }
 0x166   : > { %2778 = vmatprep.subr.bf16.mxu1 %v4028_v16  ;;  %v4113_v16 = vld [vmem:[%s4687_s11 + $0xc0] ss:$16 sps:$4 sm:$0xff]  }
 0x168   : > { %2738 = vmatpush1.bf16.msra.mxu0 %v4023_v17  ;;  %v4121_v17 = vld [vmem:[%s4687_s11 + $0xa4] ss:$16 sps:$4 sm:$0xff]  }
 0x169   : > { %2779 = vmatpush1.bf16.msra.mxu1 %v4026_v18  ;;  %2739 = vmatprep.subr.bf16.mxu0 %v4031_v19  ;;  %v4124_v18 = vld [vmem:[%s4687_s11 + $0xac] ss:$16 sps:$4 sm:$0xff]   ;;  %v4119_v19 = vld [vmem:[%s4687_s11 + $0xa0] ss:$16 sps:$4 sm:$0xff]  }
 0x16a   : > { %2780 = vmatprep.subr.bf16.mxu1 %v4034_v20  ;;  %v4122_v20 = vld [vmem:[%s4687_s11 + $0xa8] ss:$16 sps:$4 sm:$0xff]  }
 0x16c   : > { %2740 = vmatpush1.bf16.msra.mxu0 %v4029_v22  ;;  %v4127_v22 = vld [vmem:[%s4687_s11 + $0x84] ss:$16 sps:$4 sm:$0xff]  }
 0x16d   : > { %2781 = vmatpush1.bf16.msra.mxu1 %v4032_v23  ;;  %2741 = vmatprep.subr.bf16.mxu0 %v4037_v25  ;;  %v4130_v23 = vld [vmem:[%s4687_s11 + $0x8c] ss:$16 sps:$4 sm:$0xff]   ;;  %v4125_v25 = vld [vmem:[%s4687_s11 + $0x80] ss:$16 sps:$4 sm:$0xff]  }
 0x16e   : > { %2782 = vmatprep.subr.bf16.mxu1 %v4040_v26  ;;  %v4128_v26 = vld [vmem:[%s4687_s11 + $0x88] ss:$16 sps:$4 sm:$0xff]  }
 0x170   : > { %2742 = vmatpush1.bf16.msra.mxu0 %v4035_v27  ;;  %v4133_v27 = vld [vmem:[%s4687_s11 + $0x64] ss:$16 sps:$4 sm:$0xff]  }
 0x171   : > { %2783 = vmatpush1.bf16.msra.mxu1 %v4038_v28  ;;  %2743 = vmatprep.subr.bf16.mxu0 %v4043_v29  ;;  %v4136_v28 = vld [vmem:[%s4687_s11 + $0x6c] ss:$16 sps:$4 sm:$0xff]   ;;  %v4131_v29 = vld [vmem:[%s4687_s11 + $0x60] ss:$16 sps:$4 sm:$0xff]  }
 0x172   : > { %2784 = vmatprep.subr.bf16.mxu1 %v4046_v30  ;;  %v4134_v30 = vld [vmem:[%s4687_s11 + $0x68] ss:$16 sps:$4 sm:$0xff]  }
 0x174   : > { %2744 = vmatpush1.bf16.msra.mxu0 %v4041_v31  ;;  %v4139_v31 = vld [vmem:[%s4687_s11 + $0x44] ss:$16 sps:$4 sm:$0xff]  }
 0x175   : > { %2785 = vmatpush1.bf16.msra.mxu1 %v4044_v33  ;;  %2745 = vmatprep.subr.bf16.mxu0 %v4049_v34  ;;  %v4142_v33 = vld [vmem:[%s4687_s11 + $0x4c] ss:$16 sps:$4 sm:$0xff]   ;;  %v4137_v34 = vld [vmem:[%s4687_s11 + $0x40] ss:$16 sps:$4 sm:$0xff]  }
 0x176   : > { %2786 = vmatprep.subr.bf16.mxu1 %v4052_v35  ;;  %v4140_v35 = vld [vmem:[%s4687_s11 + $0x48] ss:$16 sps:$4 sm:$0xff]  }
 0x178   : > { %2746 = vmatpush1.bf16.msra.mxu0 %v4047_v36  ;;  %v4145_v36 = vld [vmem:[%s4687_s11 + $0x24] ss:$16 sps:$4 sm:$0xff]  }
 0x179   : > { %2787 = vmatpush1.bf16.msra.mxu1 %v4050_v37  ;;  %2747 = vmatprep.subr.bf16.mxu0 %v4055_v38  ;;  %v4148_v37 = vld [vmem:[%s4687_s11 + $0x2c] ss:$16 sps:$4 sm:$0xff]   ;;  %v4143_v38 = vld [vmem:[%s4687_s11 + $0x20] ss:$16 sps:$4 sm:$0xff]  }
 0x17a   : > { %2788 = vmatprep.subr.bf16.mxu1 %v4058_v39  ;;  %v4146_v39 = vld [vmem:[%s4687_s11 + $0x28] ss:$16 sps:$4 sm:$0xff]  }
 0x17c   : > { %2748 = vmatpush1.bf16.msra.mxu0 %v4053_v60  ;;  %v4151_v60 = vld [vmem:[%s4687_s11 + $0x4] ss:$16 sps:$4 sm:$0xff]  }
 0x17d   : > { %2789 = vmatpush1.bf16.msra.mxu1 %v4056_v40  ;;  %2749 = vmatprep.subr.bf16.mxu0 %v4061_v41  ;;  %v4154_v40 = vld [vmem:[%s4687_s11 + $0xc] ss:$16 sps:$4 sm:$0xff]   ;;  %v4149_v41 = vld [vmem:[%s4687_s11] ss:$16 sps:$4 sm:$0xff]  }
 0x17e   : > { %2790 = vmatprep.subr.bf16.mxu1 %v4064_v42  ;;  %v4152_v42 = vld [vmem:[%s4687_s11 + $0x8] ss:$16 sps:$4 sm:$0xff]  }
 0x180   : > { %2750 = vmatpush2.bf16.msra.mxu0 %v4059_v43  ;;  %v4157_v43 = vld [vmem:[%s4687_s11 + $0x1e4] ss:$16 sps:$4 sm:$0xff]  }
 0x181   : > { %2791 = vmatpush2.bf16.msra.mxu1 %v4062_v44  ;;  %2751 = vmatprep.subr.bf16.mxu0 %v4067_v45  ;;  %v4160_v44 = vld [vmem:[%s4687_s11 + $0x1ec] ss:$16 sps:$4 sm:$0xff]   ;;  %v4155_v45 = vld [vmem:[%s4687_s11 + $0x1e0] ss:$16 sps:$4 sm:$0xff]  }
 0x182   : > { %2792 = vmatprep.subr.bf16.mxu1 %v4070_v46  ;;  %v4158_v46 = vld [vmem:[%s4687_s11 + $0x1e8] ss:$16 sps:$4 sm:$0xff]  }
 0x184   : > { %2752 = vmatpush2.bf16.msra.mxu0 %v4065_v47  ;;  %v4163_v47 = vld [vmem:[%s4687_s11 + $0x1c4] ss:$16 sps:$4 sm:$0xff]  }
 0x185   : > { %2793 = vmatpush2.bf16.msra.mxu1 %v4068_v48  ;;  %2753 = vmatprep.subr.bf16.mxu0 %v4073_v49  ;;  %v4166_v48 = vld [vmem:[%s4687_s11 + $0x1cc] ss:$16 sps:$4 sm:$0xff]   ;;  %v4161_v49 = vld [vmem:[%s4687_s11 + $0x1c0] ss:$16 sps:$4 sm:$0xff]  }
 0x186   : > { %2794 = vmatprep.subr.bf16.mxu1 %v4076_v50  ;;  %v4164_v50 = vld [vmem:[%s4687_s11 + $0x1c8] ss:$16 sps:$4 sm:$0xff]  }
 0x188   : > { %2754 = vmatpush2.bf16.msra.mxu0 %v4071_v51  ;;  %v4169_v51 = vld [vmem:[%s4687_s11 + $0x1a4] ss:$16 sps:$4 sm:$0xff]  }
 0x189   : > { %2795 = vmatpush2.bf16.msra.mxu1 %v4074_v53  ;;  %2755 = vmatprep.subr.bf16.mxu0 %v4079_v54  ;;  %v4172_v53 = vld [vmem:[%s4687_s11 + $0x1ac] ss:$16 sps:$4 sm:$0xff]   ;;  %v4167_v54 = vld [vmem:[%s4687_s11 + $0x1a0] ss:$16 sps:$4 sm:$0xff]  }
 0x18a   : > { %2796 = vmatprep.subr.bf16.mxu1 %v4082_v21  ;;  %v4170_v21 = vld [vmem:[%s4687_s11 + $0x1a8] ss:$16 sps:$4 sm:$0xff]  }
 0x18c   : > { %2756 = vmatpush2.bf16.msra.mxu0 %v4077_v55  ;;  %v4175_v55 = vld [vmem:[%s4687_s11 + $0x184] ss:$16 sps:$4 sm:$0xff]  }
 0x18d   : > { %2797 = vmatpush2.bf16.msra.mxu1 %v4080_v24  ;;  %2757 = vmatprep.subr.bf16.mxu0 %v4085_v56  ;;  %v4178_v24 = vld [vmem:[%s4687_s11 + $0x18c] ss:$16 sps:$4 sm:$0xff]   ;;  %v4173_v56 = vld [vmem:[%s4687_s11 + $0x180] ss:$16 sps:$4 sm:$0xff]  }
 0x18e   : > { %2798 = vmatprep.subr.bf16.mxu1 %v4088_v57  ;;  %v4176_v57 = vld [vmem:[%s4687_s11 + $0x188] ss:$16 sps:$4 sm:$0xff]  }
 0x190   : > { %2758 = vmatpush2.bf16.msra.mxu0 %v4083_v58  ;;  %v4181_v58 = vld [vmem:[%s4687_s11 + $0x164] ss:$16 sps:$4 sm:$0xff]  }
 0x191   : > { %2799 = vmatpush2.bf16.msra.mxu1 %v4086_v59  ;;  %2759 = vmatprep.subr.bf16.mxu0 %v4091_v61  ;;  %v4184_v59 = vld [vmem:[%s4687_s11 + $0x16c] ss:$16 sps:$4 sm:$0xff]   ;;  %v4179_v61 = vld [vmem:[%s4687_s11 + $0x160] ss:$16 sps:$4 sm:$0xff]  }
 0x192   : > { %2800 = vmatprep.subr.bf16.mxu1 %v4094_v62  ;;  %v4182_v62 = vld [vmem:[%s4687_s11 + $0x168] ss:$16 sps:$4 sm:$0xff]  }
 0x194   : > { %2760 = vmatpush2.bf16.msra.mxu0 %v4089_v63  ;;  %v4187_v63 = vld [vmem:[%s4687_s11 + $0x144] ss:$16 sps:$4 sm:$0xff]  }
 0x195   : > { %2801 = vmatpush2.bf16.msra.mxu1 %v4092_v0  ;;  %2761 = vmatprep.subr.bf16.mxu0 %v4097_v1  ;;  %v4190_v0 = vld [vmem:[%s4687_s11 + $0x14c] ss:$16 sps:$4 sm:$0xff]   ;;  %v4185_v1 = vld [vmem:[%s4687_s11 + $0x140] ss:$16 sps:$4 sm:$0xff]  }
 0x196   : > { %2802 = vmatprep.subr.bf16.mxu1 %v4100_v2  ;;  %v4188_v2 = vld [vmem:[%s4687_s11 + $0x148] ss:$16 sps:$4 sm:$0xff]  }
 0x198   : > { %2762 = vmatpush2.bf16.msra.mxu0 %v4095_v3  ;;  %v4193_v3 = vld [vmem:[%s4687_s11 + $0x124] ss:$16 sps:$4 sm:$0xff]  }
 0x199   : > { %2803 = vmatpush2.bf16.msra.mxu1 %v4098_v4  ;;  %2763 = vmatprep.subr.bf16.mxu0 %v4103_v5  ;;  %v4196_v4 = vld [vmem:[%s4687_s11 + $0x12c] ss:$16 sps:$4 sm:$0xff]   ;;  %v4191_v5 = vld [vmem:[%s4687_s11 + $0x120] ss:$16 sps:$4 sm:$0xff]  }
 0x19a   : > { %2804 = vmatprep.subr.bf16.mxu1 %v4106_v7  ;;  %v4194_v7 = vld [vmem:[%s4687_s11 + $0x128] ss:$16 sps:$4 sm:$0xff]  }
 0x19c   : > { %2764 = vmatpush2.bf16.msra.mxu0 %v4101_v8  ;;  %v4199_v8 = vld [vmem:[%s4687_s11 + $0x104] ss:$16 sps:$4 sm:$0xff]  }
 0x19d   : > { %2805 = vmatpush2.bf16.msra.mxu1 %v4104_v9  ;;  %3276 = vmatprep.subr.bf16.mxu0 %v4109_v10  ;;  %v4202_v9 = vld [vmem:[%s4687_s11 + $0x10c] ss:$16 sps:$4 sm:$0xff]   ;;  %v4200_v10 = vld [vmem:[%s4687_s11 + $0x108] ss:$16 sps:$4 sm:$0xff]  }
 0x19e   : > { %3317 = vmatprep.subr.bf16.mxu1 %v4112_v11 }
 0x19f   : > { %2766 = vmatmul.mubr.bf16.vlgmr.msra.gmra.mxu0 %v5251_v52  ;;  %v4116_v52 = vld [vmem:[%s4687_s11 + $0xc8] ss:$16 sps:$4 sm:$0xff]  }
 0x1a0   : > { %2807 = vmatmul.mubr.bf16.vlgmr.msra.gmra.mxu1 %v2000_v6  ;;  %3277 = vmatpush1.bf16.msra.mxu0 %v4107_v12  ;;  %v4197_v6 = vld [vmem:[%s4687_s11 + $0x100] ss:$16 sps:$4 sm:$0xff]  }
 0x1a1   : > { %3318 = vmatpush1.bf16.msra.mxu1 %v4110_v13  ;;  %3278 = vmatprep.subr.bf16.mxu0 %v4115_v14 }
 0x1a2   : > { %3319 = vmatprep.subr.bf16.mxu1 %v4118_v15 }
 0x1a4   : > { %3279 = vmatpush1.bf16.msra.mxu0 %v4113_v16 }
 0x1a5   : > { %3320 = vmatpush1.bf16.msra.mxu1 %v4116_v52  ;;  %3280 = vmatprep.subr.bf16.mxu0 %v4121_v17 }
 0x1a6   : > { %3321 = vmatprep.subr.bf16.mxu1 %v4124_v18  ;;  %v5398_v18 = vsub.s32 0, %v5236_v32 }
 0x1a8   : > { %3281 = vmatpush1.bf16.msra.mxu0 %v4119_v19  ;;  %v1941_v19 = vld [vmem:[%s5469_s17] sm:$0x3] }
 0x1a9   : > { %3322 = vmatpush1.bf16.msra.mxu1 %v4122_v20  ;;  %3282 = vmatprep.subr.bf16.mxu0 %v4127_v22  ;;  %v5406_v20 = vsub.s32 1, %v5236_v32  ;;  %v1946_v22 = vrot.slane %v1941_v19, %v5398_v18 }
 0x1aa   : > { %3323 = vmatprep.subr.bf16.mxu1 %v4130_v23 }
 0x1ab   : > { %v1950_v23 = vrot.slane %v1941_v19, %v5406_v20 }
 0x1ac   : > { %3283 = vmatpush1.bf16.msra.mxu0 %v4125_v25 }
 0x1ad   : > { %3324 = vmatpush1.bf16.msra.mxu1 %v4128_v26  ;;  %3284 = vmatprep.subr.bf16.mxu0 %v4133_v27 }
 0x1ae   : > { %3325 = vmatprep.subr.bf16.mxu1 %v4136_v28 }
 0x1b0   : > { %3285 = vmatpush1.bf16.msra.mxu0 %v4131_v29 }
 0x1b1   : > { %3326 = vmatpush1.bf16.msra.mxu1 %v4134_v30  ;;  %3286 = vmatprep.subr.bf16.mxu0 %v4139_v31 }
 0x1b2   : > { %3327 = vmatprep.subr.bf16.mxu1 %v4142_v33 }
 0x1b4   : > { %3287 = vmatpush1.bf16.msra.mxu0 %v4137_v34 }
 0x1b5   : > { %3328 = vmatpush1.bf16.msra.mxu1 %v4140_v35  ;;  %3288 = vmatprep.subr.bf16.mxu0 %v4145_v36 }
 0x1b6   : > { %3329 = vmatprep.subr.bf16.mxu1 %v4148_v37 }
 0x1b8   : > { %3289 = vmatpush1.bf16.msra.mxu0 %v4143_v38 }
 0x1b9   : > { %3330 = vmatpush1.bf16.msra.mxu1 %v4146_v39  ;;  %3290 = vmatprep.subr.bf16.mxu0 %v4151_v60 }
 0x1ba   : > { %3331 = vmatprep.subr.bf16.mxu1 %v4154_v40 }
 0x1bc   : > { %3291 = vmatpush1.bf16.msra.mxu0 %v4149_v41 }
 0x1bd   : > { %3332 = vmatpush1.bf16.msra.mxu1 %v4152_v42  ;;  %3292 = vmatprep.subr.bf16.mxu0 %v4157_v43 }
 0x1be   : > { %3333 = vmatprep.subr.bf16.mxu1 %v4160_v44 }
 0x1c0   : > { %3293 = vmatpush2.bf16.msra.mxu0 %v4155_v45 }
 0x1c1   : > { %3334 = vmatpush2.bf16.msra.mxu1 %v4158_v46  ;;  %3294 = vmatprep.subr.bf16.mxu0 %v4163_v47 }
 0x1c2   : > { %3335 = vmatprep.subr.bf16.mxu1 %v4166_v48 }
 0x1c4   : > { %3295 = vmatpush2.bf16.msra.mxu0 %v4161_v49 }
 0x1c5   : > { %3336 = vmatpush2.bf16.msra.mxu1 %v4164_v50  ;;  %3296 = vmatprep.subr.bf16.mxu0 %v4169_v51 }
 0x1c6   : > { %3337 = vmatprep.subr.bf16.mxu1 %v4172_v53 }
 0x1c8   : > { %3297 = vmatpush2.bf16.msra.mxu0 %v4167_v54 }
 0x1c9   : > { %3338 = vmatpush2.bf16.msra.mxu1 %v4170_v21  ;;  %3298 = vmatprep.subr.bf16.mxu0 %v4175_v55 }
 0x1ca   : > { %3339 = vmatprep.subr.bf16.mxu1 %v4178_v24 }
 0x1cc   : > { %3299 = vmatpush2.bf16.msra.mxu0 %v4173_v56 }
 0x1cd   : > { %3340 = vmatpush2.bf16.msra.mxu1 %v4176_v57  ;;  %3300 = vmatprep.subr.bf16.mxu0 %v4181_v58 }
 0x1ce   : > { %3341 = vmatprep.subr.bf16.mxu1 %v4184_v59 }
 0x1d0   : > { %3301 = vmatpush2.bf16.msra.mxu0 %v4179_v61 }
 0x1d1   : > { %3342 = vmatpush2.bf16.msra.mxu1 %v4182_v62  ;;  %3302 = vmatprep.subr.bf16.mxu0 %v4187_v63 }
 0x1d2   : > { %3343 = vmatprep.subr.bf16.mxu1 %v4190_v0 }
 0x1d4   : > { %3303 = vmatpush2.bf16.msra.mxu0 %v4185_v1 }
 0x1d5   : > { %3344 = vmatpush2.bf16.msra.mxu1 %v4188_v2  ;;  %3304 = vmatprep.subr.bf16.mxu0 %v4193_v3 }
 0x1d6   : > { %3345 = vmatprep.subr.bf16.mxu1 %v4196_v4 }
 0x1d8   : > { %3305 = vmatpush2.bf16.msra.mxu0 %v4191_v5 }
 0x1d9   : > { %3346 = vmatpush2.bf16.msra.mxu1 %v4194_v7  ;;  %3306 = vmatprep.subr.bf16.mxu0 %v4199_v8 }
 0x1da   : > { %3347 = vmatprep.subr.bf16.mxu1 %v4202_v9 }
 0x1dc   : > { %3307 = vmatpush2.bf16.msra.mxu0 %v4197_v6 }
 0x1dd   : > { %3348 = vmatpush2.bf16.msra.mxu1 %v4200_v10 }
 0x21f   : > { %v2685_v11 = vpop.f32.mrf.mxu0 }
 0x220   : > { %v2726_v12 = vpop.f32.mrf.mxu1  ;;  %v2686_v25 = vadd.f32 %v2685_v11, %v1946_v22 }
 0x221   : > { %v2687_v13 = vpop.f32.mrf.mxu0 }
 0x222   : > { %v2728_v14 = vpop.f32.mrf.mxu1  ;;  %v2688_v26 = vadd.f32 %v2687_v13, %v1950_v23  ;;  %v2727_v27 = vadd.f32 %v2726_v12, %v2686_v25 }
 0x223   : > { %v2689_v15 = vpop.f32.mrf.mxu0 }
 0x224   : > { %v2730_v16 = vpop.f32.mrf.mxu1  ;;  %v2729_v30 = vadd.f32 %v2728_v14, %v2688_v26 }
 0x225   : > { %v2690_v52 = vpop.f32.mrf.mxu0 }
 0x226   : > { %v2731_v17 = vpop.f32.mrf.mxu1  ;;  %v2861_v52 = vld [vmem:[%s5470_s20] sm:$0x3] }
 0x227   : > { %v2875_v17 = vld [vmem:[%s5471_s14] sm:$0x3]  ;;  %v2866_v19 = vrot.slane %v2861_v52, %v5398_v18  ;;  %v2870_v25 = vrot.slane %v2861_v52, %v5406_v20 }
 0x228   : > { %v2880_v26 = vrot.slane %v2875_v17, %v5398_v18 }
 0x25f   : > { %v2767_v28 = vpop.f32.mrf.mxu0 }
 0x260   : > { %v2808_v29 = vpop.f32.mrf.mxu1  ;;  %v2768_v31 = vadd.f32 %v2767_v28, %v2727_v27 }
 0x261   : > { %v2769_v33 = vpop.f32.mrf.mxu0 }
 0x262   : > { %v2810_v34 = vpop.f32.mrf.mxu1  ;;  %v2809_v35 = vadd.f32 %v2808_v29, %v2768_v31  ;;  %v2770_v36 = vadd.f32 %v2769_v33, %v2729_v30  ;;  %v2884_v30 = vrot.slane %v2875_v17, %v5406_v20 }
 0x263   : > { %v2771_v37 = vpop.f32.mrf.mxu0 }
 0x264   : > { %v2812_v38 = vpop.f32.mrf.mxu1  ;;  %v2815_v39 = vmax.f32 %v2809_v35, 0.0  ;;  %v2811_v60 = vadd.f32 %v2810_v34, %v2770_v36  ;;  %v4274_v37 = vmov 1983009808  }
 0x265   : > { %v2772_v40 = vpop.f32.mrf.mxu0  ;;  %v3365_v38 = vunpack.c.l.s4 %v4274_v37 }
 0x266   : > { %v2813_v41 = vpop.f32.mrf.mxu1  ;;  %v2818_v42 = vsel %vm2817_vm0, %v2815_v39, 0.0  ;;  %v2816_v43 = vmax.f32 %v2811_v60, 0.0 }
 0x267   : > { %v2819_v44 = vrot.slane %v2818_v42, 4 }
 0x268   : > { %v2825_v45 = vsel %vm2817_vm0, %v2816_v43, 0.0 }
 0x269   : > { %v2820_v46 = vadd.f32 %v2819_v44, %v2818_v42  ;;  %v2826_v47 = vrot.slane %v2825_v45, 4 }
 0x26b   : > { %v2821_v48 = vrot.slane %v2820_v46, 2  ;;  %v2827_v49 = vadd.f32 %v2826_v47, %v2825_v45 }
 0x26d   : > { %v2822_v50 = vadd.f32 %v2821_v48, %v2820_v46  ;;  %v2828_v51 = vrot.slane %v2827_v49, 2  ;;  %v2889_v48 = vld [vmem:[#allocation3] sm:$0xff] }
 0x26f   : > { %v2823_v53 = vrot.slane %v2822_v50, 1  ;;  %v2829_v54 = vadd.f32 %v2828_v51, %v2827_v49 }
 0x271   : > { %v2824_v21 = vadd.f32 %v2823_v53, %v2822_v50  ;;  %v2830_v55 = vrot.slane %v2829_v54, 1 }
 0x273   : > { %v2833_v24 = vmul.f32 0.5, %v2824_v21  ;;  %v2831_v56 = vadd.f32 %v2830_v55, %v2829_v54 }
 0x275   : > { %v2835_v57 = vsub.f32 %v2815_v39, %v2833_v24  ;;  %v2834_v58 = vmul.f32 0.5, %v2831_v56  ;;  %v3366_v39 = vunpack.c.0.s8 %v3365_v38 }
 0x277   : > { %v2837_v59 = vmul.f32 %v2835_v57, %v2835_v57  ;;  %v2836_v61 = vsub.f32 %v2816_v43, %v2834_v58  ;;  %v3369_v18 = vsub.s32 %v3366_v39, %v5236_v32 }
 0x279   : > { %v2839_v62 = vsel %vm2817_vm0, %v2837_v59, 0.0  ;;  %v2838_v63 = vmul.f32 %v2836_v61, %v2836_v61 }
 0x27a   : > { %v2840_v0 = vrot.slane %v2839_v62, 4 }
 0x27b   : > { %v2846_v1 = vsel %vm2817_vm0, %v2838_v63, 0.0 }
 0x27c   : > { %v2841_v2 = vadd.f32 %v2840_v0, %v2839_v62  ;;  %v2847_v3 = vrot.slane %v2846_v1, 4 }
 0x27e   : > { %v2842_v4 = vrot.slane %v2841_v2, 2  ;;  %v2848_v5 = vadd.f32 %v2847_v3, %v2846_v1 }
 0x280   : > { %v2843_v7 = vadd.f32 %v2842_v4, %v2841_v2  ;;  %v2849_v8 = vrot.slane %v2848_v5, 2 }
 0x282   : > { %v2844_v9 = vrot.slane %v2843_v7, 1  ;;  %v2850_v6 = vadd.f32 %v2849_v8, %v2848_v5 }
 0x284   : > { %v2845_v10 = vadd.f32 %v2844_v9, %v2843_v7  ;;  %v2851_v11 = vrot.slane %v2850_v6, 1 }
 0x286   : > { %v2853_v12 = vmul.f32 0.5, %v2845_v10  ;;  %v2852_v13 = vadd.f32 %v2851_v11, %v2850_v6 }
 0x288   : > { %v2855_v14 = vadd.f32 1e-05, %v2853_v12  ;;  %v2854_v15 = vmul.f32 0.5, %v2852_v13 }
 0x28a   : > { %4203 = vrsqrt.f32 %v2855_v14  ;;  %v2856_v16 = vadd.f32 1e-05, %v2854_v15 }
 0x28c   : > { %4205 = vrsqrt.f32 %v2856_v16 }
 0x297   : > { %v4204_v22 = vpop.eup %4203 }
 0x298   : > { %v2859_v23 = vmul.f32 %v4204_v22, %v2835_v57 }
 0x299   : > { %v4206_v27 = vpop.eup %4205 }
 0x29a   : > { %v2873_v28 = vmul.f32 %v2866_v19, %v2859_v23  ;;  %v2860_v29 = vmul.f32 %v4206_v27, %v2836_v61 }
 0x29c   : > { %v2874_v31 = vmul.f32 %v2870_v25, %v2860_v29  ;;  %v2887_v33 = vadd.f32 %v2880_v26, %v2873_v28 }
 0x29e   : > { %v2888_v34 = vadd.f32 %v2884_v30, %v2874_v31  ;;  %v2890_v36 = vpack.c.bf16 %v2887_v33, %v2887_v33 }
 0x2a0   : > { %v2891_v35 = vpack.c.bf16 %v2888_v34, %v2888_v34 }
 0x2a2   : > { %3308 = vmatprep.mubr.bf16.mxu0 %v2891_v35  ;;  %3349 = vmatprep.mubr.bf16.mxu1 %v2891_v35 }
 0x2a3   : > { %3309 = vmatmul.mubr.bf16.vlgmr.msra.gmra.mxu0 %v2890_v36  ;;  %3350 = vmatmul.mubr.bf16.vlgmr.msra.gmra.mxu1 %v2890_v36 }
 0x363   : > { %v3310_v60 = vpop.f32.mrf.mxu0  ;;  %v3351_v40 = vpop.f32.mrf.mxu1 }
 0x365   : > { %v3312_v41 = vpop.f32.mrf.mxu0  ;;  %v3353_v42 = vpop.f32.mrf.mxu1 }
 0x366   : > { %v3362_v43 = vcombine.low %v3310_v60, %v3312_v41  ;;  %v3363_v20 = vcombine.low %v3351_v40, %v3353_v42 }
 0x367   : > { %v3314_v44 = vpop.f32.mrf.mxu0  ;;  %v3355_v45 = vpop.f32.mrf.mxu1 }
 0x368   : > { %v3370_v46 = vrot.slane %v3362_v43, %v3369_v18  ;;  %v3377_v47 = vrot.slane %v3363_v20, %v3369_v18 }
 0x369   : > { %v3315_v49 = vpop.f32.mrf.mxu0  ;;  %v3356_v50 = vpop.f32.mrf.mxu1 }
 0x36a   : > { %v3378_v51 = vcombine.low %v3370_v46, %v3377_v47  ;;  %3385 = sbr.rel (%p3860_p5) target bundleno = 887 (0x377), region = 110 }
 0x36c   : > { %v3380_v53 = vadd.f32 %v3378_v51, %v2889_v48 }
 0x36e   : > { %3381 = vst [vmem:[#allocation3] sm:$0xff] %v3380_v53 }
 0x375   : > { %v3386_v54 = vld [vmem:[#allocation3] sm:$0xff] }
 0x376   : > { %3387 = vst [vmem:[%s5452_s9] sm:$0xff] %v3386_v54 }
 0x377 PF: > { %p18_p9 = scmp.ge.s32.totalorder %s4344_s13, 4   ;;  %s5472_s30 = smov %s4263_s10 }
 0x378   : > { %s5473_s10 = smov %s4354_s16  ;;  %s5474_s11 = smov %s4344_s13 }
 0x379   :  { %20 = sbr.rel (!%p18_p9) target bundleno = 6 (0x6), region = 177 }
 0x37e   :  { %3399 = vsyncpa [#allocation5], 1 }
 0x37f   :  { %3401 = vsyncpa [#allocation5 + $0x1], 1 }
 0x380   :  { %3402 = vsyncpa [#allocation7], 1 }

</bundles_post_ra>
